<compile_context>
chip_gen: v7x
topology: tpu7x:2x2x1
jax: 0.10.0
libtpu: 0.0.40
codegen_flags: <defaults>
</compile_context>

<pallas_src>
import functools

import jax
import jax.numpy as jnp
from jax.experimental import pallas as pl
from jax.experimental.pallas import tpu as pltpu


# ----------------------------- Pallas kernel -------------------------------


def _kan_kernel(x_ref, c_ref, w_ref, o_ref, feat_ref,
                *, spline_order, nb0, in_features):
    """One (batch_tile, out_tile) tile of KANLinear forward.

    x_ref   : (TB, IN)                  input tile
    c_ref   : (2+3K, NB0*IN)            packed grid constants, rows =
                                        [g_lo | g_hi | rl(K) | gr(K) | rr(K)]
                                        (knot-major, feature-minor along lanes)
    w_ref   : ((GK+1)*IN, OUT_TILE)     fused [base | spline] weight, lane-dense cols
    o_ref   : (TB, OUT_TILE)            output tile
    feat_ref: (TB, (GK+1)*IN) scratch   cached [silu | bases] feature slab
    """
    K = spline_order

    # Recompute the feature slab only once per batch tile (out axis is the
    # inner, "arbitrary" grid axis, so j==0 is visited first for every i).
    @pl.when(pl.program_id(1) == 0)
    def _():
        x = x_ref[...].astype(jnp.float32)                   # (TB, IN)
        silu = x * jax.nn.sigmoid(x)

        # Replicate x across the NB0 lane groups: x_rep[:, j*IN + i] = x[:, i].
        x_rep = jnp.concatenate([x] * nb0, axis=-1)          # (TB, NB0*IN)

        c = c_ref[...]                                       # (2+3K, NB0*IN)
        g_lo = c[0:1, :]                                     # lower knots  g[j]
        g_hi = c[1:2, :]                                     # upper knots  g[j+1]
        rl = c[2:2 + K, :]                                   # 1/(g[j+k]-g[j])
        gr = c[2 + K:2 + 2 * K, :]                           # g[j+k+1]
        rr = c[2 + 2 * K:2 + 3 * K, :]                       # 1/(g[j+k+1]-g[j+1])

        # Degree-0 indicator bases, packed lane-major (half-open intervals, as
        # in the PyTorch reference: x exactly equal to the top knot gets 0).
        bases = jnp.logical_and(x_rep >= g_lo, x_rep < g_hi).astype(jnp.float32)

        # Cox-de Boor recursion on the packed layout; divisions replaced by
        # precomputed (guarded) reciprocals.  K is tiny -> unrolled at trace time.
        for k in range(1, K + 1):
            wk = (nb0 - k) * in_features
            xk = x_rep[:, :wk]
            left = (xk - g_lo[:, :wk]) * rl[k - 1:k, :wk]
            right = (gr[k - 1:k, :wk] - xk) * rr[k - 1:k, :wk]
            bases = (left * bases[:, :wk]
                     + right * bases[:, in_features:wk + in_features])
        # bases now has width GK*IN with bases[:, c*IN + i] = B_c(x_i).

        feat = jnp.concatenate([silu, bases], axis=-1)       # (TB, (GK+1)*IN)
        feat_ref[...] = feat.astype(feat_ref.dtype)          # single cast (f32/bf16)

    # Single fused MXU matmul: [silu | bases] @ [base_w | spline_w].
    o_ref[...] = jnp.dot(feat_ref[...], w_ref[...],
                         preferred_element_type=jnp.float32).astype(o_ref.dtype)


# ----------------------------- wrapper --------------------------------------


def kan_linear_forward(x, grid, base_weight, spline_weight, spline_scaler,
                       spline_order, *, batch_tile=128, out_tile=None,
                       matmul_dtype=None, vmem_limit_bytes=None):
    """Pallas implementation of KANLinear.forward.

    x             : (batch, in_features)
    grid          : (in_features, G + 2K + 1)
    base_weight   : (out_features, in_features)
    spline_weight : (out_features, in_features, G + K)
    spline_scaler : (out_features, in_features)

    batch_tile      : rows per grid step (multiple of 8; pick as large as VMEM allows)
    out_tile        : output columns per grid step (multiple of 128); None = all (padded)
    matmul_dtype    : e.g. jnp.bfloat16 to run the fused matmul in bf16 (f32 accumulate)
    vmem_limit_bytes: raise the scoped VMEM limit for large tiles / resident weights
    """
    batch, in_features = x.shape
    out_features = base_weight.shape[0]
    n_coef = spline_weight.shape[-1]               # GK = G + K
    n_grid_pts = grid.shape[-1]                    # NG = G + 2K + 1
    nb0 = n_grid_pts - 1                           # number of degree-0 bases
    nbw = nb0 * in_features

    assert batch_tile % 8 == 0, "batch_tile must be a multiple of 8"

    # ---- pad batch to a multiple of batch_tile ------------------------------
    batch_pad = ((batch + batch_tile - 1) // batch_tile) * batch_tile
    x_in = jnp.pad(x, ((0, batch_pad - batch), (0, 0))) if batch_pad != batch else x

    # ---- lane-dense (128-padded) output -------------------------------------
    if out_tile is None:
        out_tile = ((out_features + 127) // 128) * 128
    assert out_tile % 128 == 0, "out_tile must be a multiple of 128"
    out_pad = ((out_features + out_tile - 1) // out_tile) * out_tile

    # ---- fused weight: rows = [silu | B_0 | ... | B_{GK-1}] per feature ------
    scaled_spline_w = spline_weight * spline_scaler[..., None]           # (OUT, IN, GK)
    spline_rows = jnp.transpose(scaled_spline_w, (2, 1, 0)).reshape(
        n_coef * in_features, out_features)                              # (GK*IN, OUT)
    w_fused = jnp.concatenate([base_weight.T, spline_rows], axis=0)      # ((GK+1)*IN, OUT)
    w_fused = jnp.pad(w_fused, ((0, 0), (0, out_pad - out_features)))
    if matmul_dtype is not None:
        w_fused = w_fused.astype(matmul_dtype)
    k_feat = (n_coef + 1) * in_features

    # ---- packed grid constants (knot-major, feature-minor along lanes) -------
    grid_t = grid.T.astype(jnp.float32)                                  # (NG, IN)
    g_lo = grid_t[:nb0].reshape(1, nbw)
    g_hi = grid_t[1:nb0 + 1].reshape(1, nbw)

    def safe_recip(d):
        # Cox-de Boor convention: 0 for degenerate (repeated) knots.
        return jnp.where(d == 0, 0.0, 1.0 / jnp.where(d == 0, 1.0, d))

    rl_rows, gr_rows, rr_rows = [], [], []
    for k in range(1, spline_order + 1):
        n = nb0 - k
        pad = nbw - n * in_features
        dl = grid_t[k:k + n] - grid_t[:n]                                # (n, IN)
        dr = grid_t[k + 1:k + 1 + n] - grid_t[1:1 + n]                   # (n, IN)
        rl_rows.append(jnp.pad(safe_recip(dl).reshape(-1), (0, pad)))
        gr_rows.append(jnp.pad(grid_t[k + 1:k + 1 + n].reshape(-1), (0, pad)))
        rr_rows.append(jnp.pad(safe_recip(dr).reshape(-1), (0, pad)))
    consts = jnp.concatenate(
        [g_lo, g_hi, jnp.stack(rl_rows), jnp.stack(gr_rows), jnp.stack(rr_rows)],
        axis=0)                                                          # (2+3K, nbw)
    n_const_rows = 2 + 3 * spline_order

    kernel = functools.partial(
        _kan_kernel, spline_order=spline_order, nb0=nb0, in_features=in_features)

    n_bt = batch_pad // batch_tile
    n_ot = out_pad // out_tile
    feat_dtype = w_fused.dtype

    out = pl.pallas_call(
        kernel,
        out_shape=jax.ShapeDtypeStruct((batch_pad, out_pad), x.dtype),
        grid_spec=pltpu.PrefetchScalarGridSpec(
            num_scalar_prefetch=0,
            grid=(n_bt, n_ot),
            in_specs=[
                pl.BlockSpec((batch_tile, in_features), lambda i, j: (i, 0)),
                pl.BlockSpec((n_const_rows, nbw), lambda i, j: (0, 0)),
                pl.BlockSpec((k_feat, out_tile), lambda i, j: (0, j)),
            ],
            out_specs=pl.BlockSpec((batch_tile, out_tile), lambda i, j: (i, j)),
            scratch_shapes=[pltpu.VMEM((batch_tile, k_feat), feat_dtype)],
        ),
        compiler_params=pltpu.CompilerParams(
            dimension_semantics=("parallel", "arbitrary"),
            vmem_limit_bytes=vmem_limit_bytes,
        ),
    )(x_in, consts, w_fused)

    return out[:batch, :out_features]


# ----------------------------- pure-JAX reference ----------------------------


def kan_linear_reference(x, grid, base_weight, spline_weight, spline_scaler,
                         spline_order):
    silu = x * jax.nn.sigmoid(x)
    base_out = silu @ base_weight.T

    xg = x[..., None]                                                    # (B, IN, 1)
    bases = jnp.logical_and(xg >= grid[:, :-1], xg < grid[:, 1:]).astype(x.dtype)
    for k in range(1, spline_order + 1):
        bases = (
            (xg - grid[:, :-(k + 1)])
            / (grid[:, k:-1] - grid[:, :-(k + 1)]) * bases[..., :-1]
            + (grid[:, k + 1:] - xg)
            / (grid[:, k + 1:] - grid[:, 1:-k]) * bases[..., 1:]
        )
    scaled = spline_weight * spline_scaler[..., None]
    spline_out = bases.reshape(x.shape[0], -1) @ scaled.reshape(
        base_weight.shape[0], -1).T
    return base_out + spline_out


# ----------------------------- main -----------------------------------------


if __name__ == "__main__":
    # Module hyperparameters (defaults of KANLinear).
    in_features = 16
    out_features = 32
    grid_size = 5
    spline_order = 3
    grid_range = (-1.0, 1.0)

    batch = 256            # small demo batch; 2 grid steps at batch_tile=128
    batch_tile = 128

    n_coef = grid_size + spline_order              # 8
    n_grid_pts = grid_size + 2 * spline_order + 1  # 12

    # Spline grid buffer (same for every input feature, like the PyTorch expand).
    h = (grid_range[1] - grid_range[0]) / grid_size
    grid_1d = (jnp.arange(-spline_order, grid_size + spline_order + 1,
                          dtype=jnp.float32) * h + grid_range[0])
    grid = jnp.broadcast_to(grid_1d, (in_features, n_grid_pts))

    # Deterministic synthetic parameter init (shapes from __init__; not a checkpoint).
    # TODO(synk): curve2coeff-based init (torch.linalg.lstsq) is training-time
    # setup, not part of forward; synthetic uniform init is used here instead.
    key = jax.random.PRNGKey(0)
    k_x, k_bw, k_sw, k_ss = jax.random.split(key, 4)

    bound = 1.0 / jnp.sqrt(jnp.float32(in_features))
    base_weight = jax.random.uniform(
        k_bw, (out_features, in_features), jnp.float32, -bound, bound)
    spline_weight = jax.random.uniform(
        k_sw, (out_features, in_features, n_coef), jnp.float32,
        -0.1 / grid_size, 0.1 / grid_size)
    spline_scaler = jax.random.uniform(
        k_ss, (out_features, in_features), jnp.float32, -bound, bound)

    x = jax.random.uniform(k_x, (batch, in_features), jnp.float32, -0.95, 0.95)

    out = kan_linear_forward(x, grid, base_weight, spline_weight, spline_scaler,
                             spline_order, batch_tile=batch_tile)
    out = jax.block_until_ready(out)

    ref = kan_linear_reference(x, grid, base_weight, spline_weight,
                               spline_scaler, spline_order)
    ref = jax.block_until_ready(ref)

    assert out.shape == (batch, out_features)
    assert jnp.allclose(out, ref, atol=1e-4, rtol=1e-4), (
        f"max abs diff = {jnp.max(jnp.abs(out - ref))}")

    print("KERNEL_OK")
</pallas_src>

<mosaic_0001>
module attributes {stable_mosaic.version = 11 : i64} {
  func.func @_kan_kernel(%arg0: i32, %arg1: i32, %arg2: memref<128x16xf32, #tpu.memory_space<vmem>>, %arg3: memref<11x176xf32, #tpu.memory_space<vmem>>, %arg4: memref<144x128xf32, #tpu.memory_space<vmem>>, %arg5: memref<128x128xf32, #tpu.memory_space<vmem>>, %arg6: memref<128x144xf32, #tpu.memory_space<vmem>>) attributes {dimension_semantics = [#tpu.dimension_semantics<parallel>, #tpu.dimension_semantics<arbitrary>], iteration_bounds = array<i64: 2, 1>, scalar_prefetch = 0 : i64, scratch_operands = 1 : i64, tpu.core_type = #tpu.core_type<tc>, window_params = [{transform_indices = @transform_0, window_bounds = array<i64: 128, 16>}, {pipeline_mode = #tpu.pipeline_mode<synchronous>, transform_indices = @transform_1, window_bounds = array<i64: 11, 176>}, {transform_indices = @transform_2, window_bounds = array<i64: 144, 128>}, {transform_indices = @transform_3, window_bounds = array<i64: 128, 128>}]} {
    %c0_i32 = arith.constant 0 : i32
    %0 = arith.cmpi eq, %arg1, %c0_i32 : i32
    %1 = arith.extui %0 : i1 to i32
    %c0_i32_0 = arith.constant 0 : i32
    %2 = arith.cmpi ne, %1, %c0_i32_0 : i32
    scf.if %2 {
      %c0_6 = arith.constant 0 : index
      %c0_7 = arith.constant 0 : index
      %7 = vector.load %arg2[%c0_6, %c0_7] : memref<128x16xf32, #tpu.memory_space<vmem>>, vector<128x16xf32>
      %8 = arith.negf %7 : vector<128x16xf32>
      %9 = math.exp %8 : vector<128x16xf32>
      %cst_8 = arith.constant 1.000000e+00 : f32
      %10 = vector.broadcast %cst_8 : f32 to vector<128x16xf32>
      %11 = arith.addf %10, %9 : vector<128x16xf32>
      %12 = arith.divf %10, %11 : vector<128x16xf32>
      %13 = arith.mulf %7, %12 : vector<128x16xf32>
      %14 = tpu.concatenate %7, %7, %7, %7, %7, %7, %7, %7, %7, %7, %7 in 1 : vector<128x16xf32>, vector<128x16xf32>, vector<128x16xf32>, vector<128x16xf32>, vector<128x16xf32>, vector<128x16xf32>, vector<128x16xf32>, vector<128x16xf32>, vector<128x16xf32>, vector<128x16xf32>, vector<128x16xf32> -> vector<128x176xf32>
      %c0_9 = arith.constant 0 : index
      %c0_10 = arith.constant 0 : index
      %15 = vector.load %arg3[%c0_9, %c0_10] : memref<11x176xf32, #tpu.memory_space<vmem>>, vector<11x176xf32>
      %16 = vector.extract_strided_slice %15 {offsets = [0, 0], sizes = [1, 176], strides = [1, 1]} : vector<11x176xf32> to vector<1x176xf32>
      %17 = vector.extract_strided_slice %15 {offsets = [1, 0], sizes = [1, 176], strides = [1, 1]} : vector<11x176xf32> to vector<1x176xf32>
      %18 = vector.extract_strided_slice %15 {offsets = [2, 0], sizes = [3, 176], strides = [1, 1]} : vector<11x176xf32> to vector<3x176xf32>
      %19 = vector.extract_strided_slice %15 {offsets = [5, 0], sizes = [3, 176], strides = [1, 1]} : vector<11x176xf32> to vector<3x176xf32>
      %20 = vector.extract_strided_slice %15 {offsets = [8, 0], sizes = [3, 176], strides = [1, 1]} : vector<11x176xf32> to vector<3x176xf32>
      %21 = vector.broadcast %16 : vector<1x176xf32> to vector<128x176xf32>
      %22 = arith.cmpf oge, %14, %21 : vector<128x176xf32>
      %23 = vector.broadcast %17 : vector<1x176xf32> to vector<128x176xf32>
      %24 = arith.cmpf olt, %14, %23 : vector<128x176xf32>
      %25 = arith.andi %22, %24 : vector<128x176xi1>
      %26 = arith.extui %25 : vector<128x176xi1> to vector<128x176xi32>
      %27 = arith.sitofp %26 : vector<128x176xi32> to vector<128x176xf32>
      %28 = vector.extract_strided_slice %14 {offsets = [0, 0], sizes = [128, 160], strides = [1, 1]} : vector<128x176xf32> to vector<128x160xf32>
      %29 = vector.extract_strided_slice %16 {offsets = [0, 0], sizes = [1, 160], strides = [1, 1]} : vector<1x176xf32> to vector<1x160xf32>
      %30 = vector.broadcast %29 : vector<1x160xf32> to vector<128x160xf32>
      %31 = arith.subf %28, %30 : vector<128x160xf32>
      %32 = vector.extract_strided_slice %18 {offsets = [0, 0], sizes = [1, 160], strides = [1, 1]} : vector<3x176xf32> to vector<1x160xf32>
      %33 = vector.broadcast %32 : vector<1x160xf32> to vector<128x160xf32>
      %34 = arith.mulf %31, %33 : vector<128x160xf32>
      %35 = vector.extract_strided_slice %19 {offsets = [0, 0], sizes = [1, 160], strides = [1, 1]} : vector<3x176xf32> to vector<1x160xf32>
      %36 = vector.broadcast %35 : vector<1x160xf32> to vector<128x160xf32>
      %37 = arith.subf %36, %28 : vector<128x160xf32>
      %38 = vector.extract_strided_slice %20 {offsets = [0, 0], sizes = [1, 160], strides = [1, 1]} : vector<3x176xf32> to vector<1x160xf32>
      %39 = vector.broadcast %38 : vector<1x160xf32> to vector<128x160xf32>
      %40 = arith.mulf %37, %39 : vector<128x160xf32>
      %41 = vector.extract_strided_slice %27 {offsets = [0, 0], sizes = [128, 160], strides = [1, 1]} : vector<128x176xf32> to vector<128x160xf32>
      %42 = arith.mulf %34, %41 : vector<128x160xf32>
      %43 = vector.extract_strided_slice %27 {offsets = [0, 16], sizes = [128, 160], strides = [1, 1]} : vector<128x176xf32> to vector<128x160xf32>
      %44 = arith.mulf %40, %43 : vector<128x160xf32>
      %45 = arith.addf %42, %44 : vector<128x160xf32>
      %46 = vector.extract_strided_slice %14 {offsets = [0, 0], sizes = [128, 144], strides = [1, 1]} : vector<128x176xf32> to vector<128x144xf32>
      %47 = vector.extract_strided_slice %16 {offsets = [0, 0], sizes = [1, 144], strides = [1, 1]} : vector<1x176xf32> to vector<1x144xf32>
      %48 = vector.broadcast %47 : vector<1x144xf32> to vector<128x144xf32>
      %49 = arith.subf %46, %48 : vector<128x144xf32>
      %50 = vector.extract_strided_slice %18 {offsets = [1, 0], sizes = [1, 144], strides = [1, 1]} : vector<3x176xf32> to vector<1x144xf32>
      %51 = vector.broadcast %50 : vector<1x144xf32> to vector<128x144xf32>
      %52 = arith.mulf %49, %51 : vector<128x144xf32>
      %53 = vector.extract_strided_slice %19 {offsets = [1, 0], sizes = [1, 144], strides = [1, 1]} : vector<3x176xf32> to vector<1x144xf32>
      %54 = vector.broadcast %53 : vector<1x144xf32> to vector<128x144xf32>
      %55 = arith.subf %54, %46 : vector<128x144xf32>
      %56 = vector.extract_strided_slice %20 {offsets = [1, 0], sizes = [1, 144], strides = [1, 1]} : vector<3x176xf32> to vector<1x144xf32>
      %57 = vector.broadcast %56 : vector<1x144xf32> to vector<128x144xf32>
      %58 = arith.mulf %55, %57 : vector<128x144xf32>
      %59 = vector.extract_strided_slice %45 {offsets = [0, 0], sizes = [128, 144], strides = [1, 1]} : vector<128x160xf32> to vector<128x144xf32>
      %60 = arith.mulf %52, %59 : vector<128x144xf32>
      %61 = vector.extract_strided_slice %45 {offsets = [0, 16], sizes = [128, 144], strides = [1, 1]} : vector<128x160xf32> to vector<128x144xf32>
      %62 = arith.mulf %58, %61 : vector<128x144xf32>
      %63 = arith.addf %60, %62 : vector<128x144xf32>
      %64 = vector.extract_strided_slice %14 {offsets = [0, 0], sizes = [128, 128], strides = [1, 1]} : vector<128x176xf32> to vector<128x128xf32>
      %65 = vector.extract_strided_slice %16 {offsets = [0, 0], sizes = [1, 128], strides = [1, 1]} : vector<1x176xf32> to vector<1x128xf32>
      %66 = vector.broadcast %65 : vector<1x128xf32> to vector<128x128xf32>
      %67 = arith.subf %64, %66 : vector<128x128xf32>
      %68 = vector.extract_strided_slice %18 {offsets = [2, 0], sizes = [1, 128], strides = [1, 1]} : vector<3x176xf32> to vector<1x128xf32>
      %69 = vector.broadcast %68 : vector<1x128xf32> to vector<128x128xf32>
      %70 = arith.mulf %67, %69 : vector<128x128xf32>
      %71 = vector.extract_strided_slice %19 {offsets = [2, 0], sizes = [1, 128], strides = [1, 1]} : vector<3x176xf32> to vector<1x128xf32>
      %72 = vector.broadcast %71 : vector<1x128xf32> to vector<128x128xf32>
      %73 = arith.subf %72, %64 : vector<128x128xf32>
      %74 = vector.extract_strided_slice %20 {offsets = [2, 0], sizes = [1, 128], strides = [1, 1]} : vector<3x176xf32> to vector<1x128xf32>
      %75 = vector.broadcast %74 : vector<1x128xf32> to vector<128x128xf32>
      %76 = arith.mulf %73, %75 : vector<128x128xf32>
      %77 = vector.extract_strided_slice %63 {offsets = [0, 0], sizes = [128, 128], strides = [1, 1]} : vector<128x144xf32> to vector<128x128xf32>
      %78 = arith.mulf %70, %77 : vector<128x128xf32>
      %79 = vector.extract_strided_slice %63 {offsets = [0, 16], sizes = [128, 128], strides = [1, 1]} : vector<128x144xf32> to vector<128x128xf32>
      %80 = arith.mulf %76, %79 : vector<128x128xf32>
      %81 = arith.addf %78, %80 : vector<128x128xf32>
      %82 = tpu.concatenate %13, %81 in 1 : vector<128x16xf32>, vector<128x128xf32> -> vector<128x144xf32>
      %c0_11 = arith.constant 0 : index
      %c0_12 = arith.constant 0 : index
      %83 = vector.load %arg6[%c0_11, %c0_12] : memref<128x144xf32, #tpu.memory_space<vmem>>, vector<128x144xf32>
      tpu.vector_store %arg6[%c0_11, %c0_12], %82 {strides = array<i32>} : memref<128x144xf32, #tpu.memory_space<vmem>>, vector<128x144xf32>,
    } else {
    }
    %c0 = arith.constant 0 : index
    %c0_1 = arith.constant 0 : index
    %3 = vector.load %arg6[%c0, %c0_1] : memref<128x144xf32, #tpu.memory_space<vmem>>, vector<128x144xf32>
    %c0_2 = arith.constant 0 : index
    %c0_3 = arith.constant 0 : index
    %4 = vector.load %arg4[%c0_2, %c0_3] : memref<144x128xf32, #tpu.memory_space<vmem>>, vector<144x128xf32>
    %cst = arith.constant dense<0.000000e+00> : vector<128x128xf32>
    %5 = tpu.matmul %3, %4, %cst {dimension_numbers = #tpu.dot_dimension_numbers<[1], [0], [0], [1], [0, 0, 1, 1], [], []>} : vector<128x144xf32>, vector<144x128xf32>, vector<128x128xf32> -> vector<128x128xf32>
    %c0_4 = arith.constant 0 : index
    %c0_5 = arith.constant 0 : index
    %6 = vector.load %arg5[%c0_4, %c0_5] : memref<128x128xf32, #tpu.memory_space<vmem>>, vector<128x128xf32>
    tpu.vector_store %arg5[%c0_4, %c0_5], %5 {strides = array<i32>} : memref<128x128xf32, #tpu.memory_space<vmem>>, vector<128x128xf32>,
    return
  }
  func.func @transform_0(%arg0: i32, %arg1: i32) -> (i32, i32) {
    %c0_i32 = arith.constant 0 : i32
    %c0_i32_0 = arith.constant 0 : i32
    return %arg0, %c0_i32 : i32, i32
  }
  func.func @transform_1(%arg0: i32, %arg1: i32) -> (i32, i32) {
    %c0_i32 = arith.constant 0 : i32
    %c0_i32_0 = arith.constant 0 : i32
    %c0_i32_1 = arith.constant 0 : i32
    return %c0_i32, %c0_i32_0 : i32, i32
  }
  func.func @transform_2(%arg0: i32, %arg1: i32) -> (i32, i32) {
    %c0_i32 = arith.constant 0 : i32
    %c0_i32_0 = arith.constant 0 : i32
    return %c0_i32, %arg1 : i32, i32
  }
  func.func @transform_3(%arg0: i32, %arg1: i32) -> (i32, i32) {
    %c0_i32 = arith.constant 0 : i32
    return %arg0, %arg1 : i32, i32
  }
}

</mosaic_0001>

<bundles_post_ra>
// kernel: tpu_custom_call.1
= control target key start
LH: loop header
LB: loop body
LE: loop exit
PB: predicated region body
PF: predicated region fallthrough
CT: control target
= control target key end

     0   :  { %8 = vsyncpa [#allocation4], 0  ;;  %s5039_s0 = inlined_call_operand.vmem [shape: f32[256,16], index: 0, kind: input, shape index: {}]   ;;  %s5040_s1 = inlined_call_operand.vmem [shape: f32[11,176], index: 1, kind: input, shape index: {}]   ;;  %s5041_s2 = inlined_call_operand.vmem [shape: f32[144,128], index: 2, kind: input, shape index: {}]   ;;  %s5042_s3 = inlined_call_operand.hbm [shape: f32[256,128], index: 3, kind: output, shape index: {}]  }
   0x1   :  { %10 = vsyncpa [#allocation4 + $0x1], 0  ;;  %s2912_s12 = smov 0   ;;  %s2914_s13 = smov 0  }
   0x2   :  { %s2916_s14 = smov 0   ;;  %s2918_s15 = smov 0  }
   0x3   :  { %s2920_s16 = smov 0   ;;  %s2922_s17 = smov 0  }
   0x4 LB: > { %s2448_s18 = sadd.s32 4294967295, %s2878_s17   ;;  %s2449_s19 = sadd.s32 4294967294, %s2878_s17   ;;  %s2878_s17 = sphi %s2922_s17, %s16_s17   ;;  %s2874_s16 = sphi %s2920_s16, %s5375_s16   ;;  %s2870_s15 = sphi %s2918_s15, %s5374_s15   ;;  %s2866_s14 = sphi %s2916_s14, %s5373_s14   ;;  %s2862_s13 = sphi %s2914_s13, %s5372_s13   ;;  %s2858_s12 = sphi %s2912_s12, %s5371_s12  }
   0x5   : > { %s28_s20 = sadd.s32 1, %s2874_s16  ;;  %s110_s21 = sadd.s32 1, %s2866_s14 }
   0x6   : > { %p30_p0 = scmp.ge.s32.totalorder %s28_s20, 2  ;;  %p120_p1 = scmp.ne.s32.totalorder %s2866_s14, %s2862_s13 }
   0x7   : > { %p121_p2 = scmp.eq.s32.totalorder %s2448_s18, 1  ;;  %p126_p3 = scmp.ne.s32.totalorder %s2862_s13, %s2858_s12 }
   0x8   : > { %s5377_s20 = smov (%p30_p0, %s28_s20), 0  ;;  %p127_p5 = scmp.eq.s32.totalorder %s2449_s19, 1 }
   0x9   : > { %p2952_p4 = por %p121_p2, %p120_p1  ;;  %s105_s23 = ssub.s32 %s2874_s16, %s5377_s20 }
   0xa   : > { %p2453_p6 = scmp.ge.s32.totalorder %s2878_s17, 1  ;;  %p108_p7 = scmp.eq.s32.totalorder %s105_s23, 0 }
   0xb   : > { %p2959_p8 = por %p127_p5, %p126_p3  ;;  %p164_p9 = scmp.lt.s32.totalorder %s2878_s17, 3 }
   0xc   : > { %s2965_s25 = scalar_select %p108_p7, %s2866_s14, %s110_s21  }
   0xd   : > { %p165_p10 = pnand %p2453_p6, %p164_p9 }
   0xf   : > { %168 = sbr.rel (%p165_p10) target bundleno = 1088 (0x440), region = 32 }
  0x16   : > { %s2455_s26 = sshll.u32 %s2870_s15, 4  ;;  %v810_v0 = vlaneseq  ;;  %v2973_v2 = vld [vmem:[%s5040_s1 + $0x8] sm:$0xff]  ;;  %v809_v4 = vld [vmem:[%s5040_s1 + $0x18] sm:$0x7]  ;;  %s2880_s8 = smov 32   ;;  %v3044_v18 = vld [vmem:[%s5040_s1] sm:$0xff] }
  0x17   : > { %p193_p11 = scmp.lt.s32.totalorder %s2455_s26, 31  ;;  %s2881_s9 = smov 16   ;;  %v808_v21 = vld [vmem:[%s5040_s1 + $0x10] sm:$0x7]  ;;  %vm687_vm0 = vcmask 130048   ;;  %vm704_vm1 = vcmask 261120  }
  0x18   : > { %v2968_v1 = vshrl.u32 %v810_v0, 7  ;;  %s2882_s10 = smov 48   ;;  %s2883_s11 = smov 64   ;;  %v5043_v47 = vmov 0.0   ;;  %vm721_vm14 = vcmask 392192   ;;  %vm738_vm15 = vcmask 523264  }
  0x19   : > { %s5379_s26 = smov (!%p193_p11, %s2455_s26), 31  ;;  %s2884_s18 = smov 80  }
  0x1a   : > { %v1060_v3 = vsub.s32 5, %v2968_v1  ;;  %s2456_s4 = sshll.u32 %s5379_s26, 3  ;;  %v2980_v5 = vsub.s32 1, %v2968_v1  ;;  %v1020_v6 = vsub.s32 2, %v2968_v1  ;;  %v1380_v7 = vsub.s32 3, %v2968_v1  ;;  %s2885_s27 = smov 96  }
  0x1b   : > { %v1420_v8 = vsub.s32 6, %v2968_v1  ;;  %s2988_s7 = scalar_lea.vmem %s5039_s0, %s2456_s4  ;;  %s2886_s28 = smov 112   ;;  %v1760_v25 = vsub.s32 7, %v2968_v1  ;;  %v1740_v28 = vsub.s32 4, %v2968_v1  ;;  %v3181_v36 = vsub.s32 0, %v2968_v1 }
  0x1c   : > { %v2991_v9 = vrot.slane %v2973_v2, %v1060_v3  ;;  %v2994_v10 = vld [vmem:[%s2988_s7] sm:$0xff]  ;;  %v2997_v11 = vrot.slane %v2973_v2, %v1020_v6  ;;  %v3000_v12 = vrot.slane %v2973_v2, %v1380_v7  ;;  %v3006_v14 = vrot.slane %v809_v4, %v2980_v5  ;;  %v3028_v16 = vld [vmem:[%s2988_s7 + $0x48] sm:$0xff]  ;;  %v3086_v26 = vld [vmem:[%s2988_s7 + $0x50] sm:$0xff]  ;;  %s2526_s26 = sshll.u32 %s2870_s15, 11  ;;  %s2889_s6 = smov [#allocation3]  }
  0x1d   : > { %v3003_v13 = vrot.slane %v2973_v2, %v1420_v8  ;;  %399 = vrot.lane.b32.xlu1 %v2994_v10, %s2880_s8  ;;  %351 = vrot.lane.b32.xlu0 %v2994_v10, %s2881_s9  ;;  %v3013_v15 = vld [vmem:[%s2988_s7 + $0x40] sm:$0xff]  ;;  %v3031_v17 = vld [vmem:[%s2988_s7 + $0x8] sm:$0xff]  ;;  %v3047_v19 = vrot.slane %v3044_v18, %v1060_v3  ;;  %v3054_v20 = vrot.slane %v3044_v18, %v1420_v8  ;;  %s4986_s4 = scalar_lea.hbm %s5042_s3, %s2526_s26 }
  0x1e   : > { %5142 = vst [vmem:[#allocation7_spill] sm:$0xff] %v3006_v14  ;;  %v3060_v22 = vrot.slane %v3044_v18, %v1020_v6  ;;  %v3063_v23 = vrot.slane %v3044_v18, %v1380_v7  ;;  %v3070_v24 = vrot.slane %v808_v21, %v2980_v5  ;;  %v3089_v27 = vld [vmem:[%s2988_s7 + $0x10] sm:$0xff]  ;;  %v3093_v29 = vrot.slane %v3044_v18, %v1760_v25  ;;  %v3129_v32 = vld [vmem:[%s2988_s7 + $0x58] sm:$0xff]  ;;  %v3163_v34 = vld [vmem:[%s2988_s7 + $0x60] sm:$0xff] }
  0x1f   : > { %5141 = vst [vmem:[#allocation6_spill] sm:$0xff] %v3003_v13  ;;  %5143 = vst [vmem:[#allocation8_spill] sm:$0xff] %v3054_v20  ;;  %v3096_v30 = vrot.slane %v3044_v18, %v1740_v28  ;;  %v3098_v31 = vrot.slane %v808_v21, %v1020_v6  ;;  %v3132_v33 = vld [vmem:[%s2988_s7 + $0x18] sm:$0xff]  ;;  %v3166_v35 = vld [vmem:[%s2988_s7 + $0x20] sm:$0xff]  ;;  %v3189_v37 = vrot.slane %v2973_v2, %v3181_v36 }
  0x20   : > { %5144 = vst [vmem:[#allocation9_spill] sm:$0xff] %v3063_v23  ;;  %5145 = vst [vmem:[#allocation10_spill] sm:$0xff] %v3070_v24  ;;  %v3193_v38 = vrot.slane %v2973_v2, %v2980_v5  ;;  %v3247_v57 = vld [vmem:[%s2988_s7 + $0x68] sm:$0xff] }
  0x21   : > { %415 = vrot.lane.b32.xlu1 %v3013_v15, %s2880_s8  ;;  %367 = vrot.lane.b32.xlu0 %v3013_v15, %s2881_s9  ;;  %5146 = vst [vmem:[#allocation11_spill] sm:$0xff] %v3093_v29  ;;  %5147 = vst [vmem:[#allocation12_spill] sm:$0xff] %v3096_v30  ;;  %v3250_v58 = vld [vmem:[%s2988_s7 + $0x28] sm:$0xff] }
  0x22   : > { %5148 = vst [vmem:[#allocation13_spill] sm:$0xff] %v3098_v31 }
  0x25   : > { %463 = vrot.lane.b32.xlu1 %v3013_v15, %s2882_s10  ;;  %447 = vrot.lane.b32.xlu0 %v2994_v10, %s2882_s10 }
  0x29   : > { %511 = vrot.lane.b32.xlu1 %v3013_v15, %s2883_s11  ;;  %495 = vrot.lane.b32.xlu0 %v2994_v10, %s2883_s11 }
  0x2d   : > { %369 = vrot.lane.b32.xlu1 %v3028_v16, %s2881_s9  ;;  %353 = vrot.lane.b32.xlu0 %v3031_v17, %s2881_s9 }
  0x31   : > { %559 = vrot.lane.b32.xlu1 %v3013_v15, %s2884_s18  ;;  %543 = vrot.lane.b32.xlu0 %v2994_v10, %s2884_s18 }
  0x35   : > { %417 = vrot.lane.b32.xlu1 %v3028_v16, %s2880_s8  ;;  %401 = vrot.lane.b32.xlu0 %v3031_v17, %s2880_s8 }
  0x39   : > { %607 = vrot.lane.b32.xlu1 %v3013_v15, %s2885_s27  ;;  %591 = vrot.lane.b32.xlu0 %v2994_v10, %s2885_s27 }
  0x3d   : > { %465 = vrot.lane.b32.xlu1 %v3028_v16, %s2882_s10  ;;  %449 = vrot.lane.b32.xlu0 %v3031_v17, %s2882_s10 }
  0x41   : > { %655 = vrot.lane.b32.xlu1 %v3013_v15, %s2886_s28  ;;  %639 = vrot.lane.b32.xlu0 %v2994_v10, %s2886_s28 }
  0x45   : > { %513 = vrot.lane.b32.xlu1 %v3028_v16, %s2883_s11  ;;  %497 = vrot.lane.b32.xlu0 %v3031_v17, %s2883_s11 }
  0x49   : > { %371 = vrot.lane.b32.xlu1 %v3086_v26, %s2881_s9  ;;  %355 = vrot.lane.b32.xlu0 %v3089_v27, %s2881_s9 }
  0x4d   : > { %561 = vrot.lane.b32.xlu1 %v3028_v16, %s2884_s18  ;;  %545 = vrot.lane.b32.xlu0 %v3031_v17, %s2884_s18 }
  0x51   : > { %419 = vrot.lane.b32.xlu1 %v3086_v26, %s2880_s8  ;;  %403 = vrot.lane.b32.xlu0 %v3089_v27, %s2880_s8 }
  0x55   : > { %609 = vrot.lane.b32.xlu1 %v3028_v16, %s2885_s27  ;;  %593 = vrot.lane.b32.xlu0 %v3031_v17, %s2885_s27 }
  0x59   : > { %467 = vrot.lane.b32.xlu1 %v3086_v26, %s2882_s10  ;;  %451 = vrot.lane.b32.xlu0 %v3089_v27, %s2882_s10 }
  0x5d   : > { %657 = vrot.lane.b32.xlu1 %v3028_v16, %s2886_s28  ;;  %641 = vrot.lane.b32.xlu0 %v3031_v17, %s2886_s28 }
  0x61   : > { %515 = vrot.lane.b32.xlu1 %v3086_v26, %s2883_s11  ;;  %499 = vrot.lane.b32.xlu0 %v3089_v27, %s2883_s11 }
  0x65   : > { %373 = vrot.lane.b32.xlu1 %v3129_v32, %s2881_s9  ;;  %357 = vrot.lane.b32.xlu0 %v3132_v33, %s2881_s9 }
  0x69   : > { %563 = vrot.lane.b32.xlu1 %v3086_v26, %s2884_s18  ;;  %547 = vrot.lane.b32.xlu0 %v3089_v27, %s2884_s18 }
  0x6d   : > { %421 = vrot.lane.b32.xlu1 %v3129_v32, %s2880_s8  ;;  %405 = vrot.lane.b32.xlu0 %v3132_v33, %s2880_s8 }
  0x71   : > { %611 = vrot.lane.b32.xlu1 %v3086_v26, %s2885_s27  ;;  %595 = vrot.lane.b32.xlu0 %v3089_v27, %s2885_s27 }
  0x75   : > { %469 = vrot.lane.b32.xlu1 %v3129_v32, %s2882_s10  ;;  %453 = vrot.lane.b32.xlu0 %v3132_v33, %s2882_s10 }
  0x79   : > { %659 = vrot.lane.b32.xlu1 %v3086_v26, %s2886_s28  ;;  %643 = vrot.lane.b32.xlu0 %v3089_v27, %s2886_s28 }
  0x7d   : > { %517 = vrot.lane.b32.xlu1 %v3129_v32, %s2883_s11  ;;  %501 = vrot.lane.b32.xlu0 %v3132_v33, %s2883_s11 }
  0x81   : > { %375 = vrot.lane.b32.xlu1 %v3163_v34, %s2881_s9  ;;  %359 = vrot.lane.b32.xlu0 %v3166_v35, %s2881_s9 }
  0x85   : > { %565 = vrot.lane.b32.xlu1 %v3129_v32, %s2884_s18  ;;  %549 = vrot.lane.b32.xlu0 %v3132_v33, %s2884_s18 }
  0x89   : > { %423 = vrot.lane.b32.xlu1 %v3163_v34, %s2880_s8  ;;  %407 = vrot.lane.b32.xlu0 %v3166_v35, %s2880_s8 }
  0x8d   : > { %613 = vrot.lane.b32.xlu1 %v3129_v32, %s2885_s27  ;;  %597 = vrot.lane.b32.xlu0 %v3132_v33, %s2885_s27 }
  0x8f   : > { %v400_v39 = vpop.permute.xlu1 %399  ;;  %v352_v40 = vpop.permute.xlu0 %351 }
  0x90   : > { %v688_v41 = vsel %vm687_vm0, %v2994_v10, %v352_v40 }
  0x91   : > { %v3198_v42 = vsel %vm704_vm1, %v688_v41, %v400_v39  ;;  %471 = vrot.lane.b32.xlu1 %v3163_v34, %s2882_s10  ;;  %455 = vrot.lane.b32.xlu0 %v3166_v35, %s2882_s10 }
  0x92   : > { %5149 = vst [vmem:[#allocation14_spill] sm:$0xff] %v3198_v42  ;;  %vm819_vm2 = vcmp.ge.f32.partialorder %v3198_v42, %v3189_v37  ;;  %vm859_vm3 = vcmp.lt.f32.partialorder %v3198_v42, %v3193_v38  ;;  %v3210_v43 = vsub.f32 %v3198_v42, %v3189_v37 }
  0x93   : > { %v416_v44 = vpop.permute.xlu1 %415  ;;  %v368_v45 = vpop.permute.xlu0 %367  ;;  %vm891_vm4 = vmand %vm819_vm2, %vm859_vm3  ;;  %vm755_vm2 = vcmask 654336   ;;  %vm772_vm3 = vcmask 785408  }
  0x94   : > { %v696_v46 = vsel %vm687_vm0, %v3013_v15, %v368_v45  ;;  %v3215_v48 = vsel %vm891_vm4, 1.0, %v5043_v47  ;;  %v1027_v49 = vmul.f32 %v2997_v11, %v3210_v43  ;;  %vm789_vm4 = vcmask 916480  }
  0x95   : > { %v3220_v50 = vsel %vm704_vm1, %v696_v46, %v416_v44  ;;  %661 = vrot.lane.b32.xlu1 %v3129_v32, %s2886_s28  ;;  %645 = vrot.lane.b32.xlu0 %v3132_v33, %s2886_s28 }
  0x96   : > { %5150 = vst [vmem:[#allocation15_spill] sm:$0xff] %v3220_v50  ;;  %vm835_vm5 = vcmp.ge.f32.partialorder %v3220_v50, %v3189_v37  ;;  %vm875_vm6 = vcmp.lt.f32.partialorder %v3220_v50, %v3193_v38  ;;  %v3232_v51 = vsub.f32 %v3220_v50, %v3189_v37  ;;  %v3235_v54 = vmul.f32 %v3215_v48, %v1027_v49 }
  0x97   : > { %v464_v52 = vpop.permute.xlu1 %463  ;;  %v448_v53 = vpop.permute.xlu0 %447  ;;  %vm907_vm7 = vmand %vm835_vm5, %vm875_vm6 }
  0x98   : > { %5151 = vst [vmem:[#allocation16_spill] sm:$0xff] %v3235_v54  ;;  %v3238_v55 = vsel %vm907_vm7, 1.0, %v5043_v47  ;;  %v1043_v56 = vmul.f32 %v2997_v11, %v3232_v51  ;;  %v730_v46 = vsel %vm721_vm14, %v3220_v50, %v464_v52  ;;  %v722_v49 = vsel %vm721_vm14, %v3198_v42, %v448_v53 }
  0x99   : > { %519 = vrot.lane.b32.xlu1 %v3163_v34, %s2883_s11  ;;  %503 = vrot.lane.b32.xlu0 %v3166_v35, %s2883_s11 }
  0x9a   : > { %v3253_v59 = vmul.f32 %v3238_v55, %v1043_v56 }
  0x9b   : > { %v512_v60 = vpop.permute.xlu1 %511  ;;  %v496_v61 = vpop.permute.xlu0 %495 }
  0x9c   : > { %5152 = vst [vmem:[#allocation17_spill] sm:$0xff] %v3253_v59  ;;  %v747_v56 = vsel %vm738_vm15, %v730_v46, %v512_v60  ;;  %v3339_v60 = vrot.slane %v3044_v18, %v2980_v5 }
  0x9d   : > { %377 = vrot.lane.b32.xlu1 %v3247_v57, %s2881_s9  ;;  %361 = vrot.lane.b32.xlu0 %v3250_v58, %s2881_s9 }
  0x9f   : > { %v370_v62 = vpop.permute.xlu1 %369  ;;  %v354_v63 = vpop.permute.xlu0 %353 }
  0xa0   : > { %v697_v2 = vsel %vm687_vm0, %v3028_v16, %v370_v62  ;;  %v689_v3 = vsel %vm687_vm0, %v3031_v17, %v354_v63  ;;  %v739_v62 = vsel %vm738_vm15, %v722_v49, %v496_v61  ;;  %v3333_v63 = vrot.slane %v3044_v18, %v3181_v36  ;;  %v3362_v18 = vld [vmem:[%s2988_s7 + $0x70] sm:$0xff] }
  0xa1   : > { %567 = vrot.lane.b32.xlu1 %v3163_v34, %s2884_s18  ;;  %551 = vrot.lane.b32.xlu0 %v3166_v35, %s2884_s18 }
  0xa3   : > { %v560_v0 = vpop.permute.xlu1 %559  ;;  %v544_v1 = vpop.permute.xlu0 %543 }
  0xa4   : > { %v764_v52 = vsel %vm755_vm2, %v747_v56, %v560_v0  ;;  %v756_v53 = vsel %vm755_vm2, %v739_v62, %v544_v1 }
  0xa5   : > { %425 = vrot.lane.b32.xlu1 %v3247_v57, %s2880_s8  ;;  %409 = vrot.lane.b32.xlu0 %v3250_v58, %s2880_s8 }
  0xa7   : > { %v418_v4 = vpop.permute.xlu1 %417  ;;  %v402_v6 = vpop.permute.xlu0 %401 }
  0xa8   : > { %v3272_v7 = vsel %vm704_vm1, %v697_v2, %v418_v4  ;;  %v3275_v8 = vsel %vm704_vm1, %v689_v3, %v402_v6 }
  0xa9   : > { %5153 = vst [vmem:[#allocation18_spill] sm:$0xff] %v3272_v7  ;;  %5154 = vst [vmem:[#allocation19_spill] sm:$0xff] %v3275_v8  ;;  %v3279_v10 = vsub.f32 %v3272_v7, %v3189_v37  ;;  %v3283_v15 = vsub.f32 %v3275_v8, %v3189_v37  ;;  %615 = vrot.lane.b32.xlu1 %v3163_v34, %s2885_s27  ;;  %599 = vrot.lane.b32.xlu0 %v3166_v35, %s2885_s27 }
  0xaa   : > { %vm837_vm8 = vcmp.ge.f32.partialorder %v3272_v7, %v3189_v37  ;;  %vm877_vm9 = vcmp.lt.f32.partialorder %v3272_v7, %v3193_v38  ;;  %vm821_vm10 = vcmp.ge.f32.partialorder %v3275_v8, %v3189_v37  ;;  %vm861_vm11 = vcmp.lt.f32.partialorder %v3275_v8, %v3193_v38 }
  0xab   : > { %5155 = vst [vmem:[#allocation20_spill] sm:$0xff] %v3279_v10  ;;  %v608_v16 = vpop.permute.xlu1 %607  ;;  %v592_v17 = vpop.permute.xlu0 %591  ;;  %vm909_vm12 = vmand %vm837_vm8, %vm877_vm9  ;;  %v1045_v21 = vmul.f32 %v2997_v11, %v3279_v10  ;;  %v1029_v25 = vmul.f32 %v2997_v11, %v3283_v15 }
  0xac   : > { %v3302_v28 = vsel %vm909_vm12, 1.0, %v5043_v47  ;;  %vm893_vm13 = vmand %vm821_vm10, %vm861_vm11  ;;  %v781_v61 = vsel %vm772_vm3, %v764_v52, %v608_v16  ;;  %v773_v2 = vsel %vm772_vm3, %v756_v53, %v592_v17  ;;  %v3373_v17 = vld [vmem:[%s2988_s7 + $0x30] sm:$0xff] }
  0xad   : > { %473 = vrot.lane.b32.xlu1 %v3247_v57, %s2882_s10  ;;  %457 = vrot.lane.b32.xlu0 %v3250_v58, %s2882_s10  ;;  %v3309_v39 = vsel %vm893_vm13, 1.0, %v5043_v47  ;;  %v3312_v40 = vmul.f32 %v3302_v28, %v1045_v21 }
  0xae   : > { %v3315_v41 = vmul.f32 %v3309_v39, %v1029_v25 }
  0xaf   : > { %5156 = vst [vmem:[#allocation21_spill] sm:$0xff] %v3312_v40  ;;  %v3317_v44 = vpop.permute.xlu1 %465  ;;  %v3319_v45 = vpop.permute.xlu0 %449 }
  0xb0   : > { %5157 = vst [vmem:[#allocation22_spill] sm:$0xff] %v3315_v41  ;;  %v731_v41 = vsel %vm721_vm14, %v3272_v7, %v3317_v44  ;;  %v723_v40 = vsel %vm721_vm14, %v3275_v8, %v3319_v45 }
  0xb1   : > { %663 = vrot.lane.b32.xlu1 %v3163_v34, %s2886_s28  ;;  %647 = vrot.lane.b32.xlu0 %v3166_v35, %s2886_s28 }
  0xb3   : > { %v656_v3 = vpop.permute.xlu1 %655  ;;  %v640_v4 = vpop.permute.xlu0 %639 }
  0xb4   : > { %v3344_v6 = vsel %vm789_vm4, %v781_v61, %v656_v3  ;;  %v3347_v21 = vsel %vm789_vm4, %v773_v2, %v640_v4 }
  0xb5   : > { %5158 = vst [vmem:[#allocation23_spill] sm:$0xff] %v3344_v6  ;;  %5159 = vst [vmem:[#allocation24_spill] sm:$0xff] %v3347_v21  ;;  %v3351_v0 = vsub.f32 %v3344_v6, %v3333_v63  ;;  %v3355_v5 = vsub.f32 %v3347_v21, %v3333_v63  ;;  %521 = vrot.lane.b32.xlu1 %v3247_v57, %s2883_s11  ;;  %505 = vrot.lane.b32.xlu0 %v3250_v58, %s2883_s11 }
  0xb6   : > { %vm834_vm5 = vcmp.ge.f32.partialorder %v3344_v6, %v3333_v63  ;;  %vm874_vm6 = vcmp.lt.f32.partialorder %v3344_v6, %v3339_v60  ;;  %vm818_vm7 = vcmp.ge.f32.partialorder %v3347_v21, %v3333_v63  ;;  %vm858_vm8 = vcmp.lt.f32.partialorder %v3347_v21, %v3339_v60 }
  0xb7   : > { %5160 = vst [vmem:[#allocation25_spill] sm:$0xff] %v3351_v0  ;;  %5161 = vst [vmem:[#allocation26_spill] sm:$0xff] %v3355_v5  ;;  %v514_v1 = vpop.permute.xlu1 %513  ;;  %v498_v16 = vpop.permute.xlu0 %497  ;;  %v1026_v25 = vmul.f32 %v3060_v22, %v3355_v5  ;;  %v1042_v46 = vmul.f32 %v3060_v22, %v3351_v0 }
  0xb8   : > { %vm906_vm9 = vmand %vm834_vm5, %vm874_vm6 }
  0xb9   : > { %v3380_v49 = vsel %vm906_vm9, 1.0, %v5043_v47  ;;  %vm890_vm10 = vmand %vm818_vm7, %vm858_vm8  ;;  %379 = vrot.lane.b32.xlu1 %v3362_v18, %s2881_s9  ;;  %363 = vrot.lane.b32.xlu0 %v3373_v17, %s2881_s9 }
  0xba   : > { %v3385_v56 = vsel %vm890_vm10, 1.0, %v5043_v47  ;;  %v3388_v62 = vmul.f32 %v3380_v49, %v1042_v46 }
  0xbb   : > { %v3393_v52 = vmul.f32 %v3385_v56, %v1026_v25  ;;  %v372_v53 = vpop.permute.xlu1 %371  ;;  %v356_v61 = vpop.permute.xlu0 %355 }
  0xbc   : > { %5162 = vst [vmem:[#allocation27_spill] sm:$0xff] %v3388_v62  ;;  %v698_v4 = vsel %vm687_vm0, %v3086_v26, %v372_v53  ;;  %v690_v25 = vsel %vm687_vm0, %v3089_v27, %v356_v61 }
  0xbd   : > { %5163 = vst [vmem:[#allocation28_spill] sm:$0xff] %v3393_v52  ;;  %569 = vrot.lane.b32.xlu1 %v3247_v57, %s2884_s18  ;;  %553 = vrot.lane.b32.xlu0 %v3250_v58, %s2884_s18 }
  0xbf   : > { %v562_v2 = vpop.permute.xlu1 %561  ;;  %v546_v3 = vpop.permute.xlu0 %545 }
  0xc1   : > { %427 = vrot.lane.b32.xlu1 %v3362_v18, %s2880_s8  ;;  %411 = vrot.lane.b32.xlu0 %v3373_v17, %s2880_s8 }
  0xc3   : > { %v420_v46 = vpop.permute.xlu1 %419  ;;  %v404_v47 = vpop.permute.xlu0 %403 }
  0xc4   : > { %v3408_v31 = vsel %vm704_vm1, %v698_v4, %v420_v46  ;;  %v3411_v29 = vsel %vm704_vm1, %v690_v25, %v404_v47  ;;  %v5168_v47 = vmov 0.0  }
  0xc5   : > { %5164 = vst [vmem:[#allocation29_spill] sm:$0xff] %v3408_v31  ;;  %5165 = vst [vmem:[#allocation30_spill] sm:$0xff] %v3411_v29  ;;  %v3415_v30 = vsub.f32 %v3408_v31, %v3189_v37  ;;  %v3419_v24 = vsub.f32 %v3411_v29, %v3189_v37  ;;  %617 = vrot.lane.b32.xlu1 %v3247_v57, %s2885_s27  ;;  %vm839_vm11 = vcmp.ge.f32.partialorder %v3408_v31, %v3189_v37 }
  0xc6   : > { %vm879_vm12 = vcmp.lt.f32.partialorder %v3408_v31, %v3193_v38  ;;  %601 = vrot.lane.b32.xlu0 %v3250_v58, %s2885_s27  ;;  %vm823_vm5 = vcmp.ge.f32.partialorder %v3411_v29, %v3189_v37  ;;  %vm863_vm6 = vcmp.lt.f32.partialorder %v3411_v29, %v3193_v38 }
  0xc7   : > { %5166 = vst [vmem:[#allocation31_spill] sm:$0xff] %v3415_v30  ;;  %5167 = vst [vmem:[#allocation32_spill] sm:$0xff] %v3419_v24  ;;  %v610_v26 = vpop.permute.xlu1 %609  ;;  %v594_v27 = vpop.permute.xlu0 %593  ;;  %v1047_v61 = vmul.f32 %v2997_v11, %v3415_v30  ;;  %v1031_v4 = vmul.f32 %v2997_v11, %v3419_v24 }
  0xc8   : > { %vm911_vm13 = vmand %vm839_vm11, %vm879_vm12 }
  0xc9   : > { %v3434_v53 = vsel %vm911_vm13, 1.0, %v5168_v47  ;;  %vm895_vm7 = vmand %vm823_vm5, %vm863_vm6  ;;  %475 = vrot.lane.b32.xlu1 %v3362_v18, %s2882_s10 }
  0xca   : > { %v3441_v25 = vsel %vm895_vm7, 1.0, %v5168_v47  ;;  %v3446_v46 = vmul.f32 %v3434_v53, %v1047_v61  ;;  %459 = vrot.lane.b32.xlu0 %v3373_v17, %s2882_s10  ;;  %v748_v61 = vsel %vm738_vm15, %v731_v41, %v514_v1 }
  0xcb   : > { %v3449_v14 = vmul.f32 %v3441_v25, %v1031_v4  ;;  %v3453_v20 = vpop.permute.xlu1 %467  ;;  %v3455_v13 = vpop.permute.xlu0 %451  ;;  %v740_v4 = vsel %vm738_vm15, %v723_v40, %v498_v16 }
  0xcc   : > { %5169 = vst [vmem:[#allocation33_spill] sm:$0xff] %v3446_v46  ;;  %v757_v46 = vsel %vm755_vm2, %v740_v4, %v546_v3 }
  0xcd   : > { %5170 = vst [vmem:[#allocation34_spill] sm:$0xff] %v3449_v14  ;;  %665 = vrot.lane.b32.xlu1 %v3247_v57, %s2886_s28  ;;  %v765_v14 = vsel %vm755_vm2, %v748_v61, %v562_v2  ;;  %v774_v52 = vsel %vm772_vm3, %v757_v46, %v594_v27 }
  0xce   : > { %649 = vrot.lane.b32.xlu0 %v3250_v58, %s2886_s28  ;;  %v782_v44 = vsel %vm772_vm3, %v765_v14, %v610_v26  ;;  %v3492_v14 = vld [vmem:[%s2988_s7 + $0x78] sm:$0xff] }
  0xcf   : > { %v658_v45 = vpop.permute.xlu1 %657  ;;  %v642_v41 = vpop.permute.xlu0 %641  ;;  %v3503_v26 = vld [vmem:[%s2988_s7 + $0x38] sm:$0xff] }
  0xd0   : > { %v3474_v1 = vsel %vm789_vm4, %v782_v44, %v658_v45  ;;  %v3477_v40 = vsel %vm789_vm4, %v774_v52, %v642_v41 }
  0xd1   : > { %5171 = vst [vmem:[#allocation35_spill] sm:$0xff] %v3474_v1  ;;  %5172 = vst [vmem:[#allocation36_spill] sm:$0xff] %v3477_v40  ;;  %v3481_v16 = vsub.f32 %v3474_v1, %v3333_v63  ;;  %v3485_v2 = vsub.f32 %v3477_v40, %v3333_v63  ;;  %523 = vrot.lane.b32.xlu1 %v3362_v18, %s2883_s11  ;;  %vm836_vm8 = vcmp.ge.f32.partialorder %v3474_v1, %v3333_v63 }
  0xd2   : > { %507 = vrot.lane.b32.xlu0 %v3373_v17, %s2883_s11  ;;  %vm876_vm9 = vcmp.lt.f32.partialorder %v3474_v1, %v3339_v60  ;;  %vm820_vm10 = vcmp.ge.f32.partialorder %v3477_v40, %v3333_v63  ;;  %vm860_vm11 = vcmp.lt.f32.partialorder %v3477_v40, %v3339_v60  ;;  %v724_v40 = vsel %vm721_vm14, %v3411_v29, %v3455_v13 }
  0xd3   : > { %5173 = vst [vmem:[#allocation37_spill] sm:$0xff] %v3481_v16  ;;  %5174 = vst [vmem:[#allocation38_spill] sm:$0xff] %v3485_v2  ;;  %v516_v52 = vpop.permute.xlu1 %515  ;;  %v500_v3 = vpop.permute.xlu0 %499  ;;  %v1028_v27 = vmul.f32 %v3060_v22, %v3485_v2  ;;  %v1044_v46 = vmul.f32 %v3060_v22, %v3481_v16 }
  0xd4   : > { %vm908_vm12 = vmand %vm836_vm8, %vm876_vm9 }
  0xd5   : > { %v3510_v61 = vsel %vm908_vm12, 1.0, %v5168_v47  ;;  %vm892_vm13 = vmand %vm820_vm10, %vm860_vm11  ;;  %381 = vrot.lane.b32.xlu1 %v3492_v14, %s2881_s9 }
  0xd6   : > { %v3515_v4 = vsel %vm892_vm13, 1.0, %v5168_v47  ;;  %v3518_v44 = vmul.f32 %v3510_v61, %v1044_v46  ;;  %365 = vrot.lane.b32.xlu0 %v3503_v26, %s2881_s9 }
  0xd7   : > { %v3523_v45 = vmul.f32 %v3515_v4, %v1028_v27  ;;  %v374_v41 = vpop.permute.xlu1 %373  ;;  %v358_v62 = vpop.permute.xlu0 %357 }
  0xd8   : > { %5175 = vst [vmem:[#allocation39_spill] sm:$0xff] %v3518_v44  ;;  %v699_v27 = vsel %vm687_vm0, %v3129_v32, %v374_v41  ;;  %v691_v46 = vsel %vm687_vm0, %v3132_v33, %v358_v62 }
  0xd9   : > { %5176 = vst [vmem:[#allocation40_spill] sm:$0xff] %v3523_v45  ;;  %571 = vrot.lane.b32.xlu1 %v3362_v18, %s2884_s18 }
  0xda   : > { %555 = vrot.lane.b32.xlu0 %v3373_v17, %s2884_s18 }
  0xdb   : > { %v564_v54 = vpop.permute.xlu1 %563  ;;  %v548_v59 = vpop.permute.xlu0 %547 }
  0xdd   : > { %429 = vrot.lane.b32.xlu1 %v3492_v14, %s2880_s8 }
  0xde   : > { %413 = vrot.lane.b32.xlu0 %v3503_v26, %s2880_s8  ;;  %s2804_s8 = sshll.u32 %s2889_s6, 4  ;;  %s2805_s8 = int_to_ptr.vmem [resolvable:$false] %s2804_s8 }
  0xdf   : > { %v422_v45 = vpop.permute.xlu1 %421  ;;  %v406_v44 = vpop.permute.xlu0 %405 }
  0xe0   : > { %v3538_v16 = vsel %vm704_vm1, %v699_v27, %v422_v45  ;;  %v3541_v2 = vsel %vm704_vm1, %v691_v46, %v406_v44 }
  0xe1   : > { %v3545_v30 = vsub.f32 %v3538_v16, %v3189_v37  ;;  %v3549_v24 = vsub.f32 %v3541_v2, %v3189_v37  ;;  %619 = vrot.lane.b32.xlu1 %v3362_v18, %s2885_s27  ;;  %vm841_vm5 = vcmp.ge.f32.partialorder %v3538_v16, %v3189_v37  ;;  %vm881_vm6 = vcmp.lt.f32.partialorder %v3538_v16, %v3193_v38 }
  0xe2   : > { %603 = vrot.lane.b32.xlu0 %v3373_v17, %s2885_s27  ;;  %vm913_vm7 = vmand %vm841_vm5, %vm881_vm6  ;;  %vm825_vm8 = vcmp.ge.f32.partialorder %v3541_v2, %v3189_v37  ;;  %vm865_vm9 = vcmp.lt.f32.partialorder %v3541_v2, %v3193_v38 }
  0xe3   : > { %5177 = vst [vmem:[#allocation41_spill] sm:$0xff] %v3545_v30  ;;  %5178 = vst [vmem:[#allocation42_spill] sm:$0xff] %v3549_v24  ;;  %v612_v32 = vpop.permute.xlu1 %611  ;;  %v596_v33 = vpop.permute.xlu0 %595  ;;  %v3564_v62 = vsel %vm913_vm7, 1.0, %v5168_v47  ;;  %v1049_v44 = vmul.f32 %v2997_v11, %v3545_v30  ;;  %v1033_v45 = vmul.f32 %v2997_v11, %v3549_v24  ;;  %v732_v24 = vsel %vm721_vm14, %v3408_v31, %v3453_v20 }
  0xe4   : > { %vm897_vm10 = vmand %vm825_vm8, %vm865_vm9 }
  0xe5   : > { %v3571_v41 = vsel %vm897_vm10, 1.0, %v5168_v47  ;;  %477 = vrot.lane.b32.xlu1 %v3492_v14, %s2882_s10  ;;  %v3576_v27 = vmul.f32 %v3564_v62, %v1049_v44  ;;  %v749_v44 = vsel %vm738_vm15, %v732_v24, %v516_v52 }
  0xe6   : > { %v3579_v46 = vmul.f32 %v3571_v41, %v1033_v45  ;;  %461 = vrot.lane.b32.xlu0 %v3503_v26, %s2882_s10  ;;  %v741_v45 = vsel %vm738_vm15, %v724_v40, %v500_v3  ;;  %s2806_s10 = scalar_lea.vmem %s2805_s8, 4096 }
  0xe7   : > { %5179 = vst [vmem:[#allocation43_spill] sm:$0xff] %v3576_v27  ;;  %v3583_v0 = vpop.permute.xlu1 %469  ;;  %v3585_v30 = vpop.permute.xlu0 %453  ;;  %v758_v27 = vsel %vm755_vm2, %v741_v45, %v548_v59 }
  0xe8   : > { %5180 = vst [vmem:[#allocation44_spill] sm:$0xff] %v3579_v46  ;;  %v766_v46 = vsel %vm755_vm2, %v749_v44, %v564_v54  ;;  %v775_v10 = vsel %vm772_vm3, %v758_v27, %v596_v33 }
  0xe9   : > { %667 = vrot.lane.b32.xlu1 %v3362_v18, %s2886_s28  ;;  %v783_v20 = vsel %vm772_vm3, %v766_v46, %v612_v32 }
  0xea   : > { %651 = vrot.lane.b32.xlu0 %v3373_v17, %s2886_s28 }
  0xeb   : > { %v660_v23 = vpop.permute.xlu1 %659  ;;  %v644_v13 = vpop.permute.xlu0 %643 }
  0xec   : > { %v3604_v24 = vsel %vm789_vm4, %v783_v20, %v660_v23  ;;  %v3607_v40 = vsel %vm789_vm4, %v775_v10, %v644_v13 }
  0xed   : > { %5181 = vst [vmem:[#allocation45_spill] sm:$0xff] %v3604_v24  ;;  %5182 = vst [vmem:[#allocation46_spill] sm:$0xff] %v3607_v40  ;;  %v3611_v54 = vsub.f32 %v3604_v24, %v3333_v63  ;;  %v3615_v59 = vsub.f32 %v3607_v40, %v3333_v63  ;;  %525 = vrot.lane.b32.xlu1 %v3492_v14, %s2883_s11  ;;  %vm838_vm11 = vcmp.ge.f32.partialorder %v3604_v24, %v3333_v63 }
  0xee   : > { %509 = vrot.lane.b32.xlu0 %v3503_v26, %s2883_s11  ;;  %vm878_vm12 = vcmp.lt.f32.partialorder %v3604_v24, %v3339_v60  ;;  %vm822_vm13 = vcmp.ge.f32.partialorder %v3607_v40, %v3333_v63  ;;  %vm862_vm5 = vcmp.lt.f32.partialorder %v3607_v40, %v3339_v60  ;;  %v2638_v24 = vpack.i.bf16 %v3215_v48, %v3385_v56 }
  0xef   : > { %5183 = vst [vmem:[#allocation47_spill] sm:$0xff] %v3611_v54  ;;  %5184 = vst [vmem:[#allocation48_spill] sm:$0xff] %v3615_v59  ;;  %v518_v23 = vpop.permute.xlu1 %517  ;;  %v502_v10 = vpop.permute.xlu0 %501  ;;  %v1030_v52 = vmul.f32 %v3060_v22, %v3615_v59  ;;  %v1046_v3 = vmul.f32 %v3060_v22, %v3611_v54 }
  0xf0   : > { %vm910_vm6 = vmand %vm838_vm11, %vm878_vm12 }
  0xf1   : > { %v2493_v32 = vsel %vm910_vm6, 1.0, %v5168_v47  ;;  %vm894_vm7 = vmand %vm822_vm13, %vm862_vm5  ;;  %573 = vrot.lane.b32.xlu1 %v3492_v14, %s2884_s18 }
  0xf2   : > { %v2477_v33 = vsel %vm894_vm7, 1.0, %v5168_v47  ;;  %v3637_v27 = vmul.f32 %v2493_v32, %v1046_v3  ;;  %557 = vrot.lane.b32.xlu0 %v3503_v26, %s2884_s18 }
  0xf3   : > { %v3641_v46 = vmul.f32 %v2477_v33, %v1030_v52  ;;  %v376_v44 = vpop.permute.xlu1 %375  ;;  %v360_v45 = vpop.permute.xlu0 %359 }
  0xf4   : > { %5185 = vst [vmem:[#allocation49_spill] sm:$0xff] %v3637_v27  ;;  %v700_v52 = vsel %vm687_vm0, %v3163_v34, %v376_v44  ;;  %v692_v3 = vsel %vm687_vm0, %v3166_v35, %v360_v45  ;;  %v2643_v27 = vpack.i.bf16 %v3238_v55, %v3380_v49  ;;  %v2653_v49 = vpack.i.bf16 %v3302_v28, %v3510_v61 }
  0xf5   : > { %5186 = vst [vmem:[#allocation50_spill] sm:$0xff] %v3641_v46  ;;  %621 = vrot.lane.b32.xlu1 %v3492_v14, %s2885_s27 }
  0xf6   : > { %605 = vrot.lane.b32.xlu0 %v3503_v26, %s2885_s27 }
  0xf7   : > { %v566_v20 = vpop.permute.xlu1 %565  ;;  %v550_v13 = vpop.permute.xlu0 %549 }
  0xf9   : > { %669 = vrot.lane.b32.xlu1 %v3492_v14, %s2886_s28 }
  0xfa   : > { %653 = vrot.lane.b32.xlu0 %v3503_v26, %s2886_s28 }
  0xfb   : > { %v424_v59 = vpop.permute.xlu1 %423  ;;  %v408_v46 = vpop.permute.xlu0 %407 }
  0xfc   : > { %v3658_v54 = vsel %vm704_vm1, %v700_v52, %v424_v59  ;;  %v3661_v40 = vsel %vm704_vm1, %v692_v3, %v408_v46  ;;  %v2663_v52 = vpack.i.bf16 %v3434_v53, %v2493_v32  ;;  %v2658_v3 = vpack.i.bf16 %v3441_v25, %v2477_v33 }
  0xfd   : > { %5187 = vst [vmem:[#allocation51_spill] sm:$0xff] %v3658_v54  ;;  %v3667_v34 = vsub.f32 %v3658_v54, %v3189_v37  ;;  %v3671_v35 = vsub.f32 %v3661_v40, %v3189_v37  ;;  %2644 = vrot.lane.b32.xlu1 %v2643_v27, %s2886_s28  ;;  %vm843_vm8 = vcmp.ge.f32.partialorder %v3658_v54, %v3189_v37 }
  0xfe   : > { %vm883_vm9 = vcmp.lt.f32.partialorder %v3658_v54, %v3193_v38  ;;  %2639 = vrot.lane.b32.xlu0 %v2638_v24, %s2886_s28  ;;  %vm827_vm11 = vcmp.ge.f32.partialorder %v3661_v40, %v3189_v37  ;;  %vm867_vm12 = vcmp.lt.f32.partialorder %v3661_v40, %v3193_v38  ;;  %v2648_v27 = vpack.i.bf16 %v3309_v39, %v3515_v4 }
  0xff   : > { %5188 = vst [vmem:[#allocation52_spill] sm:$0xff] %v3667_v34  ;;  %5189 = vst [vmem:[#allocation53_spill] sm:$0xff] %v3671_v35  ;;  %v614_v48 = vpop.permute.xlu1 %613  ;;  %v598_v55 = vpop.permute.xlu0 %597  ;;  %v1051_v59 = vmul.f32 %v2997_v11, %v3667_v34  ;;  %v1035_v24 = vmul.f32 %v2997_v11, %v3671_v35  ;;  %v733_v39 = vsel %vm721_vm14, %v3538_v16, %v3583_v0 }
 0x100   : > { %vm915_vm10 = vmand %vm843_vm8, %vm883_vm9  ;;  %v725_v4 = vsel %vm721_vm14, %v3541_v2, %v3585_v30 }
 0x101   : > { %v3686_v56 = vsel %vm915_vm10, 1.0, %v5168_v47  ;;  %vm899_vm13 = vmand %vm827_vm11, %vm867_vm12  ;;  %2654 = vrot.lane.b32.xlu1 %v2653_v49, %s2886_s28  ;;  %v750_v49 = vsel %vm738_vm15, %v733_v39, %v518_v23 }
 0x102   : > { %v3695_v46 = vsel %vm899_vm13, 1.0, %v5168_v47  ;;  %v3699_v28 = vmul.f32 %v3686_v56, %v1051_v59  ;;  %2649 = vrot.lane.b32.xlu0 %v2648_v27, %s2886_s28  ;;  %v742_v59 = vsel %vm738_vm15, %v725_v4, %v502_v10 }
 0x103   : > { %v3702_v61 = vmul.f32 %v3695_v46, %v1035_v24  ;;  %v3705_v44 = vpop.permute.xlu1 %471  ;;  %v3707_v45 = vpop.permute.xlu0 %455  ;;  %v767_v24 = vsel %vm755_vm2, %v750_v49, %v566_v20  ;;  %v759_v53 = vsel %vm755_vm2, %v742_v59, %v550_v13 }
 0x104   : > { %5190 = vst [vmem:[#allocation54_spill] sm:$0xff] %v3699_v28  ;;  %v784_v0 = vsel %vm772_vm3, %v767_v24, %v614_v48  ;;  %v776_v32 = vsel %vm772_vm3, %v759_v53, %v598_v55  ;;  %v734_v35 = vsel %vm721_vm14, %v3658_v54, %v3705_v44 }
 0x105   : > { %5191 = vst [vmem:[#allocation55_spill] sm:$0xff] %v3702_v61  ;;  %2664 = vrot.lane.b32.xlu1 %v2663_v52, %s2886_s28 }
 0x106   : > { %2659 = vrot.lane.b32.xlu0 %v2658_v3, %s2886_s28 }
 0x107   : > { %v662_v27 = vpop.permute.xlu1 %661  ;;  %v646_v30 = vpop.permute.xlu0 %645 }
 0x108   : > { %v3726_v25 = vsel %vm789_vm4, %v784_v0, %v662_v27  ;;  %v3729_v23 = vsel %vm789_vm4, %v776_v32, %v646_v30 }
 0x109   : > { %v3733_v10 = vsub.f32 %v3726_v25, %v3333_v63  ;;  %v3737_v33 = vsub.f32 %v3729_v23, %v3333_v63  ;;  %vm840_vm5 = vcmp.ge.f32.partialorder %v3726_v25, %v3333_v63  ;;  %vm880_vm6 = vcmp.lt.f32.partialorder %v3726_v25, %v3339_v60 }
 0x10a   : > { %vm824_vm7 = vcmp.ge.f32.partialorder %v3729_v23, %v3333_v63  ;;  %vm864_vm8 = vcmp.lt.f32.partialorder %v3729_v23, %v3339_v60  ;;  %vm912_vm9 = vmand %vm840_vm5, %vm880_vm6 }
 0x10b   : > { %v520_v20 = vpop.permute.xlu1 %519  ;;  %v504_v13 = vpop.permute.xlu0 %503  ;;  %v1032_v48 = vmul.f32 %v3060_v22, %v3737_v33  ;;  %v1048_v55 = vmul.f32 %v3060_v22, %v3733_v10  ;;  %v2495_v52 = vsel %vm912_vm9, 1.0, %v5168_v47  ;;  %vm896_vm10 = vmand %vm824_vm7, %vm864_vm8 }
 0x10c   : > { %v2673_v39 = vpack.i.bf16 %v3564_v62, %v2495_v52  ;;  %v2479_v4 = vsel %vm896_vm10, 1.0, %v5168_v47 }
 0x10d   : > { %v3754_v3 = vmul.f32 %v2495_v52, %v1048_v55  ;;  %v2668_v49 = vpack.i.bf16 %v3571_v41, %v2479_v4  ;;  %v3757_v59 = vmul.f32 %v2479_v4, %v1032_v48 }
 0x10e   : > { %2674 = vrot.lane.b32.xlu1 %v2673_v39, %s2886_s28 }
 0x10f   : > { %v378_v24 = vpop.permute.xlu1 %377  ;;  %v362_v53 = vpop.permute.xlu0 %361  ;;  %2669 = vrot.lane.b32.xlu0 %v2668_v49, %s2886_s28 }
 0x110   : > { %v701_v27 = vsel %vm687_vm0, %v3247_v57, %v378_v24  ;;  %v693_v62 = vsel %vm687_vm0, %v3250_v58, %v362_v53 }
 0x113   : > { %v568_v0 = vpop.permute.xlu1 %567  ;;  %v552_v32 = vpop.permute.xlu0 %551 }
 0x117   : > { %v426_v30 = vpop.permute.xlu1 %425  ;;  %v410_v55 = vpop.permute.xlu0 %409 }
 0x118   : > { %v3766_v41 = vsel %vm704_vm1, %v701_v27, %v426_v30  ;;  %v3769_v48 = vsel %vm704_vm1, %v693_v62, %v410_v55 }
 0x119   : > { %5192 = vst [vmem:[#allocation56_spill] sm:$0xff] %v3766_v41  ;;  %5193 = vst [vmem:[#allocation57_spill] sm:$0xff] %v3769_v48  ;;  %v3773_v52 = vsub.f32 %v3766_v41, %v3189_v37  ;;  %v3777_v39 = vsub.f32 %v3769_v48, %v3189_v37  ;;  %vm845_vm11 = vcmp.ge.f32.partialorder %v3766_v41, %v3189_v37 }
 0x11a   : > { %vm885_vm12 = vcmp.lt.f32.partialorder %v3766_v41, %v3193_v38  ;;  %vm829_vm5 = vcmp.ge.f32.partialorder %v3769_v48, %v3189_v37  ;;  %vm869_vm6 = vcmp.lt.f32.partialorder %v3769_v48, %v3193_v38 }
 0x11b   : > { %5194 = vst [vmem:[#allocation58_spill] sm:$0xff] %v3773_v52  ;;  %5195 = vst [vmem:[#allocation59_spill] sm:$0xff] %v3777_v39  ;;  %v616_v57 = vpop.permute.xlu1 %615  ;;  %v600_v58 = vpop.permute.xlu0 %599  ;;  %v1053_v49 = vmul.f32 %v2997_v11, %v3773_v52  ;;  %v1037_v24 = vmul.f32 %v2997_v11, %v3777_v39  ;;  %v726_v39 = vsel %vm721_vm14, %v3661_v40, %v3707_v45 }
 0x11c   : > { %vm917_vm13 = vmand %vm845_vm11, %vm885_vm12  ;;  %v751_v52 = vsel %vm738_vm15, %v734_v35, %v520_v20  ;;  %v743_v61 = vsel %vm738_vm15, %v726_v39, %v504_v13 }
 0x11d   : > { %v3788_v4 = vsel %vm917_vm13, 1.0, %v5168_v47  ;;  %vm901_vm7 = vmand %vm829_vm5, %vm869_vm6 }
 0x11e   : > { %v3795_v53 = vsel %vm901_vm7, 1.0, %v5168_v47  ;;  %v3798_v27 = vmul.f32 %v3788_v4, %v1053_v49  ;;  %v768_v49 = vsel %vm755_vm2, %v751_v52, %v568_v0 }
 0x11f   : > { %v3801_v62 = vmul.f32 %v3795_v53, %v1037_v24  ;;  %v474_v30 = vpop.permute.xlu1 %473  ;;  %v3803_v55 = vpop.permute.xlu0 %457  ;;  %v760_v24 = vsel %vm755_vm2, %v743_v61, %v552_v32 }
 0x120   : > { %5196 = vst [vmem:[#allocation60_spill] sm:$0xff] %v3798_v27  ;;  %v777_v27 = vsel %vm772_vm3, %v760_v24, %v600_v58 }
 0x121   : > { %5197 = vst [vmem:[#allocation61_spill] sm:$0xff] %v3801_v62  ;;  %v785_v62 = vsel %vm772_vm3, %v768_v49, %v616_v57 }
 0x123   : > { %v664_v34 = vpop.permute.xlu1 %663  ;;  %v648_v28 = vpop.permute.xlu0 %647 }
 0x124   : > { %v3818_v44 = vsel %vm789_vm4, %v785_v62, %v664_v34  ;;  %v3821_v54 = vsel %vm789_vm4, %v777_v27, %v648_v28 }
 0x125   : > { %5198 = vst [vmem:[#allocation62_spill] sm:$0xff] %v3818_v44  ;;  %v3825_v35 = vsub.f32 %v3818_v44, %v3333_v63  ;;  %v3829_v45 = vsub.f32 %v3821_v54, %v3333_v63  ;;  %vm842_vm8 = vcmp.ge.f32.partialorder %v3818_v44, %v3333_v63  ;;  %vm882_vm9 = vcmp.lt.f32.partialorder %v3818_v44, %v3339_v60 }
 0x126   : > { %vm826_vm10 = vcmp.ge.f32.partialorder %v3821_v54, %v3333_v63  ;;  %vm866_vm11 = vcmp.lt.f32.partialorder %v3821_v54, %v3339_v60  ;;  %vm914_vm12 = vmand %vm842_vm8, %vm882_vm9 }
 0x127   : > { %5199 = vst [vmem:[#allocation63_spill] sm:$0xff] %v3825_v35  ;;  %5200 = vst [vmem:[#allocation64_spill] sm:$0xff] %v3829_v45  ;;  %v522_v34 = vpop.permute.xlu1 %521  ;;  %v1034_v28 = vmul.f32 %v3060_v22, %v3829_v45  ;;  %v1050_v61 = vmul.f32 %v3060_v22, %v3825_v35  ;;  %v506_v20 = vpop.permute.xlu0 %505  ;;  %v2497_v13 = vsel %vm914_vm12, 1.0, %v5168_v47  ;;  %v735_v45 = vsel %vm721_vm14, %v3766_v41, %v474_v30 }
 0x128   : > { %vm898_vm13 = vmand %vm826_vm10, %vm866_vm11  ;;  %v2683_v0 = vpack.i.bf16 %v3686_v56, %v2497_v13  ;;  %v752_v35 = vsel %vm738_vm15, %v735_v45, %v522_v34 }
 0x129   : > { %v2481_v32 = vsel %vm898_vm13, 1.0, %v5168_v47  ;;  %v3846_v52 = vmul.f32 %v2497_v13, %v1050_v61 }
 0x12a   : > { %v2678_v39 = vpack.i.bf16 %v3695_v46, %v2481_v32  ;;  %v3849_v57 = vmul.f32 %v2481_v32, %v1034_v28  ;;  %2684 = vrot.lane.b32.xlu1 %v2683_v0, %s2886_s28 }
 0x12b   : > { %5201 = vst [vmem:[#allocation65_spill] sm:$0xff] %v3846_v52  ;;  %v380_v58 = vpop.permute.xlu1 %379  ;;  %v364_v27 = vpop.permute.xlu0 %363 }
 0x12c   : > { %5202 = vst [vmem:[#allocation66_spill] sm:$0xff] %v3849_v57  ;;  %2679 = vrot.lane.b32.xlu0 %v2678_v39, %s2886_s28  ;;  %v702_v24 = vsel %vm687_vm0, %v3362_v18, %v380_v58  ;;  %v694_v61 = vsel %vm687_vm0, %v3373_v17, %v364_v27 }
 0x12f   : > { %v570_v62 = vpop.permute.xlu1 %569  ;;  %v554_v49 = vpop.permute.xlu0 %553 }
 0x133   : > { %v428_v56 = vpop.permute.xlu1 %427  ;;  %v412_v46 = vpop.permute.xlu0 %411 }
 0x134   : > { %v3858_v13 = vsel %vm704_vm1, %v702_v24, %v428_v56  ;;  %v3865_v0 = vsel %vm704_vm1, %v694_v61, %v412_v46 }
 0x135   : > { %5203 = vst [vmem:[#allocation67_spill] sm:$0xff] %v3858_v13  ;;  %v3862_v28 = vsub.f32 %v3858_v13, %v3189_v37  ;;  %5205 = vst [vmem:[#allocation69_spill] sm:$0xff] %v3865_v0  ;;  %vm847_vm5 = vcmp.ge.f32.partialorder %v3858_v13, %v3189_v37  ;;  %vm887_vm6 = vcmp.lt.f32.partialorder %v3858_v13, %v3193_v38 }
 0x136   : > { %v3873_v18 = vsub.f32 %v3865_v0, %v3189_v37  ;;  %vm919_vm7 = vmand %vm847_vm5, %vm887_vm6  ;;  %vm831_vm8 = vcmp.ge.f32.partialorder %v3865_v0, %v3189_v37  ;;  %vm871_vm9 = vcmp.lt.f32.partialorder %v3865_v0, %v3193_v38 }
 0x137   : > { %5204 = vst [vmem:[#allocation68_spill] sm:$0xff] %v3862_v28  ;;  %v618_v17 = vpop.permute.xlu1 %617  ;;  %v3880_v32 = vsel %vm919_vm7, 1.0, %v5168_v47  ;;  %vm903_vm10 = vmand %vm831_vm8, %vm871_vm9  ;;  %v1055_v39 = vmul.f32 %v2997_v11, %v3862_v28  ;;  %v727_v28 = vsel %vm721_vm14, %v3769_v48, %v3803_v55  ;;  %v5243_v48 = vld [vmem:[#allocation16_spill] sm:$0xff] }
 0x138   : > { %5206 = vst [vmem:[#allocation70_spill] sm:$0xff] %v3873_v18  ;;  %v602_v58 = vpop.permute.xlu0 %601  ;;  %v3885_v27 = vsel %vm903_vm10, 1.0, %v5168_v47  ;;  %v1039_v24 = vmul.f32 %v2997_v11, %v3873_v18  ;;  %v744_v52 = vsel %vm738_vm15, %v727_v28, %v506_v20  ;;  %v769_v18 = vsel %vm755_vm2, %v752_v35, %v570_v62 }
 0x139   : > { %v3890_v56 = vmul.f32 %v3880_v32, %v1055_v39  ;;  %v761_v39 = vsel %vm755_vm2, %v744_v52, %v554_v49 }
 0x13a   : > { %v3893_v61 = vmul.f32 %v3885_v27, %v1039_v24  ;;  %v786_v24 = vsel %vm772_vm3, %v769_v18, %v618_v17 }
 0x13b   : > { %5207 = vst [vmem:[#allocation71_spill] sm:$0xff] %v3890_v56  ;;  %v476_v46 = vpop.permute.xlu1 %475  ;;  %v778_v56 = vsel %vm772_vm3, %v761_v39, %v602_v58 }
 0x13c   : > { %5208 = vst [vmem:[#allocation72_spill] sm:$0xff] %v3893_v61  ;;  %v460_v57 = vpop.permute.xlu0 %459 }
 0x13f   : > { %v666_v61 = vpop.permute.xlu1 %665 }
 0x140   : > { %v3907_v30 = vsel %vm789_vm4, %v786_v24, %v666_v61  ;;  %v650_v41 = vpop.permute.xlu0 %649 }
 0x141   : > { %5209 = vst [vmem:[#allocation73_spill] sm:$0xff] %v3907_v30  ;;  %v3911_v55 = vsub.f32 %v3907_v30, %v3333_v63  ;;  %v3914_v45 = vsel %vm789_vm4, %v778_v56, %v650_v41  ;;  %vm844_vm11 = vcmp.ge.f32.partialorder %v3907_v30, %v3333_v63  ;;  %vm884_vm12 = vcmp.lt.f32.partialorder %v3907_v30, %v3339_v60 }
 0x142   : > { %5211 = vst [vmem:[#allocation75_spill] sm:$0xff] %v3914_v45  ;;  %v3920_v35 = vsub.f32 %v3914_v45, %v3333_v63  ;;  %vm828_vm13 = vcmp.ge.f32.partialorder %v3914_v45, %v3333_v63  ;;  %vm916_vm5 = vmand %vm844_vm11, %vm884_vm12  ;;  %vm868_vm6 = vcmp.lt.f32.partialorder %v3914_v45, %v3339_v60 }
 0x143   : > { %5210 = vst [vmem:[#allocation74_spill] sm:$0xff] %v3911_v55  ;;  %v524_v34 = vpop.permute.xlu1 %523  ;;  %v1052_v41 = vmul.f32 %v3060_v22, %v3911_v55  ;;  %v2499_v52 = vsel %vm916_vm5, 1.0, %v5168_v47  ;;  %vm900_vm7 = vmand %vm828_vm13, %vm868_vm6 }
 0x144   : > { %5212 = vst [vmem:[#allocation76_spill] sm:$0xff] %v3920_v35  ;;  %v508_v20 = vpop.permute.xlu0 %507  ;;  %v1036_v62 = vmul.f32 %v3060_v22, %v3920_v35  ;;  %v2693_v49 = vpack.i.bf16 %v3788_v4, %v2499_v52  ;;  %v2483_v28 = vsel %vm900_vm7, 1.0, %v5168_v47 }
 0x145   : > { %v3935_v18 = vmul.f32 %v2499_v52, %v1052_v41  ;;  %v2688_v17 = vpack.i.bf16 %v3795_v53, %v2483_v28 }
 0x146   : > { %v3938_v58 = vmul.f32 %v2483_v28, %v1036_v62  ;;  %2694 = vrot.lane.b32.xlu1 %v2693_v49, %s2886_s28 }
 0x147   : > { %5213 = vst [vmem:[#allocation77_spill] sm:$0xff] %v3935_v18  ;;  %v382_v56 = vpop.permute.xlu1 %381  ;;  %2689 = vrot.lane.b32.xlu0 %v2688_v17, %s2886_s28 }
 0x148   : > { %5214 = vst [vmem:[#allocation78_spill] sm:$0xff] %v3938_v58  ;;  %v366_v61 = vpop.permute.xlu0 %365  ;;  %v703_v35 = vsel %vm687_vm0, %v3492_v14, %v382_v56 }
 0x149   : > { %v695_v41 = vsel %vm687_vm0, %v3503_v26, %v366_v61 }
 0x14b   : > { %v572_v39 = vpop.permute.xlu1 %571 }
 0x14c   : > { %v556_v24 = vpop.permute.xlu0 %555 }
 0x14f   : > { %v430_v4 = vpop.permute.xlu1 %429 }
 0x150   : > { %v3947_v52 = vsel %vm704_vm1, %v703_v35, %v430_v4  ;;  %v414_v53 = vpop.permute.xlu0 %413 }
 0x151   : > { %5215 = vst [vmem:[#allocation79_spill] sm:$0xff] %v3947_v52  ;;  %v3951_v62 = vsub.f32 %v3947_v52, %v3189_v37  ;;  %v3954_v49 = vsel %vm704_vm1, %v695_v41, %v414_v53  ;;  %vm849_vm8 = vcmp.ge.f32.partialorder %v3947_v52, %v3189_v37  ;;  %vm889_vm9 = vcmp.lt.f32.partialorder %v3947_v52, %v3193_v38 }
 0x152   : > { %5217 = vst [vmem:[#allocation81_spill] sm:$0xff] %v3954_v49  ;;  %v3962_v14 = vsub.f32 %v3954_v49, %v3189_v37  ;;  %vm921_vm10 = vmand %vm849_vm8, %vm889_vm9  ;;  %vm833_vm11 = vcmp.ge.f32.partialorder %v3954_v49, %v3189_v37  ;;  %vm873_vm12 = vcmp.lt.f32.partialorder %v3954_v49, %v3193_v38  ;;  %v736_v41 = vsel %vm721_vm14, %v3858_v13, %v476_v46 }
 0x153   : > { %5216 = vst [vmem:[#allocation80_spill] sm:$0xff] %v3951_v62  ;;  %v620_v26 = vpop.permute.xlu1 %619  ;;  %v3969_v35 = vsel %vm921_vm10, 1.0, %v5168_v47  ;;  %vm905_vm1 = vmand %vm833_vm11, %vm873_vm12  ;;  %v1057_v28 = vmul.f32 %v2997_v11, %v3951_v62  ;;  %v728_v62 = vsel %vm721_vm14, %v3865_v0, %v460_v57  ;;  %v753_v58 = vsel %vm738_vm15, %v736_v41, %v524_v34 }
 0x154   : > { %5218 = vst [vmem:[#allocation82_spill] sm:$0xff] %v3962_v14  ;;  %v604_v17 = vpop.permute.xlu0 %603  ;;  %v3974_v56 = vsel %vm905_vm1, 1.0, %v5168_v47  ;;  %v1041_v61 = vmul.f32 %v2997_v11, %v3962_v14  ;;  %v745_v11 = vsel %vm738_vm15, %v728_v62, %v508_v20  ;;  %v2782_v62 = vld [vmem:[%s5040_s1 + $0x18] sm:$0x7]  ;;  %v1083_v41 = vsub.f32 %v2991_v9, %v3220_v50  ;;  %v5229_v50 = vld [vmem:[#allocation36_spill] sm:$0xff] }
 0x155   : > { %v3979_v37 = vmul.f32 %v3969_v35, %v1057_v28  ;;  %v770_v28 = vsel %vm755_vm2, %v753_v58, %v572_v39 }
 0x156   : > { %v3982_v38 = vmul.f32 %v3974_v56, %v1041_v61  ;;  %v787_v61 = vsel %vm772_vm3, %v770_v28, %v620_v26  ;;  %v1067_v26 = vsub.f32 %v2991_v9, %v3198_v42 }
 0x157   : > { %5219 = vst [vmem:[#allocation83_spill] sm:$0xff] %v3979_v37  ;;  %v3984_v4 = vpop.permute.xlu1 %477  ;;  %v762_v37 = vsel %vm755_vm2, %v745_v11, %v556_v24 }
 0x158   : > { %5220 = vst [vmem:[#allocation84_spill] sm:$0xff] %v3982_v38  ;;  %v3988_v53 = vpop.permute.xlu0 %461  ;;  %v779_v14 = vsel %vm772_vm3, %v762_v37, %v604_v17 }
 0x15b   : > { %v668_v38 = vpop.permute.xlu1 %667 }
 0x15c   : > { %v3999_v46 = vsel %vm789_vm4, %v787_v61, %v668_v38  ;;  %v652_v13 = vpop.permute.xlu0 %651  ;;  %v1085_v61 = vsub.f32 %v2991_v9, %v3272_v7  ;;  %v4063_v7 = vmul.f32 %v3000_v12, %v3210_v43 }
 0x15d   : > { %5221 = vst [vmem:[#allocation85_spill] sm:$0xff] %v3999_v46  ;;  %v4003_v57 = vsub.f32 %v3999_v46, %v3333_v63  ;;  %v4006_v34 = vsel %vm789_vm4, %v779_v14, %v652_v13  ;;  %vm846_vm13 = vcmp.ge.f32.partialorder %v3999_v46, %v3333_v63  ;;  %vm886_vm5 = vcmp.lt.f32.partialorder %v3999_v46, %v3339_v60  ;;  %v5233_v46 = vld [vmem:[#allocation45_spill] sm:$0xff] }
 0x15e   : > { %5223 = vst [vmem:[#allocation87_spill] sm:$0xff] %v4006_v34  ;;  %v4012_v20 = vsub.f32 %v4006_v34, %v3333_v63  ;;  %vm830_vm6 = vcmp.ge.f32.partialorder %v4006_v34, %v3333_v63  ;;  %vm918_vm7 = vmand %vm846_vm13, %vm886_vm5  ;;  %vm870_vm8 = vcmp.lt.f32.partialorder %v4006_v34, %v3339_v60  ;;  %v4027_v14 = vrot.slane %v2782_v62, %v3181_v36 }
 0x15f   : > { %5222 = vst [vmem:[#allocation86_spill] sm:$0xff] %v4003_v57  ;;  %v526_v58 = vpop.permute.xlu1 %525  ;;  %v1054_v13 = vmul.f32 %v3060_v22, %v4003_v57  ;;  %v2501_v24 = vsel %vm918_vm7, 1.0, %v5168_v47  ;;  %vm902_vm9 = vmand %vm830_vm6, %vm870_vm8  ;;  %v1069_v62 = vsub.f32 %v2991_v9, %v3275_v8  ;;  %v1087_v8 = vsub.f32 %v2991_v9, %v3408_v31  ;;  %v5230_v57 = vld [vmem:[#allocation25_spill] sm:$0xff] }
 0x160   : > { %5224 = vst [vmem:[#allocation88_spill] sm:$0xff] %v4012_v20  ;;  %v510_v39 = vpop.permute.xlu0 %509  ;;  %v1038_v17 = vmul.f32 %v3060_v22, %v4012_v20  ;;  %v2703_v37 = vpack.i.bf16 %v3880_v32, %v2501_v24  ;;  %v2485_v38 = vsel %vm902_vm9, 1.0, %v5168_v47  ;;  %v1082_v32 = vsub.f32 %v3047_v19, %v3344_v6 }
 0x161   : > { %v4037_v11 = vmul.f32 %v2501_v24, %v1054_v13  ;;  %v2698_v28 = vpack.i.bf16 %v3885_v27, %v2485_v38  ;;  %v1066_v20 = vsub.f32 %v3047_v19, %v3347_v21  ;;  %v2783_v27 = vld [vmem:[%s5040_s1 + $0x10] sm:$0x7]  ;;  %v1071_v6 = vsub.f32 %v2991_v9, %v3411_v29 }
 0x162   : > { %v4044_v42 = vmul.f32 %v2485_v38, %v1038_v17  ;;  %2704 = vrot.lane.b32.xlu1 %v2703_v37, %s2886_s28  ;;  %v4055_v24 = vrot.slane %v2783_v27, %v3181_v36  ;;  %v4059_v38 = vmul.f32 %v4027_v14, %v1067_v26  ;;  %v1123_v37 = vmul.f32 %v4027_v14, %v1083_v41 }
 0x163   : > { %5225 = vst [vmem:[#allocation89_spill] sm:$0xff] %v4037_v11  ;;  %v574_v13 = vpop.permute.xlu1 %573  ;;  %2699 = vrot.lane.b32.xlu0 %v2698_v28, %s2886_s28  ;;  %v4072_v36 = vmul.f32 %v3000_v12, %v3232_v51  ;;  %v1084_v26 = vsub.f32 %v3047_v19, %v3474_v1  ;;  %v4077_v28 = vmul.f32 %v4027_v14, %v1085_v61  ;;  %v5227_v51 = vld [vmem:[#allocation9_spill] sm:$0xff]  ;;  %v5228_v1 = vld [vmem:[#allocation20_spill] sm:$0xff] }
 0x164   : > { %5226 = vst [vmem:[#allocation90_spill] sm:$0xff] %v4044_v42  ;;  %v558_v17 = vpop.permute.xlu0 %557  ;;  %v4080_v43 = vmul.f32 %v4027_v14, %v1069_v62  ;;  %v4084_v41 = vmul.f32 %v3000_v12, %v3283_v15  ;;  %v1122_v31 = vmul.f32 %v4055_v24, %v1082_v32  ;;  %v1106_v29 = vmul.f32 %v4055_v24, %v1066_v20  ;;  %v5231_v20 = vld [vmem:[#allocation32_spill] sm:$0xff] }
 0x165   : > { %v4090_v21 = vmul.f32 %v5227_v51, %v3355_v5  ;;  %v4094_v61 = vmul.f32 %v3000_v12, %v5228_v1  ;;  %v1068_v62 = vsub.f32 %v3047_v19, %v5229_v50  ;;  %v737_v15 = vsel %vm721_vm14, %v3947_v52, %v3984_v4 }
 0x166   : > { %v4103_v32 = vmul.f32 %v5227_v51, %v5230_v57  ;;  %v4107_v5 = vmul.f32 %v3000_v12, %v5231_v20  ;;  %v729_v1 = vsel %vm721_vm14, %v3954_v49, %v3988_v53  ;;  %v754_v11 = vsel %vm738_vm15, %v737_v15, %v526_v58  ;;  %v5232_v20 = vld [vmem:[#allocation31_spill] sm:$0xff]  ;;  %v5234_v58 = vld [vmem:[#allocation46_spill] sm:$0xff] }
 0x167   : > { %v622_v27 = vpop.permute.xlu1 %621  ;;  %v4114_v50 = vmul.f32 %v4027_v14, %v1087_v8  ;;  %v4117_v4 = vmul.f32 %v4027_v14, %v1071_v6  ;;  %v746_v52 = vsel %vm738_vm15, %v729_v1, %v510_v39  ;;  %v771_v57 = vsel %vm755_vm2, %v754_v11, %v574_v13  ;;  %v5236_v1 = vld [vmem:[#allocation38_spill] sm:$0xff] }
 0x168   : > { %v606_v42 = vpop.permute.xlu0 %605  ;;  %v1124_v34 = vmul.f32 %v4055_v24, %v1084_v26  ;;  %v4124_v0 = vmul.f32 %v3000_v12, %v5232_v20  ;;  %v1086_v53 = vsub.f32 %v3047_v19, %v5233_v46  ;;  %v1070_v8 = vsub.f32 %v3047_v19, %v5234_v58  ;;  %v5241_v58 = vld [vmem:[#allocation47_spill] sm:$0xff] }
 0x169   : > { %v763_v15 = vsel %vm755_vm2, %v746_v52, %v558_v17  ;;  %v788_v6 = vsel %vm772_vm3, %v771_v57, %v622_v27  ;;  %v1108_v26 = vmul.f32 %v4055_v24, %v1068_v62  ;;  %v4139_v20 = vmul.f32 %v5227_v51, %v5236_v1 }
 0x16a   : > { %v780_v39 = vsel %vm772_vm3, %v763_v15, %v606_v42  ;;  %v5239_v42 = vld [vmem:[#allocation37_spill] sm:$0xff]  ;;  %v1126_v62 = vmul.f32 %v4055_v24, %v1086_v53  ;;  %v1110_v15 = vmul.f32 %v4055_v24, %v1070_v8  ;;  %v4173_v17 = vmul.f32 %v5227_v51, %v5241_v58 }
 0x16b   : > { %v670_v49 = vpop.permute.xlu1 %669 }
 0x16c   : > { %v4134_v11 = vsel %vm789_vm4, %v788_v6, %v670_v49  ;;  %v654_v13 = vpop.permute.xlu0 %653  ;;  %v4152_v49 = vmul.f32 %v5227_v51, %v5239_v42 }
 0x16d   : > { %5235 = vst [vmem:[#allocation9_spill] sm:$0xff] %v4134_v11  ;;  %v4143_v46 = vsub.f32 %v4134_v11, %v3333_v63  ;;  %v4146_v52 = vsel %vm789_vm4, %v780_v39, %v654_v13  ;;  %vm848_vm14 = vcmp.ge.f32.partialorder %v4134_v11, %v3333_v63  ;;  %vm888_vm15 = vcmp.lt.f32.partialorder %v4134_v11, %v3339_v60 }
 0x16e   : > { %5238 = vst [vmem:[#allocation32_spill] sm:$0xff] %v4146_v52  ;;  %v4156_v57 = vsub.f32 %v4146_v52, %v3333_v63  ;;  %vm832_vm2 = vcmp.ge.f32.partialorder %v4146_v52, %v3333_v63  ;;  %vm920_vm3 = vmand %vm848_vm14, %vm888_vm15  ;;  %vm872_vm10 = vcmp.lt.f32.partialorder %v4146_v52, %v3339_v60 }
 0x16f   : > { %5237 = vst [vmem:[#allocation20_spill] sm:$0xff] %v4143_v46  ;;  %v2645_v27 = vpop.permute.xlu1 %2644  ;;  %v1056_v6 = vmul.f32 %v3060_v22, %v4143_v46  ;;  %v2503_v63 = vsel %vm920_vm3, 1.0, %v5168_v47  ;;  %vm904_vm11 = vmand %vm832_vm2, %vm872_vm10 }
 0x170   : > { %5240 = vst [vmem:[#allocation31_spill] sm:$0xff] %v4156_v57  ;;  %v2647_v39 = vunpack.i.h.bf16 %v2645_v27  ;;  %v2646_v13 = vunpack.i.l.bf16 %v2645_v27  ;;  %v2640_v42 = vpop.permute.xlu0 %2639  ;;  %v2713_v60 = vpack.i.bf16 %v3969_v35, %v2503_v63  ;;  %v2487_v53 = vsel %vm904_vm11, 1.0, %v5168_v47  ;;  %v5242_v35 = vld [vmem:[#allocation17_spill] sm:$0xff] }
 0x171   : > { %v2642_v1 = vunpack.i.h.bf16 %v2640_v42  ;;  %v2641_v11 = vunpack.i.l.bf16 %v2640_v42  ;;  %v2708_v46 = vpack.i.bf16 %v3974_v56, %v2487_v53  ;;  %v1040_v27 = vmul.f32 %v3060_v22, %v4156_v57 }
 0x172   : > { %v1331_v8 = vmul.f32 %v2647_v39, %v1123_v37  ;;  %v1274_v52 = vsel %vm789_vm4, %v2646_v13, %v2647_v39  ;;  %2714 = vrot.lane.b32.xlu1 %v2713_v60, %s2886_s28  ;;  %v4184_v45 = vmul.f32 %v2503_v63, %v1056_v6  ;;  %v5245_v6 = vld [vmem:[#allocation28_spill] sm:$0xff] }
 0x173   : > { %v1330_v55 = vmul.f32 %v1274_v52, %v1122_v31  ;;  %v1315_v18 = vmul.f32 %v2642_v1, %v4059_v38  ;;  %v1266_v58 = vsel %vm789_vm4, %v2641_v11, %v2642_v1  ;;  %v2655_v42 = vpop.permute.xlu1 %2654  ;;  %2709 = vrot.lane.b32.xlu0 %v2708_v46, %s2886_s28  ;;  %v5244_v38 = vld [vmem:[#allocation27_spill] sm:$0xff] }
 0x174   : > { %v1363_v47 = vadd.f32 %v1331_v8, %v5242_v35  ;;  %v1314_v37 = vmul.f32 %v1266_v58, %v1106_v29  ;;  %v2657_v39 = vunpack.i.h.bf16 %v2655_v42  ;;  %v2656_v56 = vunpack.i.l.bf16 %v2655_v42  ;;  %v2650_v13 = vpop.permute.xlu0 %2649 }
 0x175   : > { %v1347_v22 = vadd.f32 %v1315_v18, %v5243_v48  ;;  %v2652_v31 = vunpack.i.h.bf16 %v2650_v13  ;;  %v2651_v52 = vunpack.i.l.bf16 %v2650_v13  ;;  %v1362_v57 = vadd.f32 %v1330_v55, %v5244_v38  ;;  %v5246_v55 = vld [vmem:[#allocation21_spill] sm:$0xff] }
 0x176   : > { %v1333_v11 = vmul.f32 %v2657_v39, %v4077_v28  ;;  %v1275_v1 = vsel %vm789_vm4, %v2656_v56, %v2657_v39  ;;  %v1346_v63 = vadd.f32 %v1314_v37, %v5245_v6  ;;  %v4194_v60 = vmul.f32 %v4072_v36, %v1363_v47  ;;  %v5247_v36 = vld [vmem:[#allocation22_spill] sm:$0xff]  ;;  %v5248_v56 = vld [vmem:[#allocation39_spill] sm:$0xff] }
 0x177   : > { %v1332_v29 = vmul.f32 %v1275_v1, %v1124_v34  ;;  %v1317_v46 = vmul.f32 %v2652_v31, %v4080_v43  ;;  %v1267_v58 = vsel %vm789_vm4, %v2651_v52, %v2652_v31  ;;  %1564 = vrot.lane.b32.xlu1 %v1347_v22, %s2886_s28  ;;  %v2665_v48 = vpop.permute.xlu1 %2664  ;;  %v4200_v18 = vmul.f32 %v4063_v7, %v1347_v22  ;;  %v5249_v7 = vld [vmem:[#allocation40_spill] sm:$0xff] }
 0x178   : > { %v1365_v28 = vadd.f32 %v1333_v11, %v5246_v55  ;;  %v1316_v8 = vmul.f32 %v1267_v58, %v1108_v26  ;;  %v2667_v42 = vunpack.i.h.bf16 %v2665_v48  ;;  %v2666_v35 = vunpack.i.l.bf16 %v2665_v48  ;;  %v2660_v37 = vpop.permute.xlu0 %2659  ;;  %1562 = vrot.lane.b32.xlu0 %v1346_v63, %s2886_s28 }
 0x179   : > { %v1349_v34 = vadd.f32 %v1317_v46, %v5247_v36  ;;  %v2662_v39 = vunpack.i.h.bf16 %v2660_v37  ;;  %v2661_v43 = vunpack.i.l.bf16 %v2660_v37  ;;  %v1364_v13 = vadd.f32 %v1332_v29, %v5248_v56  ;;  %v5250_v46 = vld [vmem:[#allocation33_spill] sm:$0xff] }
 0x17a   : > { %v1335_v31 = vmul.f32 %v2667_v42, %v4114_v50  ;;  %v1276_v52 = vsel %vm789_vm4, %v2666_v35, %v2667_v42  ;;  %v1348_v22 = vadd.f32 %v1316_v8, %v5249_v7  ;;  %v4210_v38 = vmul.f32 %v4090_v21, %v1346_v63 }
 0x17b   : > { %v1334_v26 = vmul.f32 %v1276_v52, %v1126_v62  ;;  %v1319_v11 = vmul.f32 %v2662_v39, %v4117_v4  ;;  %v1268_v1 = vsel %vm789_vm4, %v2661_v43, %v2662_v39  ;;  %1596 = vrot.lane.b32.xlu1 %v1363_v47, %s2886_s28  ;;  %v4215_v6 = vmul.f32 %v2487_v53, %v1040_v27  ;;  %v5251_v62 = vld [vmem:[#allocation34_spill] sm:$0xff]  ;;  %v5252_v4 = vld [vmem:[#allocation49_spill] sm:$0xff] }
 0x17c   : > { %v1367_v29 = vadd.f32 %v1335_v31, %v5250_v46  ;;  %v1318_v58 = vmul.f32 %v1268_v1, %v1110_v15  ;;  %1594 = vrot.lane.b32.xlu0 %v1362_v57, %s2886_s28  ;;  %v4220_v50 = vmul.f32 %v4103_v32, %v1362_v57  ;;  %v4223_v21 = vmul.f32 %v4084_v41, %v1349_v34  ;;  %v5253_v27 = vld [vmem:[#allocation50_spill] sm:$0xff]  ;;  %v5254_v32 = vld [vmem:[#allocation48_spill] sm:$0xff]  ;;  %v5256_v46 = vld [vmem:[#allocation43_spill] sm:$0xff] }
 0x17d   : > { %v1351_v63 = vadd.f32 %v1319_v11, %v5251_v62  ;;  %v1366_v48 = vadd.f32 %v1334_v26, %v5252_v4  ;;  %v4228_v55 = vmul.f32 %v4139_v20, %v1348_v22  ;;  %v4231_v53 = vmul.f32 %v4094_v61, %v1365_v28  ;;  %v5257_v4 = vld [vmem:[#allocation41_spill] sm:$0xff] }
 0x17e   : > { %v1350_v15 = vadd.f32 %v1318_v58, %v5253_v27  ;;  %v4235_v47 = vmul.f32 %v4152_v49, %v1364_v13  ;;  %v1390_v57 = vmul.f32 %v5227_v51, %v5254_v32  ;;  %v4240_v41 = vmul.f32 %v4124_v0, %v1367_v29 }
 0x17f   : > { %v1088_v8 = vsub.f32 %v3047_v19, %v3726_v25  ;;  %1568 = vrot.lane.b32.xlu1 %v1349_v34, %s2886_s28  ;;  %v1073_v61 = vsub.f32 %v2991_v9, %v3541_v2  ;;  %v4248_v20 = vmul.f32 %v4107_v5, %v1351_v63  ;;  %v4251_v49 = vmul.f32 %v4173_v17, %v1366_v48 }
 0x180   : > { %v1072_v42 = vsub.f32 %v3047_v19, %v3729_v23  ;;  %1566 = vrot.lane.b32.xlu0 %v1348_v22, %s2886_s28  ;;  %v4256_v0 = vmul.f32 %v1390_v57, %v1350_v15  ;;  %v2675_v35 = vpop.permute.xlu1 %2674  ;;  %v5255_v37 = vsub.f32 %v2991_v9, %v3538_v16  ;;  %v1409_v27 = vmul.f32 %v3000_v12, %v5257_v4  ;;  %v5258_v57 = vld [vmem:[#allocation44_spill] sm:$0xff] }
 0x181   : > { %v2677_v34 = vunpack.i.h.bf16 %v2675_v35  ;;  %v2676_v39 = vunpack.i.l.bf16 %v2675_v35  ;;  %v2670_v5 = vpop.permute.xlu0 %2669  ;;  %v1128_v43 = vmul.f32 %v4055_v24, %v1088_v8  ;;  %v1113_v17 = vmul.f32 %v4027_v14, %v1073_v61  ;;  %v5259_v61 = vld [vmem:[#allocation42_spill] sm:$0xff] }
 0x182   : > { %v1129_v36 = vmul.f32 %v4027_v14, %v5255_v37  ;;  %v2672_v56 = vunpack.i.h.bf16 %v2670_v5  ;;  %v2671_v31 = vunpack.i.l.bf16 %v2670_v5  ;;  %v1112_v22 = vmul.f32 %v4055_v24, %v1072_v42 }
 0x183   : > { %1600 = vrot.lane.b32.xlu1 %v1365_v28, %s2886_s28  ;;  %v1277_v7 = vsel %vm789_vm4, %v2676_v39, %v2677_v34  ;;  %v1393_v42 = vmul.f32 %v3000_v12, %v5259_v61  ;;  %v1392_v37 = vmul.f32 %v5227_v51, %v3737_v33  ;;  %v1090_v39 = vsub.f32 %v3047_v19, %v3818_v44  ;;  %v5320_v44 = vld [vmem:[#allocation31_spill] sm:$0xff] }
 0x184   : > { %v1337_v52 = vmul.f32 %v2677_v34, %v1129_v36  ;;  %1598 = vrot.lane.b32.xlu0 %v1364_v13, %s2886_s28  ;;  %v1336_v26 = vmul.f32 %v1277_v7, %v1128_v43  ;;  %v1321_v11 = vmul.f32 %v2672_v56, %v1113_v17  ;;  %v1269_v1 = vsel %vm789_vm4, %v2671_v31, %v2672_v56 }
 0x185   : > { %v1320_v62 = vmul.f32 %v1269_v1, %v1112_v22  ;;  %v1408_v13 = vmul.f32 %v5227_v51, %v3733_v10  ;;  %v1075_v5 = vsub.f32 %v2991_v9, %v3661_v40 }
 0x186   : > { %v1369_v58 = vadd.f32 %v1337_v52, %v5256_v46  ;;  %v1353_v8 = vadd.f32 %v1321_v11, %v5258_v57  ;;  %v1368_v28 = vadd.f32 %v1336_v26, %v3754_v3  ;;  %v1130_v52 = vmul.f32 %v4055_v24, %v1090_v39 }
 0x187   : > { %1572 = vrot.lane.b32.xlu1 %v1351_v63, %s2886_s28  ;;  %v1352_v35 = vadd.f32 %v1320_v62, %v3757_v59  ;;  %v5260_v59 = vld [vmem:[#allocation51_spill] sm:$0xff]  ;;  %v1115_v7 = vmul.f32 %v4027_v14, %v1075_v5 }
 0x188   : > { %1570 = vrot.lane.b32.xlu0 %v1350_v15, %s2886_s28  ;;  %v4283_v36 = vmul.f32 %v1409_v27, %v1369_v58  ;;  %v4285_v34 = vmul.f32 %v1393_v42, %v1353_v8  ;;  %v4287_v63 = vmul.f32 %v1408_v13, %v1368_v28  ;;  %v1091_v15 = vsub.f32 %v2991_v9, %v5260_v59  ;;  %v5261_v27 = vld [vmem:[#allocation54_spill] sm:$0xff]  ;;  %v5263_v42 = vld [vmem:[#allocation55_spill] sm:$0xff] }
 0x189   : > { %v4289_v3 = vmul.f32 %v1392_v37, %v1352_v35  ;;  %v5266_v5 = vld [vmem:[#allocation63_spill] sm:$0xff] }
 0x18a   : > { %v1131_v43 = vmul.f32 %v4027_v14, %v1091_v15  ;;  %v5265_v15 = vld [vmem:[#allocation53_spill] sm:$0xff] }
 0x18b   : > { %1604 = vrot.lane.b32.xlu1 %v1367_v29, %s2886_s28  ;;  %v1074_v29 = vsub.f32 %v3047_v19, %v3821_v54  ;;  %v1395_v39 = vmul.f32 %v3000_v12, %v5265_v15 }
 0x18c   : > { %1602 = vrot.lane.b32.xlu0 %v1366_v48, %s2886_s28 }
 0x18d   : > { %v1114_v46 = vmul.f32 %v4055_v24, %v1074_v29  ;;  %v1410_v29 = vmul.f32 %v5227_v51, %v5266_v5 }
 0x18f   : > { %1576 = vrot.lane.b32.xlu1 %v1353_v8, %s2886_s28 }
 0x190   : > { %1574 = vrot.lane.b32.xlu0 %v1352_v35, %s2886_s28  ;;  %v5264_v35 = vld [vmem:[#allocation65_spill] sm:$0xff] }
 0x193   : > { %1608 = vrot.lane.b32.xlu1 %v1369_v58, %s2886_s28 }
 0x194   : > { %1606 = vrot.lane.b32.xlu0 %v1368_v28, %s2886_s28  ;;  %v5262_v28 = vld [vmem:[#allocation52_spill] sm:$0xff] }
 0x195   : > { %v1411_v61 = vmul.f32 %v3000_v12, %v5262_v28 }
 0x19c   : > { %v2685_v48 = vpop.permute.xlu1 %2684 }
 0x19d   : > { %v2687_v17 = vunpack.i.h.bf16 %v2685_v48  ;;  %v2686_v56 = vunpack.i.l.bf16 %v2685_v48  ;;  %v5267_v48 = vld [vmem:[#allocation66_spill] sm:$0xff] }
 0x19e   : > { %v2680_v31 = vpop.permute.xlu0 %2679 }
 0x19f   : > { %v2682_v22 = vunpack.i.h.bf16 %v2680_v31  ;;  %v2681_v26 = vunpack.i.l.bf16 %v2680_v31  ;;  %v1339_v11 = vmul.f32 %v2687_v17, %v1131_v43  ;;  %v1278_v1 = vsel %vm789_vm4, %v2686_v56, %v2687_v17  ;;  %v5268_v17 = vld [vmem:[#allocation64_spill] sm:$0xff] }
 0x1a0   : > { %v1338_v58 = vmul.f32 %v1278_v1, %v1130_v52  ;;  %v1394_v56 = vmul.f32 %v5227_v51, %v5268_v17  ;;  %v1092_v1 = vsub.f32 %v3047_v19, %v3907_v30  ;;  %v5276_v30 = vld [vmem:[#allocation60_spill] sm:$0xff] }
 0x1a1   : > { %v1323_v62 = vmul.f32 %v2682_v22, %v1115_v7  ;;  %v1270_v4 = vsel %vm789_vm4, %v2681_v26, %v2682_v22  ;;  %v1371_v57 = vadd.f32 %v1339_v11, %v5261_v27  ;;  %v5273_v26 = vld [vmem:[#allocation56_spill] sm:$0xff] }
 0x1a2   : > { %v1322_v8 = vmul.f32 %v1270_v4, %v1114_v46  ;;  %v1370_v37 = vadd.f32 %v1338_v58, %v5264_v35  ;;  %v1093_v11 = vsub.f32 %v2991_v9, %v5273_v26  ;;  %v5274_v46 = vld [vmem:[#allocation57_spill] sm:$0xff] }
 0x1a3   : > { %v1355_v13 = vadd.f32 %v1323_v62, %v5263_v42  ;;  %v4323_v31 = vmul.f32 %v1411_v61, %v1371_v57  ;;  %v1077_v58 = vsub.f32 %v2991_v9, %v5274_v46  ;;  %v5275_v62 = vld [vmem:[#allocation75_spill] sm:$0xff]  ;;  %v1132_v42 = vmul.f32 %v4055_v24, %v1092_v1  ;;  %v5278_v1 = vld [vmem:[#allocation61_spill] sm:$0xff] }
 0x1a4   : > { %v1354_v43 = vadd.f32 %v1322_v8, %v5267_v48  ;;  %v4328_v7 = vmul.f32 %v1410_v29, %v1370_v37  ;;  %v1076_v4 = vsub.f32 %v3047_v19, %v5275_v62  ;;  %v1133_v8 = vmul.f32 %v4027_v14, %v1093_v11 }
 0x1a5   : > { %5269 = vst [vmem:[#allocation17_spill] sm:$0xff] %v4323_v31  ;;  %1580 = vrot.lane.b32.xlu1 %v1355_v13, %s2886_s28  ;;  %v4326_v52 = vmul.f32 %v1395_v39, %v1355_v13  ;;  %v1117_v13 = vmul.f32 %v4027_v14, %v1077_v58  ;;  %v5279_v58 = vld [vmem:[#allocation77_spill] sm:$0xff]  ;;  %v5317_v31 = vld [vmem:[#allocation82_spill] sm:$0xff] }
 0x1a6   : > { %5271 = vst [vmem:[#allocation27_spill] sm:$0xff] %v4328_v7  ;;  %1578 = vrot.lane.b32.xlu0 %v1354_v43, %s2886_s28  ;;  %v4331_v22 = vmul.f32 %v1394_v56, %v1354_v43  ;;  %v1116_v29 = vmul.f32 %v4055_v24, %v1076_v4 }
 0x1a7   : > { %5270 = vst [vmem:[#allocation16_spill] sm:$0xff] %v4326_v52  ;;  %v5319_v52 = vld [vmem:[#allocation83_spill] sm:$0xff] }
 0x1a8   : > { %5272 = vst [vmem:[#allocation28_spill] sm:$0xff] %v4331_v22 }
 0x1a9   : > { %1612 = vrot.lane.b32.xlu1 %v1371_v57, %s2886_s28 }
 0x1aa   : > { %1610 = vrot.lane.b32.xlu0 %v1370_v37, %s2886_s28 }
 0x1b8   : > { %v2695_v27 = vpop.permute.xlu1 %2694 }
 0x1b9   : > { %v2697_v28 = vunpack.i.h.bf16 %v2695_v27  ;;  %v2696_v61 = vunpack.i.l.bf16 %v2695_v27  ;;  %v2690_v57 = vpop.permute.xlu0 %2689  ;;  %v5277_v27 = vld [vmem:[#allocation58_spill] sm:$0xff] }
 0x1ba   : > { %v2692_v35 = vunpack.i.h.bf16 %v2690_v57  ;;  %v2691_v37 = vunpack.i.l.bf16 %v2690_v57  ;;  %v1413_v62 = vmul.f32 %v3000_v12, %v5277_v27  ;;  %v5280_v57 = vld [vmem:[#allocation59_spill] sm:$0xff] }
 0x1bb   : > { %v1341_v15 = vmul.f32 %v2697_v28, %v1133_v8  ;;  %v1279_v39 = vsel %vm789_vm4, %v2696_v61, %v2697_v28  ;;  %v1397_v8 = vmul.f32 %v3000_v12, %v5280_v57  ;;  %v5281_v28 = vld [vmem:[#allocation74_spill] sm:$0xff] }
 0x1bc   : > { %v1340_v48 = vmul.f32 %v1279_v39, %v1132_v42  ;;  %v1325_v43 = vmul.f32 %v2692_v35, %v1117_v13  ;;  %v1271_v56 = vsel %vm789_vm4, %v2691_v37, %v2692_v35  ;;  %v1412_v4 = vmul.f32 %v5227_v51, %v5281_v28  ;;  %v5282_v61 = vld [vmem:[#allocation78_spill] sm:$0xff]  ;;  %v5283_v13 = vld [vmem:[#allocation76_spill] sm:$0xff] }
 0x1bd   : > { %v1373_v11 = vadd.f32 %v1341_v15, %v5276_v30  ;;  %v1324_v26 = vmul.f32 %v1271_v56, %v1116_v29  ;;  %v1396_v35 = vmul.f32 %v5227_v51, %v5283_v13  ;;  %v5291_v56 = vld [vmem:[#allocation87_spill] sm:$0xff] }
 0x1be   : > { %v1357_v46 = vadd.f32 %v1325_v43, %v5278_v1  ;;  %v1372_v5 = vadd.f32 %v1340_v48, %v5279_v58  ;;  %v5289_v48 = vld [vmem:[#allocation85_spill] sm:$0xff]  ;;  %v1078_v27 = vsub.f32 %v3047_v19, %v5291_v56 }
 0x1bf   : > { %v1356_v42 = vadd.f32 %v1324_v26, %v5282_v61  ;;  %v4361_v30 = vmul.f32 %v1413_v62, %v1373_v11  ;;  %v5288_v26 = vld [vmem:[#allocation67_spill] sm:$0xff]  ;;  %v1094_v62 = vsub.f32 %v3047_v19, %v5289_v48  ;;  %v5290_v43 = vld [vmem:[#allocation69_spill] sm:$0xff] }
 0x1c0   : > { %1584 = vrot.lane.b32.xlu1 %v1357_v46, %s2886_s28  ;;  %v4364_v37 = vmul.f32 %v1397_v8, %v1357_v46  ;;  %v4366_v15 = vmul.f32 %v1412_v4, %v1372_v5  ;;  %v1095_v29 = vsub.f32 %v2991_v9, %v5288_v26  ;;  %v1079_v46 = vsub.f32 %v2991_v9, %v5290_v43 }
 0x1c1   : > { %5284 = vst [vmem:[#allocation21_spill] sm:$0xff] %v4361_v30  ;;  %1582 = vrot.lane.b32.xlu0 %v1356_v42, %s2886_s28  ;;  %v4369_v39 = vmul.f32 %v1396_v35, %v1356_v42  ;;  %v1118_v26 = vmul.f32 %v4055_v24, %v1078_v27 }
 0x1c2   : > { %5285 = vst [vmem:[#allocation22_spill] sm:$0xff] %v4364_v37  ;;  %5286 = vst [vmem:[#allocation39_spill] sm:$0xff] %v4366_v15  ;;  %v1135_v58 = vmul.f32 %v4027_v14, %v1095_v29  ;;  %v1119_v4 = vmul.f32 %v4027_v14, %v1079_v46  ;;  %v5292_v15 = vld [vmem:[#allocation71_spill] sm:$0xff]  ;;  %v5295_v46 = vld [vmem:[#allocation89_spill] sm:$0xff] }
 0x1c3   : > { %5287 = vst [vmem:[#allocation40_spill] sm:$0xff] %v4369_v39 }
 0x1c4   : > { %1616 = vrot.lane.b32.xlu1 %v1373_v11, %s2886_s28 }
 0x1c5   : > { %1614 = vrot.lane.b32.xlu0 %v1372_v5, %s2886_s28  ;;  %v1134_v5 = vmul.f32 %v4055_v24, %v1094_v62  ;;  %v5294_v62 = vld [vmem:[#allocation72_spill] sm:$0xff] }
 0x1d4   : > { %v2705_v1 = vpop.permute.xlu1 %2704 }
 0x1d5   : > { %v2707_v57 = vunpack.i.h.bf16 %v2705_v1  ;;  %v2706_v8 = vunpack.i.l.bf16 %v2705_v1  ;;  %v2700_v11 = vpop.permute.xlu0 %2699  ;;  %v5293_v1 = vld [vmem:[#allocation68_spill] sm:$0xff] }
 0x1d6   : > { %v2702_v61 = vunpack.i.h.bf16 %v2700_v11  ;;  %v2701_v42 = vunpack.i.l.bf16 %v2700_v11  ;;  %v1415_v13 = vmul.f32 %v3000_v12, %v5293_v1  ;;  %v5296_v11 = vld [vmem:[#allocation70_spill] sm:$0xff]  ;;  %v5308_v1 = vld [vmem:[#allocation24_spill] sm:$0xff] }
 0x1d7   : > { %v1343_v35 = vmul.f32 %v2707_v57, %v1135_v58  ;;  %v1280_v48 = vsel %vm789_vm4, %v2706_v8, %v2707_v57  ;;  %v1399_v58 = vmul.f32 %v3000_v12, %v5296_v11  ;;  %v5297_v57 = vld [vmem:[#allocation86_spill] sm:$0xff]  ;;  %v5310_v11 = vld [vmem:[#allocation9_spill] sm:$0xff] }
 0x1d8   : > { %v1342_v43 = vmul.f32 %v1280_v48, %v1134_v5  ;;  %v1327_v28 = vmul.f32 %v2702_v61, %v1119_v4  ;;  %v1272_v56 = vsel %vm789_vm4, %v2701_v42, %v2702_v61  ;;  %v1414_v27 = vmul.f32 %v5227_v51, %v5297_v57  ;;  %v5298_v48 = vld [vmem:[#allocation90_spill] sm:$0xff]  ;;  %v5299_v5 = vld [vmem:[#allocation88_spill] sm:$0xff]  ;;  %v5306_v42 = vld [vmem:[#allocation15_spill] sm:$0xff] }
 0x1d9   : > { %v1375_v29 = vadd.f32 %v1343_v35, %v5292_v15  ;;  %v1326_v30 = vmul.f32 %v1272_v56, %v1118_v26  ;;  %v1398_v4 = vmul.f32 %v5227_v51, %v5299_v5  ;;  %v5304_v56 = vld [vmem:[#allocation14_spill] sm:$0xff]  ;;  %v5314_v57 = vld [vmem:[#allocation23_spill] sm:$0xff] }
 0x1da   : > { %v1359_v39 = vadd.f32 %v1327_v28, %v5294_v62  ;;  %v1374_v37 = vadd.f32 %v1342_v43, %v5295_v46  ;;  %v5305_v61 = vld [vmem:[#allocation6_spill] sm:$0xff]  ;;  %v5309_v62 = vld [vmem:[#allocation8_spill] sm:$0xff] }
 0x1db   : > { %v1358_v8 = vadd.f32 %v1326_v30, %v5298_v48  ;;  %v4399_v15 = vmul.f32 %v1415_v13, %v1375_v29  ;;  %v1427_v30 = vsub.f32 %v5305_v61, %v5304_v56  ;;  %v1443_v35 = vsub.f32 %v5305_v61, %v5306_v42  ;;  %v5307_v13 = vld [vmem:[#allocation79_spill] sm:$0xff]  ;;  %v5312_v48 = vld [vmem:[#allocation32_spill] sm:$0xff] }
 0x1dc   : > { %1588 = vrot.lane.b32.xlu1 %v1359_v39, %s2886_s28  ;;  %v4402_v26 = vmul.f32 %v1399_v58, %v1359_v39  ;;  %v4404_v28 = vmul.f32 %v1414_v27, %v1374_v37  ;;  %v1097_v39 = vsub.f32 %v2991_v9, %v5307_v13  ;;  %v1426_v46 = vsub.f32 %v5309_v62, %v5308_v1  ;;  %v5311_v27 = vld [vmem:[#allocation81_spill] sm:$0xff]  ;;  %v5313_v56 = vld [vmem:[#allocation7_spill] sm:$0xff] }
 0x1dd   : > { %5300 = vst [vmem:[#allocation33_spill] sm:$0xff] %v4399_v15  ;;  %1586 = vrot.lane.b32.xlu0 %v1358_v8, %s2886_s28  ;;  %v4407_v43 = vmul.f32 %v1398_v4, %v1358_v8  ;;  %v1096_v58 = vsub.f32 %v3047_v19, %v5310_v11  ;;  %v1080_v8 = vsub.f32 %v3047_v19, %v5312_v48 }
 0x1de   : > { %5301 = vst [vmem:[#allocation34_spill] sm:$0xff] %v4402_v26  ;;  %5302 = vst [vmem:[#allocation49_spill] sm:$0xff] %v4404_v28  ;;  %v1467_v42 = vmul.f32 %v5313_v56, %v1427_v30  ;;  %v1442_v13 = vsub.f32 %v5309_v62, %v5314_v57  ;;  %v5315_v28 = vld [vmem:[#allocation19_spill] sm:$0xff]  ;;  %v1137_v15 = vmul.f32 %v4027_v14, %v1097_v39 }
 0x1df   : > { %5303 = vst [vmem:[#allocation50_spill] sm:$0xff] %v4407_v43  ;;  %v1429_v1 = vsub.f32 %v5305_v61, %v5315_v28  ;;  %v1136_v19 = vmul.f32 %v4055_v24, %v1096_v58  ;;  %v1120_v57 = vmul.f32 %v4055_v24, %v1080_v8  ;;  %v1401_v28 = vmul.f32 %v3000_v12, %v5317_v31  ;;  %v5321_v24 = vld [vmem:[#allocation84_spill] sm:$0xff] }
 0x1e0   : > { %1620 = vrot.lane.b32.xlu1 %v1375_v29, %s2886_s28  ;;  %v1081_v29 = vsub.f32 %v2991_v9, %v5311_v27  ;;  %v5316_v9 = vld [vmem:[#allocation10_spill] sm:$0xff] }
 0x1e1   : > { %1618 = vrot.lane.b32.xlu0 %v1374_v37, %s2886_s28  ;;  %v1483_v37 = vmul.f32 %v5313_v56, %v1443_v35  ;;  %v1466_v27 = vmul.f32 %v5316_v9, %v1426_v46  ;;  %v5318_v46 = vld [vmem:[#allocation80_spill] sm:$0xff] }
 0x1e2   : > { %v1121_v48 = vmul.f32 %v4027_v14, %v1081_v29  ;;  %v1417_v58 = vmul.f32 %v3000_v12, %v5318_v46 }
 0x1e4   : > { %v2715_v4 = vpop.permute.xlu1 %2714 }
 0x1e5   : > { %v2717_v11 = vunpack.i.h.bf16 %v2715_v4  ;;  %v2716_v43 = vunpack.i.l.bf16 %v2715_v4  ;;  %v2710_v5 = vpop.permute.xlu0 %2709 }
 0x1e6   : > { %v2712_v30 = vunpack.i.h.bf16 %v2710_v5  ;;  %v2711_v26 = vunpack.i.l.bf16 %v2710_v5 }
 0x1e7   : > { %v1345_v35 = vmul.f32 %v2717_v11, %v1137_v15  ;;  %v1281_v7 = vsel %vm789_vm4, %v2716_v43, %v2717_v11  ;;  %v1400_v43 = vmul.f32 %v5227_v51, %v5320_v44 }
 0x1e8   : > { %v1344_v39 = vmul.f32 %v1281_v7, %v1136_v19  ;;  %v1329_v17 = vmul.f32 %v2712_v30, %v1121_v48  ;;  %v1273_v4 = vsel %vm789_vm4, %v2711_v26, %v2712_v30  ;;  %v5322_v48 = vld [vmem:[#allocation20_spill] sm:$0xff]  ;;  %v1482_v19 = vmul.f32 %v5316_v9, %v1442_v13 }
 0x1e9   : > { %v1565_v22 = vpop.permute.xlu1 %1564  ;;  %v1377_v14 = vadd.f32 %v1345_v35, %v5319_v52  ;;  %v1328_v29 = vmul.f32 %v1273_v4, %v1120_v57  ;;  %v1416_v26 = vmul.f32 %v5227_v51, %v5322_v48  ;;  %v5324_v30 = vld [vmem:[#allocation12_spill] sm:$0xff] }
 0x1ea   : > { %v1675_v5 = vmul.f32 %v1565_v22, %v1467_v42  ;;  %v1563_v15 = vpop.permute.xlu0 %1562  ;;  %v1361_v11 = vadd.f32 %v1329_v17, %v5321_v24  ;;  %v1376_v7 = vadd.f32 %v1344_v39, %v4184_v45  ;;  %v5323_v45 = vld [vmem:[#allocation26_spill] sm:$0xff] }
 0x1eb   : > { %v1626_v31 = vsel %vm789_vm4, %v1563_v15, %v1565_v22  ;;  %v1360_v52 = vadd.f32 %v1328_v29, %v4215_v6  ;;  %v4452_v57 = vmul.f32 %v1417_v58, %v1377_v14  ;;  %v1742_v35 = vmul.f32 %v5324_v30, %v5323_v45  ;;  %v5327_v15 = vld [vmem:[#allocation25_spill] sm:$0xff] }
 0x1ec   : > { %v1707_v8 = vadd.f32 %v1675_v5, %v4200_v18  ;;  %v1674_v12 = vmul.f32 %v1626_v31, %v1466_v27  ;;  %1592 = vrot.lane.b32.xlu1 %v1361_v11, %s2886_s28  ;;  %v4456_v17 = vmul.f32 %v1401_v28, %v1361_v11  ;;  %v4458_v22 = vmul.f32 %v1416_v26, %v1376_v7  ;;  %v5325_v27 = vld [vmem:[#allocation36_spill] sm:$0xff]  ;;  %v5326_v28 = vld [vmem:[#allocation18_spill] sm:$0xff] }
 0x1ed   : > { %v1597_v42 = vpop.permute.xlu1 %1596  ;;  %1590 = vrot.lane.b32.xlu0 %v1360_v52, %s2886_s28  ;;  %v1428_v39 = vsub.f32 %v5309_v62, %v5325_v27  ;;  %v4466_v4 = vmul.f32 %v1400_v43, %v1360_v52  ;;  %v1445_v46 = vsub.f32 %v5305_v61, %v5326_v28  ;;  %v1469_v5 = vmul.f32 %v5313_v56, %v1429_v1  ;;  %v5331_v28 = vld [vmem:[#allocation46_spill] sm:$0xff] }
 0x1ee   : > { %v1706_v51 = vadd.f32 %v1674_v12, %v4210_v38  ;;  %v1691_v18 = vmul.f32 %v1597_v42, %v1483_v37  ;;  %v1595_v6 = vpop.permute.xlu0 %1594  ;;  %v1750_v24 = vmul.f32 %v5324_v30, %v5327_v15 }
 0x1ef   : > { %v1634_v13 = vsel %vm789_vm4, %v1595_v6, %v1597_v42  ;;  %v1468_v31 = vmul.f32 %v5316_v9, %v1428_v39  ;;  %v1485_v52 = vmul.f32 %v5313_v56, %v1445_v46  ;;  %v1430_v46 = vsub.f32 %v5309_v62, %v5331_v28 }
 0x1f0   : > { %v1723_v58 = vadd.f32 %v1691_v18, %v4194_v60  ;;  %v1690_v29 = vmul.f32 %v1634_v13, %v1482_v19  ;;  %v4473_v38 = vmul.f32 %v1742_v35, %v1706_v51  ;;  %1624 = vrot.lane.b32.xlu1 %v1377_v14, %s2886_s28  ;;  %v5328_v60 = vld [vmem:[#allocation35_spill] sm:$0xff]  ;;  %v5329_v19 = vld [vmem:[#allocation30_spill] sm:$0xff] }
 0x1f1   : > { %v1569_v37 = vpop.permute.xlu1 %1568  ;;  %1622 = vrot.lane.b32.xlu0 %v1376_v7, %s2886_s28  ;;  %v1444_v12 = vsub.f32 %v5309_v62, %v5328_v60  ;;  %v1431_v45 = vsub.f32 %v5305_v61, %v5329_v19  ;;  %v5330_v35 = vld [vmem:[#allocation38_spill] sm:$0xff] }
 0x1f2   : > { %v1722_v43 = vadd.f32 %v1690_v29, %v4220_v50  ;;  %v1677_v11 = vmul.f32 %v1569_v37, %v1469_v5  ;;  %v1567_v26 = vpop.permute.xlu0 %1566  ;;  %v1743_v18 = vmul.f32 %v5324_v30, %v5330_v35  ;;  %v5332_v5 = vld [vmem:[#allocation29_spill] sm:$0xff]  ;;  %v1433_v35 = vsub.f32 %v5305_v61, %v3541_v2 }
 0x1f3   : > { %v1627_v1 = vsel %vm789_vm4, %v1567_v26, %v1569_v37  ;;  %v1484_v13 = vmul.f32 %v5316_v9, %v1444_v12 }
 0x1f4   : > { %v1709_v14 = vadd.f32 %v1677_v11, %v4223_v21  ;;  %v1676_v42 = vmul.f32 %v1627_v1, %v1468_v31  ;;  %v4488_v50 = vmul.f32 %v1750_v24, %v1722_v43  ;;  %1848 = vrot.lane.b32.xlu1 %v1707_v8, %s2886_s28  ;;  %v1447_v8 = vsub.f32 %v5305_v61, %v5332_v5  ;;  %v5333_v11 = vld [vmem:[#allocation37_spill] sm:$0xff] }
 0x1f5   : > { %v1601_v7 = vpop.permute.xlu1 %1600  ;;  %1846 = vrot.lane.b32.xlu0 %v1706_v51, %s2886_s28  ;;  %v1471_v24 = vmul.f32 %v5313_v56, %v1431_v45  ;;  %v1751_v31 = vmul.f32 %v5324_v30, %v5333_v11  ;;  %v1470_v1 = vmul.f32 %v5316_v9, %v1430_v46  ;;  %v1432_v46 = vsub.f32 %v5309_v62, %v3729_v23 }
 0x1f6   : > { %v1708_v6 = vadd.f32 %v1676_v42, %v4228_v55  ;;  %v1693_v39 = vmul.f32 %v1601_v7, %v1485_v52  ;;  %v1599_v21 = vpop.permute.xlu0 %1598  ;;  %v1487_v45 = vmul.f32 %v5313_v56, %v1447_v8  ;;  %v5335_v8 = vld [vmem:[#allocation47_spill] sm:$0xff] }
 0x1f7   : > { %v1635_v29 = vsel %vm789_vm4, %v1599_v21, %v1601_v7 }
 0x1f8   : > { %v1725_v37 = vadd.f32 %v1693_v39, %v4231_v53  ;;  %v1692_v15 = vmul.f32 %v1635_v29, %v1484_v13  ;;  %v4503_v55 = vmul.f32 %v1743_v18, %v1708_v6  ;;  %1880 = vrot.lane.b32.xlu1 %v1723_v58, %s2886_s28  ;;  %v5334_v53 = vld [vmem:[#allocation45_spill] sm:$0xff]  ;;  %v1744_v18 = vmul.f32 %v5324_v30, %v5254_v32 }
 0x1f9   : > { %v1573_v51 = vpop.permute.xlu1 %1572  ;;  %1878 = vrot.lane.b32.xlu0 %v1722_v43, %s2886_s28  ;;  %v1446_v42 = vsub.f32 %v5309_v62, %v5334_v53  ;;  %v1473_v32 = vmul.f32 %v5313_v56, %v1433_v35 }
 0x1fa   : > { %v1724_v26 = vadd.f32 %v1692_v15, %v4235_v47  ;;  %v1679_v12 = vmul.f32 %v1573_v51, %v1471_v24  ;;  %v1571_v52 = vpop.permute.xlu0 %1570  ;;  %v1752_v15 = vmul.f32 %v5324_v30, %v5335_v8 }
 0x1fb   : > { %v1628_v19 = vsel %vm789_vm4, %v1571_v52, %v1573_v51  ;;  %v1486_v21 = vmul.f32 %v5316_v9, %v1446_v42 }
 0x1fc   : > { %v1711_v58 = vadd.f32 %v1679_v12, %v4248_v20  ;;  %v1678_v7 = vmul.f32 %v1628_v19, %v1470_v1  ;;  %v4518_v47 = vmul.f32 %v1751_v31, %v1724_v26  ;;  %1852 = vrot.lane.b32.xlu1 %v1709_v14, %s2886_s28  ;;  %v1449_v14 = vsub.f32 %v5305_v61, %v3538_v16 }
 0x1fd   : > { %v1605_v43 = vpop.permute.xlu1 %1604  ;;  %1850 = vrot.lane.b32.xlu0 %v1708_v6, %s2886_s28  ;;  %v1472_v16 = vmul.f32 %v5316_v9, %v1432_v46 }
 0x1fe   : > { %v1710_v39 = vadd.f32 %v1678_v7, %v4256_v0  ;;  %v1695_v13 = vmul.f32 %v1605_v43, %v1487_v45  ;;  %v1603_v20 = vpop.permute.xlu0 %1602  ;;  %v1489_v1 = vmul.f32 %v5313_v56, %v1449_v14  ;;  %v1745_v7 = vmul.f32 %v5324_v30, %v3737_v33 }
 0x1ff   : > { %v1636_v2 = vsel %vm789_vm4, %v1603_v20, %v1605_v43  ;;  %v1435_v33 = vsub.f32 %v5305_v61, %v3661_v40 }
 0x200   : > { %v1727_v29 = vadd.f32 %v1695_v13, %v4240_v41  ;;  %v1694_v5 = vmul.f32 %v1636_v2, %v1486_v21  ;;  %v4533_v0 = vmul.f32 %v1744_v18, %v1710_v39  ;;  %1884 = vrot.lane.b32.xlu1 %v1725_v37, %s2886_s28  ;;  %v1448_v41 = vsub.f32 %v5309_v62, %v3726_v25  ;;  %v5336_v2 = vld [vmem:[#allocation62_spill] sm:$0xff] }
 0x201   : > { %v1577_v6 = vpop.permute.xlu1 %1576  ;;  %1882 = vrot.lane.b32.xlu0 %v1724_v26, %s2886_s28  ;;  %v1450_v14 = vsub.f32 %v5309_v62, %v5336_v2 }
 0x202   : > { %v1726_v24 = vadd.f32 %v1694_v5, %v4251_v49  ;;  %v1681_v51 = vmul.f32 %v1577_v6, %v1473_v32  ;;  %v1575_v11 = vpop.permute.xlu0 %1574  ;;  %v1488_v19 = vmul.f32 %v5316_v9, %v1448_v41  ;;  %v5337_v5 = vld [vmem:[#allocation16_spill] sm:$0xff] }
 0x203   : > { %v1629_v31 = vsel %vm789_vm4, %v1575_v11, %v1577_v6  ;;  %v5339_v11 = vld [vmem:[#allocation64_spill] sm:$0xff] }
 0x204   : > { %v1713_v12 = vadd.f32 %v1681_v51, %v4285_v34  ;;  %v1680_v37 = vmul.f32 %v1629_v31, %v1472_v16  ;;  %v4546_v52 = vmul.f32 %v1752_v15, %v1726_v24  ;;  %1856 = vrot.lane.b32.xlu1 %v1711_v58, %s2886_s28  ;;  %v1753_v58 = vmul.f32 %v5324_v30, %v3733_v10  ;;  %v5338_v15 = vld [vmem:[#allocation28_spill] sm:$0xff] }
 0x205   : > { %v1609_v49 = vpop.permute.xlu1 %1608  ;;  %1854 = vrot.lane.b32.xlu0 %v1710_v39, %s2886_s28  ;;  %v1451_v10 = vsub.f32 %v5305_v61, %v5260_v59  ;;  %v1490_v59 = vmul.f32 %v5316_v9, %v1450_v14  ;;  %v1746_v41 = vmul.f32 %v5324_v30, %v5339_v11  ;;  %v5349_v11 = vld [vmem:[#allocation76_spill] sm:$0xff] }
 0x206   : > { %v1712_v26 = vadd.f32 %v1680_v37, %v4289_v3  ;;  %v1697_v42 = vmul.f32 %v1609_v49, %v1489_v1  ;;  %v1607_v45 = vpop.permute.xlu0 %1606 }
 0x207   : > { %v1637_v34 = vsel %vm789_vm4, %v1607_v45, %v1609_v49  ;;  %v1491_v6 = vmul.f32 %v5313_v56, %v1451_v10 }
 0x208   : > { %v1729_v35 = vadd.f32 %v1697_v42, %v4283_v36  ;;  %v1696_v43 = vmul.f32 %v1637_v34, %v1488_v19  ;;  %v4556_v18 = vmul.f32 %v1745_v7, %v1712_v26  ;;  %1888 = vrot.lane.b32.xlu1 %v1727_v29, %s2886_s28  ;;  %v1434_v36 = vsub.f32 %v5309_v62, %v3821_v54  ;;  %v5342_v19 = vld [vmem:[#allocation63_spill] sm:$0xff]  ;;  %v5343_v34 = vld [vmem:[#allocation57_spill] sm:$0xff] }
 0x209   : > { %1886 = vrot.lane.b32.xlu0 %v1726_v24, %s2886_s28  ;;  %v1754_v45 = vmul.f32 %v5324_v30, %v5342_v19 }
 0x20a   : > { %v1728_v3 = vadd.f32 %v1696_v43, %v4287_v63  ;;  %v1475_v63 = vmul.f32 %v5313_v56, %v1435_v33  ;;  %v1474_v20 = vmul.f32 %v5316_v9, %v1434_v36  ;;  %v5344_v43 = vld [vmem:[#allocation75_spill] sm:$0xff]  ;;  %v5345_v33 = vld [vmem:[#allocation56_spill] sm:$0xff] }
 0x20b   : > { %v1453_v36 = vsub.f32 %v5305_v61, %v5345_v33 }
 0x20c   : > { %v4563_v39 = vmul.f32 %v1753_v58, %v1728_v3  ;;  %1860 = vrot.lane.b32.xlu1 %v1713_v12, %s2886_s28  ;;  %v5340_v12 = vld [vmem:[#allocation17_spill] sm:$0xff] }
 0x20d   : > { %1858 = vrot.lane.b32.xlu0 %v1712_v26, %s2886_s28  ;;  %v5341_v26 = vld [vmem:[#allocation27_spill] sm:$0xff] }
 0x210   : > { %1892 = vrot.lane.b32.xlu1 %v1729_v35, %s2886_s28  ;;  %v1437_v35 = vsub.f32 %v5305_v61, %v5343_v34 }
 0x211   : > { %1890 = vrot.lane.b32.xlu0 %v1728_v3, %s2886_s28  ;;  %v1436_v3 = vsub.f32 %v5309_v62, %v5344_v43 }
 0x212   : > { %v1477_v58 = vmul.f32 %v5313_v56, %v1437_v35 }
 0x217   : > { %v1581_v13 = vpop.permute.xlu1 %1580 }
 0x218   : > { %v1683_v21 = vmul.f32 %v1581_v13, %v1475_v63  ;;  %v1579_v46 = vpop.permute.xlu0 %1578 }
 0x219   : > { %v1630_v29 = vsel %vm789_vm4, %v1579_v46, %v1581_v13  ;;  %v1476_v13 = vmul.f32 %v5316_v9, %v1436_v3  ;;  %v2118_v3 = vld [vmem:[%s5041_s2] sm:$0xff] }
 0x21a   : > { %v1715_v40 = vadd.f32 %v1683_v21, %v5337_v5  ;;  %v1682_v32 = vmul.f32 %v1630_v29, %v1474_v20  ;;  %v5346_v20 = vld [vmem:[#allocation73_spill] sm:$0xff]  ;;  %v5347_v29 = vld [vmem:[#allocation22_spill] sm:$0xff] }
 0x21b   : > { %v1613_v8 = vpop.permute.xlu1 %1612  ;;  %v1452_v46 = vsub.f32 %v5309_v62, %v5346_v20 }
 0x21c   : > { %v1714_v24 = vadd.f32 %v1682_v32, %v5338_v15  ;;  %v1699_v51 = vmul.f32 %v1613_v8, %v1491_v6  ;;  %1864 = vrot.lane.b32.xlu1 %v1715_v40, %s2886_s28  ;;  %v1611_v16 = vpop.permute.xlu0 %1610  ;;  %v1493_v32 = vmul.f32 %v5313_v56, %v1453_v36  ;;  %v5348_v15 = vld [vmem:[#allocation40_spill] sm:$0xff]  ;;  %v5353_v36 = vld [vmem:[#allocation69_spill] sm:$0xff] }
 0x21d   : > { %v1638_v31 = vsel %vm789_vm4, %v1611_v16, %v1613_v8  ;;  %v2888_v8 = vmov 0.0|0.0  }
 0x21e   : > { %v1731_v37 = vadd.f32 %v1699_v51, %v5340_v12  ;;  %v1698_v1 = vmul.f32 %v1638_v31, %v1490_v59  ;;  %1862 = vrot.lane.b32.xlu0 %v1714_v24, %s2886_s28  ;;  %v4590_v49 = vmul.f32 %v1746_v41, %v1714_v24  ;;  %2527 = vmatprep.subr.bf16.mxu0 %v2888_v8  ;;  %v5350_v12 = vld [vmem:[#allocation21_spill] sm:$0xff] }
 0x21f   : > { %2554 = vmatprep.subr.bf16.mxu1 %v2888_v8  ;;  %v1492_v59 = vmul.f32 %v5316_v9, %v1452_v46  ;;  %v1747_v41 = vmul.f32 %v5324_v30, %v5349_v11  ;;  %v2121_v46 = vld [vmem:[%s5041_s2 + $0x18] sm:$0xff]  ;;  %v2123_v11 = vld [vmem:[%s5041_s2 + $0x28] sm:$0xff] }
 0x220   : > { %v1730_v42 = vadd.f32 %v1698_v1, %v5341_v26  ;;  %1896 = vrot.lane.b32.xlu1 %v1731_v37, %s2886_s28 }
 0x222   : > { %1894 = vrot.lane.b32.xlu0 %v1730_v42, %s2886_s28  ;;  %v4597_v7 = vmul.f32 %v1754_v45, %v1730_v42  ;;  %v5351_v42 = vld [vmem:[#allocation39_spill] sm:$0xff]  ;;  %v5352_v45 = vld [vmem:[#allocation74_spill] sm:$0xff] }
 0x223   : > { %v1755_v34 = vmul.f32 %v5324_v30, %v5352_v45  ;;  %v2125_v45 = vld [vmem:[%s5041_s2 + $0x38] sm:$0xff] }
 0x232   : > { %v1585_v63 = vpop.permute.xlu1 %1584 }
 0x233   : > { %v1685_v10 = vmul.f32 %v1585_v63, %v1477_v58  ;;  %v1583_v21 = vpop.permute.xlu0 %1582  ;;  %v2119_v58 = vld [vmem:[%s5041_s2 + $0x8] sm:$0xff] }
 0x234   : > { %v1631_v14 = vsel %vm789_vm4, %v1583_v21, %v1585_v63  ;;  %v2528_v33 = vpack.c.bf16 %v2119_v58, %v2118_v3  ;;  %v1439_v63 = vsub.f32 %v5305_v61, %v5353_v36  ;;  %v2120_v21 = vld [vmem:[%s5041_s2 + $0x10] sm:$0xff]  ;;  %v5358_v3 = vld [vmem:[#allocation88_spill] sm:$0xff] }
 0x235   : > { %v1717_v5 = vadd.f32 %v1685_v10, %v5347_v29  ;;  %v1684_v40 = vmul.f32 %v1631_v14, %v1476_v13  ;;  %v5354_v10 = vld [vmem:[#allocation87_spill] sm:$0xff]  ;;  %v2531_v14 = vpack.c.bf16 %v2121_v46, %v2120_v21  ;;  %v1748_v58 = vmul.f32 %v5324_v30, %v5358_v3  ;;  %v5359_v36 = vld [vmem:[#allocation50_spill] sm:$0xff] }
 0x236   : > { %v1617_v6 = vpop.permute.xlu1 %1616  ;;  %2529 = vmatpush1.bf16.msra.mxu0 %v2528_v33  ;;  %2563 = vmatpush1.bf16.msra.mxu1 %v2528_v33  ;;  %v1438_v13 = vsub.f32 %v5309_v62, %v5354_v10  ;;  %v1479_v29 = vmul.f32 %v5313_v56, %v1439_v63 }
 0x237   : > { %v1716_v24 = vadd.f32 %v1684_v40, %v5348_v15  ;;  %v1701_v51 = vmul.f32 %v1617_v6, %v1493_v32  ;;  %1868 = vrot.lane.b32.xlu1 %v1717_v5, %s2886_s28  ;;  %v1615_v16 = vpop.permute.xlu0 %1614  ;;  %2530 = vmatprep.subr.bf16.mxu0 %v2888_v8  ;;  %v5355_v5 = vld [vmem:[#allocation67_spill] sm:$0xff] }
 0x238   : > { %v1639_v31 = vsel %vm789_vm4, %v1615_v16, %v1617_v6  ;;  %2555 = vmatprep.subr.bf16.mxu1 %v2888_v8  ;;  %v1455_v40 = vsub.f32 %v5305_v61, %v5355_v5  ;;  %v1478_v15 = vmul.f32 %v5316_v9, %v1438_v13  ;;  %v2122_v16 = vld [vmem:[%s5041_s2 + $0x20] sm:$0xff] }
 0x239   : > { %v1733_v37 = vadd.f32 %v1701_v51, %v5350_v12  ;;  %v1700_v1 = vmul.f32 %v1639_v31, %v1492_v59  ;;  %1866 = vrot.lane.b32.xlu0 %v1716_v24, %s2886_s28  ;;  %v4622_v26 = vmul.f32 %v1747_v41, %v1716_v24  ;;  %v5356_v51 = vld [vmem:[#allocation85_spill] sm:$0xff]  ;;  %v2534_v31 = vpack.c.bf16 %v2123_v11, %v2122_v16  ;;  %v5357_v12 = vld [vmem:[#allocation34_spill] sm:$0xff] }
 0x23a   : > { %2532 = vmatpush1.bf16.msra.mxu0 %v2531_v14  ;;  %2564 = vmatpush1.bf16.msra.mxu1 %v2531_v14  ;;  %v1454_v59 = vsub.f32 %v5309_v62, %v5356_v51  ;;  %v5362_v11 = vld [vmem:[#allocation86_spill] sm:$0xff] }
 0x23b   : > { %v1732_v19 = vadd.f32 %v1700_v1, %v5351_v42  ;;  %1900 = vrot.lane.b32.xlu1 %v1733_v37, %s2886_s28  ;;  %2533 = vmatprep.subr.bf16.mxu0 %v2888_v8  ;;  %v1495_v42 = vmul.f32 %v5313_v56, %v1455_v40 }
 0x23c   : > { %2556 = vmatprep.subr.bf16.mxu1 %v2888_v8  ;;  %v1494_v21 = vmul.f32 %v5316_v9, %v1454_v59  ;;  %v5361_v59 = vld [vmem:[#allocation49_spill] sm:$0xff] }
 0x23d   : > { %1898 = vrot.lane.b32.xlu0 %v1732_v19, %s2886_s28  ;;  %v4629_v35 = vmul.f32 %v1755_v34, %v1732_v19  ;;  %v2124_v19 = vld [vmem:[%s5041_s2 + $0x30] sm:$0xff] }
 0x23e   : > { %2535 = vmatpush1.bf16.msra.mxu0 %v2534_v31  ;;  %2565 = vmatpush1.bf16.msra.mxu1 %v2534_v31  ;;  %v2537_v33 = vpack.c.bf16 %v2125_v45, %v2124_v19  ;;  %v5363_v31 = vld [vmem:[#allocation81_spill] sm:$0xff]  ;;  %v2128_v19 = vld [vmem:[%s5041_s2 + $0x50] sm:$0xff]  ;;  %v2129_v45 = vld [vmem:[%s5041_s2 + $0x58] sm:$0xff] }
 0x23f   : > { %2536 = vmatprep.subr.bf16.mxu0 %v2888_v8  ;;  %2557 = vmatprep.subr.bf16.mxu1 %v2888_v8 }
 0x242   : > { %2538 = vmatpush1.bf16.msra.mxu0 %v2537_v33  ;;  %2566 = vmatpush1.bf16.msra.mxu1 %v2537_v33 }
 0x243   : > { %2539 = vmatprep.subr.bf16.mxu0 %v2888_v8  ;;  %2558 = vmatprep.subr.bf16.mxu1 %v2888_v8 }
 0x24e   : > { %v1589_v32 = vpop.permute.xlu1 %1588 }
 0x24f   : > { %v1687_v6 = vmul.f32 %v1589_v32, %v1479_v29  ;;  %v1587_v24 = vpop.permute.xlu0 %1586  ;;  %v5360_v29 = vld [vmem:[#allocation33_spill] sm:$0xff] }
 0x250   : > { %v1632_v41 = vsel %vm789_vm4, %v1587_v24, %v1589_v32 }
 0x251   : > { %v1719_v37 = vadd.f32 %v1687_v6, %v5357_v12  ;;  %v1686_v1 = vmul.f32 %v1632_v41, %v1478_v15  ;;  %v2126_v6 = vld [vmem:[%s5041_s2 + $0x40] sm:$0xff]  ;;  %v2127_v15 = vld [vmem:[%s5041_s2 + $0x48] sm:$0xff]  ;;  %v1756_v41 = vmul.f32 %v5324_v30, %v5362_v11  ;;  %v1441_v12 = vsub.f32 %v5305_v61, %v5363_v31 }
 0x252   : > { %v1621_v34 = vpop.permute.xlu1 %1620  ;;  %v2540_v24 = vpack.c.bf16 %v2127_v15, %v2126_v6  ;;  %v5367_v11 = vld [vmem:[#allocation24_spill] sm:$0xff] }
 0x253   : > { %v1718_v63 = vadd.f32 %v1686_v1, %v5359_v36  ;;  %v1703_v13 = vmul.f32 %v1621_v34, %v1495_v42  ;;  %1872 = vrot.lane.b32.xlu1 %v1719_v37, %s2886_s28  ;;  %v1619_v46 = vpop.permute.xlu0 %1618  ;;  %v5364_v1 = vld [vmem:[#allocation32_spill] sm:$0xff]  ;;  %v1481_v3 = vmul.f32 %v5313_v56, %v1441_v12  ;;  %v1749_v12 = vmul.f32 %v5324_v30, %v5320_v44 }
 0x254   : > { %v1640_v14 = vsel %vm789_vm4, %v1619_v46, %v1621_v34  ;;  %2541 = vmatpush1.bf16.msra.mxu0 %v2540_v24  ;;  %2567 = vmatpush1.bf16.msra.mxu1 %v2540_v24  ;;  %v1440_v42 = vsub.f32 %v5309_v62, %v5364_v1  ;;  %v2543_v34 = vpack.c.bf16 %v2129_v45, %v2128_v19  ;;  %v5366_v46 = vld [vmem:[#allocation9_spill] sm:$0xff]  ;;  %v2132_v24 = vld [vmem:[%s5041_s2 + $0x70] sm:$0xff] }
 0x255   : > { %v1735_v5 = vadd.f32 %v1703_v13, %v5360_v29  ;;  %v1702_v40 = vmul.f32 %v1640_v14, %v1494_v21  ;;  %1870 = vrot.lane.b32.xlu0 %v1718_v63, %s2886_s28  ;;  %v4682_v32 = vmul.f32 %v1748_v58, %v1718_v63  ;;  %2542 = vmatprep.subr.bf16.mxu0 %v2888_v8  ;;  %v5365_v58 = vld [vmem:[#allocation79_spill] sm:$0xff]  ;;  %v2130_v29 = vld [vmem:[%s5041_s2 + $0x60] sm:$0xff] }
 0x256   : > { %2559 = vmatprep.subr.bf16.mxu1 %v2888_v8  ;;  %v1457_v33 = vsub.f32 %v5305_v61, %v5365_v58  ;;  %v1480_v13 = vmul.f32 %v5316_v9, %v1440_v42  ;;  %v1456_v14 = vsub.f32 %v5309_v62, %v5366_v46  ;;  %v2131_v61 = vld [vmem:[%s5041_s2 + $0x68] sm:$0xff] }
 0x257   : > { %v1734_v16 = vadd.f32 %v1702_v40, %v5361_v59  ;;  %1904 = vrot.lane.b32.xlu1 %v1735_v5, %s2886_s28  ;;  %v2546_v40 = vpack.c.bf16 %v2131_v61, %v2130_v29  ;;  %v2133_v59 = vld [vmem:[%s5041_s2 + $0x78] sm:$0xff]  ;;  %v1757_v61 = vmul.f32 %v5324_v30, %v5322_v48 }
 0x258   : > { %2544 = vmatpush1.bf16.msra.mxu0 %v2543_v34  ;;  %2568 = vmatpush1.bf16.msra.mxu1 %v2543_v34  ;;  %v1497_v62 = vmul.f32 %v5313_v56, %v1457_v33  ;;  %v1496_v19 = vmul.f32 %v5316_v9, %v1456_v14  ;;  %v2135_v9 = vld [vmem:[%s5041_s2 + $0x88] sm:$0xff] }
 0x259   : > { %1902 = vrot.lane.b32.xlu0 %v1734_v16, %s2886_s28  ;;  %v4699_v37 = vmul.f32 %v1756_v41, %v1734_v16  ;;  %2545 = vmatprep.subr.bf16.mxu0 %v2888_v8  ;;  %v5368_v41 = vld [vmem:[#allocation11_spill] sm:$0xff] }
 0x25a   : > { %2560 = vmatprep.subr.bf16.mxu1 %v2888_v8  ;;  %v1762_v31 = vsub.f32 %v5368_v41, %v5367_v11  ;;  %v1763_v48 = vsub.f32 %v5368_v41, %v5325_v27 }
 0x25c   : > { %2547 = vmatpush1.bf16.msra.mxu0 %v2546_v40  ;;  %2569 = vmatpush1.bf16.msra.mxu1 %v2546_v40 }
 0x25d   : > { %2548 = vmatprep.subr.bf16.mxu0 %v2888_v8  ;;  %2561 = vmatprep.subr.bf16.mxu1 %v2888_v8 }
 0x25e   : > { %v1593_v36 = vpop.permute.xlu1 %1592 }
 0x25f   : > { %v1689_v63 = vmul.f32 %v1593_v36, %v1481_v3  ;;  %v1591_v21 = vpop.permute.xlu0 %1590 }
 0x260   : > { %v1633_v5 = vsel %vm789_vm4, %v1591_v21, %v1593_v36  ;;  %v5369_v36 = vld [vmem:[#allocation23_spill] sm:$0xff]  ;;  %v5370_v21 = vld [vmem:[#allocation13_spill] sm:$0xff] }
 0x261   : > { %v1721_v6 = vadd.f32 %v1689_v63, %v4456_v17  ;;  %v1688_v15 = vmul.f32 %v1633_v5, %v1480_v13  ;;  %v2549_v17 = vpack.c.bf16 %v2133_v59, %v2132_v24  ;;  %v1770_v63 = vsub.f32 %v5368_v41, %v5369_v36 }
 0x262   : > { %v1625_v16 = vpop.permute.xlu1 %1624  ;;  %v1782_v14 = vmul.f32 %v5370_v21, %v1762_v31  ;;  %v1783_v11 = vmul.f32 %v5370_v21, %v1763_v48 }
 0x263   : > { %v1720_v56 = vadd.f32 %v1688_v15, %v4466_v4  ;;  %v1705_v42 = vmul.f32 %v1625_v16, %v1497_v62  ;;  %1876 = vrot.lane.b32.xlu1 %v1721_v6, %s2886_s28  ;;  %v1623_v45 = vpop.permute.xlu0 %1622  ;;  %v2134_v4 = vld [vmem:[%s5041_s2 + $0x80] sm:$0xff]  ;;  %2550 = vmatpush1.bf16.msra.mxu0 %v2549_v17  ;;  %v1790_v62 = vmul.f32 %v5370_v21, %v1770_v63 }
 0x264   : > { %v1641_v34 = vsel %vm789_vm4, %v1623_v45, %v1625_v16  ;;  %2570 = vmatpush1.bf16.msra.mxu1 %v2549_v17  ;;  %2551 = vmatprep.subr.bf16.mxu0 %v2888_v8 }
 0x265   : > { %v1737_v3 = vadd.f32 %v1705_v42, %v4452_v57  ;;  %v1704_v44 = vmul.f32 %v1641_v34, %v1496_v19  ;;  %1874 = vrot.lane.b32.xlu0 %v1720_v56, %s2886_s28  ;;  %v4746_v58 = vmul.f32 %v1749_v12, %v1720_v56  ;;  %v2552_v57 = vpack.c.bf16 %v2135_v9, %v2134_v4 }
 0x266   : > { %v1849_v33 = vpop.permute.xlu1 %1848  ;;  %2562 = vmatprep.subr.bf16.mxu1 %v2888_v8 }
 0x267   : > { %v1736_v13 = vadd.f32 %v1704_v44, %v4458_v22  ;;  %1908 = vrot.lane.b32.xlu1 %v1737_v3, %s2886_s28  ;;  %v1847_v29 = vpop.permute.xlu0 %1846  ;;  %2553 = vmatpush1.bf16.msra.mxu0 %v2552_v57 }
 0x268   : > { %v1910_v5 = vsel %vm789_vm4, %v1847_v29, %v1849_v33  ;;  %2571 = vmatpush1.bf16.msra.mxu1 %v2552_v57 }
 0x269   : > { %v1942_v40 = vmul.f32 %v1910_v5, %v1782_v14  ;;  %1906 = vrot.lane.b32.xlu0 %v1736_v13, %s2886_s28  ;;  %v4765_v6 = vmul.f32 %v1757_v61, %v1736_v13 }
 0x26a   : > { %v1881_v22 = vpop.permute.xlu1 %1880 }
 0x26b   : > { %v1958_v15 = vadd.f32 %v1942_v40, %v4473_v38  ;;  %v1879_v24 = vpop.permute.xlu0 %1878  ;;  %v1771_v38 = vsub.f32 %v5368_v41, %v5328_v60 }
 0x26c   : > { %v1918_v30 = vsel %vm789_vm4, %v1879_v24, %v1881_v22 }
 0x26d   : > { %v1950_v59 = vmul.f32 %v1918_v30, %v1790_v62  ;;  %1990 = vrot.lane.b32.xlu0 %v1958_v15, %s2881_s9  ;;  %v1791_v42 = vmul.f32 %v5370_v21, %v1771_v38 }
 0x26e   : > { %v1853_v8 = vpop.permute.xlu1 %1852 }
 0x26f   : > { %v1966_v16 = vadd.f32 %v1950_v59, %v4488_v50  ;;  %v1851_v31 = vpop.permute.xlu0 %1850  ;;  %v1764_v50 = vsub.f32 %v5368_v41, %v5331_v28 }
 0x270   : > { %v1911_v12 = vsel %vm789_vm4, %v1851_v31, %v1853_v8 }
 0x271   : > { %v1943_v17 = vmul.f32 %v1911_v12, %v1783_v11  ;;  %2006 = vrot.lane.b32.xlu1 %v1966_v16, %s2881_s9  ;;  %v1784_v44 = vmul.f32 %v5370_v21, %v1764_v50  ;;  %v1775_v50 = vsub.f32 %v5368_v41, %v5346_v20  ;;  %v4834_v20 = vld [vmem:[%s2988_s7] sm:$0xff] }
 0x272   : > { %v1885_v27 = vpop.permute.xlu1 %1884 }
 0x273   : > { %v1959_v56 = vadd.f32 %v1943_v17, %v4503_v55  ;;  %v1883_v19 = vpop.permute.xlu0 %1882  ;;  %v1772_v55 = vsub.f32 %v5368_v41, %v5334_v53 }
 0x274   : > { %v1919_v45 = vsel %vm789_vm4, %v1883_v19, %v1885_v27 }
 0x275   : > { %v1951_v34 = vmul.f32 %v1919_v45, %v1791_v42  ;;  %1992 = vrot.lane.b32.xlu0 %v1959_v56, %s2881_s9  ;;  %v1792_v63 = vmul.f32 %v5370_v21, %v1772_v55 }
 0x276   : > { %v1857_v60 = vpop.permute.xlu1 %1856 }
 0x277   : > { %v1967_v3 = vadd.f32 %v1951_v34, %v4518_v47  ;;  %v1855_v4 = vpop.permute.xlu0 %1854  ;;  %v1765_v47 = vsub.f32 %v5368_v41, %v3729_v23 }
 0x278   : > { %v1912_v9 = vsel %vm789_vm4, %v1855_v4, %v1857_v60 }
 0x279   : > { %v1944_v33 = vmul.f32 %v1912_v9, %v1784_v44  ;;  %2008 = vrot.lane.b32.xlu1 %v1967_v3, %s2881_s9  ;;  %v1785_v61 = vmul.f32 %v5370_v21, %v1765_v47  ;;  %v1795_v3 = vmul.f32 %v5370_v21, %v1775_v50  ;;  %v2457_v9 = vmul.f32 -1.442695, %v4834_v20 }
 0x27a   : > { %v1889_v28 = vpop.permute.xlu1 %1888 }
 0x27b   : > { %v1960_v36 = vadd.f32 %v1944_v33, %v4533_v0  ;;  %v1887_v57 = vpop.permute.xlu0 %1886  ;;  %v1773_v0 = vsub.f32 %v5368_v41, %v3726_v25  ;;  %v1766_v25 = vsub.f32 %v5368_v41, %v3821_v54  ;;  %2718 = vpow2.f32 %v2457_v9 }
 0x27c   : > { %v1920_v13 = vsel %vm789_vm4, %v1887_v57, %v1889_v28  ;;  %v4842_v28 = vld [vmem:[%s2988_s7 + $0x8] sm:$0xff] }
 0x27d   : > { %v1952_v14 = vmul.f32 %v1920_v13, %v1792_v63  ;;  %1994 = vrot.lane.b32.xlu0 %v1960_v36, %s2881_s9  ;;  %v1793_v62 = vmul.f32 %v5370_v21, %v1773_v0  ;;  %v1786_v8 = vmul.f32 %v5370_v21, %v1766_v25  ;;  %v2458_v36 = vmul.f32 -1.442695, %v4842_v28  ;;  %v4848_v57 = vld [vmem:[%s2988_s7 + $0x48] sm:$0xff]  ;;  %v4856_v0 = vld [vmem:[%s2988_s7 + $0x10] sm:$0xff] }
 0x27e   : > { %v1861_v53 = vpop.permute.xlu1 %1860  ;;  %v2466_v47 = vmul.f32 -1.442695, %v4848_v57 }
 0x27f   : > { %v1968_v29 = vadd.f32 %v1952_v14, %v4546_v52  ;;  %v1859_v5 = vpop.permute.xlu0 %1858 }
 0x280   : > { %v1913_v40 = vsel %vm789_vm4, %v1859_v5, %v1861_v53  ;;  %v1776_v53 = vsub.f32 %v5368_v41, %v5356_v51 }
 0x281   : > { %v1945_v22 = vmul.f32 %v1913_v40, %v1785_v61  ;;  %2010 = vrot.lane.b32.xlu1 %v1968_v29, %s2881_s9 }
 0x282   : > { %v1893_v23 = vpop.permute.xlu1 %1892 }
 0x283   : > { %v1961_v15 = vadd.f32 %v1945_v22, %v4556_v18  ;;  %v1891_v24 = vpop.permute.xlu0 %1890  ;;  %v1774_v18 = vsub.f32 %v5368_v41, %v5336_v2  ;;  %v1767_v2 = vsub.f32 %v5368_v41, %v5344_v43 }
 0x284   : > { %v1921_v48 = vsel %vm789_vm4, %v1891_v24, %v1893_v23  ;;  %v1796_v23 = vmul.f32 %v5370_v21, %v1776_v53 }
 0x285   : > { %v1953_v52 = vmul.f32 %v1921_v48, %v1793_v62  ;;  %1996 = vrot.lane.b32.xlu0 %v1961_v15, %s2881_s9  ;;  %v2719_v29 = vpop.eup %2718 }
 0x286   : > { %v271_v62 = vadd.f32 1.0, %v2719_v29 }
 0x287   : > { %v1969_v30 = vadd.f32 %v1953_v52, %v4563_v39  ;;  %v1794_v39 = vmul.f32 %v5370_v21, %v1774_v18  ;;  %v4864_v52 = vld [vmem:[%s2988_s7 + $0x50] sm:$0xff]  ;;  %v1769_v18 = vsub.f32 %v5368_v41, %v5364_v1 }
 0x289   : > { %2012 = vrot.lane.b32.xlu1 %v1969_v30, %s2881_s9  ;;  %v2467_v30 = vmul.f32 -1.442695, %v4864_v52 }
 0x28e   : > { %v1865_v59 = vpop.permute.xlu1 %1864 }
 0x290   : > { %v1863_v16 = vpop.permute.xlu0 %1862 }
 0x291   : > { %v1914_v11 = vsel %vm789_vm4, %v1863_v16, %v1865_v59 }
 0x292   : > { %v1946_v31 = vmul.f32 %v1914_v11, %v1786_v8  ;;  %v1897_v12 = vpop.permute.xlu1 %1896  ;;  %v4870_v8 = vld [vmem:[%s2988_s7 + $0x18] sm:$0xff] }
 0x293   : > { %v2460_v16 = vmul.f32 -1.442695, %v4870_v8 }
 0x294   : > { %v1962_v38 = vadd.f32 %v1946_v31, %v4590_v49  ;;  %v1895_v17 = vpop.permute.xlu0 %1894  ;;  %v1787_v49 = vmul.f32 %v5370_v21, %v1767_v2 }
 0x295   : > { %v1922_v27 = vsel %vm789_vm4, %v1895_v17, %v1897_v12  ;;  %v4876_v12 = vld [vmem:[%s2988_s7 + $0x58] sm:$0xff] }
 0x296   : > { %v1954_v56 = vmul.f32 %v1922_v27, %v1794_v39  ;;  %1998 = vrot.lane.b32.xlu0 %v1962_v38, %s2881_s9  ;;  %v1789_v39 = vmul.f32 %v5370_v21, %v1769_v18  ;;  %v1777_v27 = vsub.f32 %v5368_v41, %v5366_v46 }
 0x298   : > { %v1970_v54 = vadd.f32 %v1954_v56, %v4597_v7  ;;  %v1797_v50 = vmul.f32 %v5370_v21, %v1777_v27 }
 0x29a   : > { %2014 = vrot.lane.b32.xlu1 %v1970_v54, %s2881_s9 }
 0x2a9   : > { %v1869_v42 = vpop.permute.xlu1 %1868 }
 0x2ab   : > { %v1867_v19 = vpop.permute.xlu0 %1866 }
 0x2ac   : > { %v1915_v45 = vsel %vm789_vm4, %v1867_v19, %v1869_v42 }
 0x2ad   : > { %v1947_v34 = vmul.f32 %v1915_v45, %v1787_v49  ;;  %v1901_v60 = vpop.permute.xlu1 %1900 }
 0x2af   : > { %v1963_v7 = vadd.f32 %v1947_v34, %v4622_v26  ;;  %v1899_v44 = vpop.permute.xlu0 %1898  ;;  %v4838_v26 = vld [vmem:[%s2988_s7 + $0x40] sm:$0xff] }
 0x2b0   : > { %v1923_v43 = vsel %vm789_vm4, %v1899_v44, %v1901_v60  ;;  %v2465_v33 = vmul.f32 -1.442695, %v4838_v26 }
 0x2b1   : > { %v1955_v4 = vmul.f32 %v1923_v43, %v1795_v3  ;;  %2000 = vrot.lane.b32.xlu0 %v1963_v7, %s2881_s9 }
 0x2b2   : > { %2720 = vpow2.f32 %v2465_v33 }
 0x2b3   : > { %v1971_v55 = vadd.f32 %v1955_v4, %v4629_v35  ;;  %v1768_v35 = vsub.f32 %v5368_v41, %v5354_v10  ;;  %2722 = vpow2.f32 %v2458_v36  ;;  %v2459_v10 = vmul.f32 -1.442695, %v4856_v0 }
 0x2b4   : > { %2724 = vpow2.f32 %v2466_v47 }
 0x2b5   : > { %2016 = vrot.lane.b32.xlu1 %v1971_v55, %s2881_s9  ;;  %v1788_v13 = vmul.f32 %v5370_v21, %v1768_v35  ;;  %2726 = vpow2.f32 %v2459_v10 }
 0x2b6   : > { %2728 = vrcp.f32 %v271_v62 }
 0x2b7   : > { %2730 = vpow2.f32 %v2467_v30 }
 0x2bc   : > { %v2721_v24 = vpop.eup %2720 }
 0x2bd   : > { %v279_v25 = vadd.f32 1.0, %v2721_v24  ;;  %v2723_v59 = vpop.eup %2722 }
 0x2be   : > { %v272_v11 = vadd.f32 1.0, %v2723_v59  ;;  %v2725_v31 = vpop.eup %2724 }
 0x2bf   : > { %2732 = vrcp.f32 %v279_v25  ;;  %v280_v56 = vadd.f32 1.0, %v2725_v31  ;;  %v2727_v54 = vpop.eup %2726 }
 0x2c0   : > { %2734 = vpow2.f32 %v2460_v16  ;;  %v2729_v2 = vpop.eup %2728  ;;  %v273_v34 = vadd.f32 1.0, %v2727_v54  ;;  %v2794_v54 = vld [vmem:[%s2988_s7 + $0x28] sm:$0xff] }
 0x2c1   : > { %2736 = vrcp.f32 %v272_v11  ;;  %v2731_v7 = vpop.eup %2730  ;;  %v319_v41 = vmul.f32 %v4834_v20, %v2729_v2  ;;  %v4894_v20 = vld [vmem:[%s2988_s7 + $0x20] sm:$0xff] }
 0x2c2   : > { %v2461_v33 = vmul.f32 -1.442695, %v4894_v20 }
 0x2c5   : > { %v1873_v63 = vpop.permute.xlu1 %1872 }
 0x2c7   : > { %v1871_v14 = vpop.permute.xlu0 %1870 }
 0x2c8   : > { %v1916_v61 = vsel %vm789_vm4, %v1871_v14, %v1873_v63 }
 0x2c9   : > { %v1948_v5 = vmul.f32 %v1916_v61, %v1788_v13  ;;  %v1905_v22 = vpop.permute.xlu1 %1904  ;;  %v2733_v60 = vpop.eup %2732 }
 0x2ca   : > { %v2735_v4 = vpop.eup %2734  ;;  %v327_v55 = vmul.f32 %v4838_v26, %v2733_v60  ;;  %v4901_v26 = vld [vmem:[%s2988_s7 + $0x60] sm:$0xff] }
 0x2cb   : > { %v1964_v40 = vadd.f32 %v1948_v5, %v4682_v32  ;;  %v1903_v15 = vpop.permute.xlu0 %1902  ;;  %v2737_v9 = vpop.eup %2736  ;;  %v2469_v14 = vmul.f32 -1.442695, %v4901_v26 }
 0x2cc   : > { %v1924_v51 = vsel %vm789_vm4, %v1903_v15, %v1905_v22  ;;  %v320_v47 = vmul.f32 %v4842_v28, %v2737_v9 }
 0x2cd   : > { %v1956_v48 = vmul.f32 %v1924_v51, %v1796_v23  ;;  %2002 = vrot.lane.b32.xlu0 %v1964_v40, %s2881_s9 }
 0x2cf   : > { %v1972_v32 = vadd.f32 %v1956_v48, %v4699_v37  ;;  %v2468_v37 = vmul.f32 -1.442695, %v4876_v12 }
 0x2d1   : > { %2018 = vrot.lane.b32.xlu1 %v1972_v32, %s2881_s9  ;;  %2738 = vpow2.f32 %v2468_v37 }
 0x2d2   : > { %2740 = vrcp.f32 %v280_v56 }
 0x2d3   : > { %2742 = vrcp.f32 %v273_v34 }
 0x2d5   : > { %v1877_v38 = vpop.permute.xlu1 %1876 }
 0x2d7   : > { %v1875_v17 = vpop.permute.xlu0 %1874 }
 0x2d8   : > { %v1917_v1 = vsel %vm789_vm4, %v1875_v17, %v1877_v38 }
 0x2d9   : > { %v1949_v42 = vmul.f32 %v1917_v1, %v1789_v39  ;;  %v1909_v19 = vpop.permute.xlu1 %1908  ;;  %v2462_v1 = vmul.f32 -1.442695, %v2794_v54 }
 0x2db   : > { %v1965_v49 = vadd.f32 %v1949_v42, %v4746_v58  ;;  %v1907_v45 = vpop.permute.xlu0 %1906  ;;  %v281_v58 = vadd.f32 1.0, %v2731_v7  ;;  %v2739_v35 = vpop.eup %2738 }
 0x2dc   : > { %v1925_v46 = vsel %vm789_vm4, %v1907_v45, %v1909_v19  ;;  %v2741_v13 = vpop.eup %2740  ;;  %v282_v61 = vadd.f32 1.0, %v2739_v35 }
 0x2dd   : > { %v1957_v3 = vmul.f32 %v1925_v46, %v1797_v50  ;;  %2004 = vrot.lane.b32.xlu0 %v1965_v49, %s2881_s9  ;;  %2744 = vrcp.f32 %v281_v58  ;;  %v328_v10 = vmul.f32 %v4848_v57, %v2741_v13  ;;  %v2743_v40 = vpop.eup %2742 }
 0x2de   : > { %2746 = vpow2.f32 %v2461_v33  ;;  %v321_v15 = vmul.f32 %v4856_v0, %v2743_v40  ;;  %v2797_v33 = vld [vmem:[%s2988_s7 + $0x70] sm:$0xff] }
 0x2df   : > { %v1973_v44 = vadd.f32 %v1957_v3, %v4765_v6  ;;  %v1991_v43 = vpop.permute.xlu0 %1990  ;;  %v274_v6 = vadd.f32 1.0, %v2735_v4 }
 0x2e0   : > { %v2038_v21 = vsel %vm687_vm0, %v319_v41, %v1991_v43  ;;  %2055 = vst.msk [vmem:[#allocation2 + $0x8] sm:$0xff] %vm687_vm0, %v1991_v43 }
 0x2e1   : > { %2020 = vrot.lane.b32.xlu1 %v1973_v44, %s2881_s9  ;;  %2748 = vrcp.f32 %v274_v6 }
 0x2e2   : > { %2750 = vpow2.f32 %v2469_v14 }
 0x2e3   : > { %v2007_v36 = vpop.permute.xlu1 %2006  ;;  %2752 = vrcp.f32 %v282_v61 }
 0x2e4   : > { %v2046_v63 = vsel %vm687_vm0, %v327_v55, %v2007_v36  ;;  %2071 = vst.msk [vmem:[#allocation2 + $0x88] sm:$0xff] %vm687_vm0, %v2007_v36  ;;  %v2796_v55 = vld [vmem:[%s2988_s7 + $0x30] sm:$0xff]  ;;  %v2471_v36 = vmul.f32 -1.442695, %v2797_v33 }
 0x2e5   : > { %v2463_v9 = vmul.f32 -1.442695, %v2796_v55 }
 0x2e7   : > { %v1993_v53 = vpop.permute.xlu0 %1992  ;;  %v2087_v29 = vld [vmem:[#allocation2 + $0x8] sm:$0xff]  ;;  %v2745_v62 = vpop.eup %2744 }
 0x2e8   : > { %v2039_v5 = vsel %vm687_vm0, %v320_v47, %v1993_v53  ;;  %2057 = vst.msk [vmem:[#allocation2 + $0x18] sm:$0xff] %vm687_vm0, %v1993_v53  ;;  %2505 = vmatprep.mubr.msk.f32.mxu0 %vm687_vm0, %v2087_v29  ;;  %v2747_v48 = vpop.eup %2746  ;;  %v329_v30 = vmul.f32 %v4864_v52, %v2745_v62  ;;  %v2798_v29 = vld [vmem:[%s2988_s7 + $0x38] sm:$0xff] }
 0x2e9   : > { %2250 = vmatmul.mubr.f32.vlgmr.msra.gmra.mrb[0].mxu0 %v2038_v21  ;;  %v275_v16 = vadd.f32 1.0, %v2747_v48  ;;  %v2464_v61 = vmul.f32 -1.442695, %v2798_v29 }
 0x2eb   : > { %v2009_v28 = vpop.permute.xlu1 %2008  ;;  %v2103_v22 = vld [vmem:[#allocation2 + $0x88] sm:$0xff]  ;;  %v2749_v32 = vpop.eup %2748  ;;  %2754 = vrcp.f32 %v275_v16 }
 0x2ec   : > { %v2047_v23 = vsel %vm687_vm0, %v328_v10, %v2009_v28  ;;  %2073 = vst.msk [vmem:[#allocation2 + $0x98] sm:$0xff] %vm687_vm0, %v2009_v28  ;;  %2513 = vmatprep.mubr.msk.f32.mxu1 %vm687_vm0, %v2103_v22  ;;  %v2751_v18 = vpop.eup %2750  ;;  %v322_v11 = vmul.f32 %v4870_v8, %v2749_v32  ;;  %v2799_v28 = vld [vmem:[%s2988_s7 + $0x78] sm:$0xff] }
 0x2ed   : > { %2290 = vmatmul.mubr.f32.vlgmr.msra.gmra.mrb[0].mxu1 %v2046_v63  ;;  %v2753_v31 = vpop.eup %2752  ;;  %v283_v52 = vadd.f32 1.0, %v2751_v18  ;;  %v2472_v22 = vmul.f32 -1.442695, %v2799_v28 }
 0x2ee   : > { %v330_v17 = vmul.f32 %v4876_v12, %v2753_v31  ;;  %v2795_v12 = vld [vmem:[%s2988_s7 + $0x68] sm:$0xff]  ;;  %s189_s7 = sand.u32 1, %s2862_s13  }
 0x2ef   : > { %v1995_v24 = vpop.permute.xlu0 %1994  ;;  %v2089_v51 = vld [vmem:[#allocation2 + $0x18] sm:$0xff]  ;;  %2756 = vrcp.f32 %v283_v52  ;;  %v2470_v49 = vmul.f32 -1.442695, %v2795_v12  ;;  %s2454_s9 = sshll.u32 %s189_s7, 7  ;;  %s4993_s5 = scalar_lea.sflag [#allocation4], %s189_s7 }
 0x2f0   : > { %v2040_v57 = vsel %vm687_vm0, %v321_v15, %v1995_v24  ;;  %2059 = vst.msk [vmem:[#allocation2 + $0x28] sm:$0xff] %vm687_vm0, %v1995_v24  ;;  %2506 = vmatprep.mubr.msk.f32.mxu0 %vm687_vm0, %v2089_v51  ;;  %2758 = vpow2.f32 %v2462_v1  ;;  %s4964_s28 = scalar_lea.vmem [#allocation3], %s2454_s9 }
 0x2f1   : > { %2255 = vmatmul.mubr.f32.gmra.mrb[2].mxu0 %v2039_v5  ;;  %2760 = vpow2.f32 %v2470_v49  ;;  %s2361_s27 = sshll.u32 %s4964_s28, 4  ;;  %s4988_s27 = int_to_ptr.vmem [resolvable:$true] %s2361_s27 }
 0x2f2   : > { %s2800_s15 = scalar_lea.vmem %s4988_s27, 2048  ;;  %p2807_p1 = scmp.lt.s32.totalorder %s4988_s27, %s2805_s8 }
 0x2f3   : > { %v2011_v25 = vpop.permute.xlu1 %2010  ;;  %v2105_v59 = vld [vmem:[#allocation2 + $0x98] sm:$0xff]  ;;  %p2801_p12 = scmp.ne.s32.totalorder %s4988_s27, %s2800_s15  ;;  %p2808_p2 = scmp.lt.s32.totalorder %s2806_s10, %s2800_s15 }
 0x2f4   : > { %v2048_v0 = vsel %vm687_vm0, %v329_v30, %v2011_v25  ;;  %2075 = vst.msk [vmem:[#allocation2 + $0xa8] sm:$0xff] %vm687_vm0, %v2011_v25  ;;  %2514 = vmatprep.mubr.msk.f32.mxu1 %vm687_vm0, %v2105_v59 }
 0x2f5   : > { %2295 = vmatmul.mubr.f32.gmra.mrb[2].mxu1 %v2047_v23  ;;  %v2755_v42 = vpop.eup %2754  ;;  %p2802_p13 = pnand %p2801_p12, %p2952_p4  ;;  %p2809_p3 = por %p2808_p2, %p2807_p1 }
 0x2f6   : > { %v323_v50 = vmul.f32 %v4894_v20, %v2755_v42 }
 0x2f7   : > { %v1997_v38 = vpop.permute.xlu0 %1996  ;;  %v2091_v37 = vld [vmem:[#allocation2 + $0x28] sm:$0xff]  ;;  %p2803_p0 = pneg %p2802_p13 }
 0x2f8   : > { %v2041_v39 = vsel %vm687_vm0, %v322_v11, %v1997_v38  ;;  %2061 = vst.msk [vmem:[#allocation2 + $0x38] sm:$0xff] %vm687_vm0, %v1997_v38  ;;  %2507 = vmatprep.mubr.msk.f32.mxu0 %vm687_vm0, %v2091_v37 }
 0x2f9   : > { %2260 = vmatmul.mubr.f32.gmra.mrb[4].mxu0 %v2040_v57  ;;  %v2757_v45 = vpop.eup %2756  ;;  %p2810_p5 = pnand %p2809_p3, %p2803_p0 }
 0x2fa   : > { %v331_v46 = vmul.f32 %v4901_v26, %v2757_v45  ;;  %v2759_v60 = vpop.eup %2758 }
 0x2fb   : > { %v2013_v27 = vpop.permute.xlu1 %2012  ;;  %v2107_v56 = vld [vmem:[#allocation2 + $0xa8] sm:$0xff]  ;;  %v276_v43 = vadd.f32 1.0, %v2759_v60  ;;  %v2761_v58 = vpop.eup %2760 }
 0x2fc   : > { %v2049_v8 = vsel %vm687_vm0, %v330_v17, %v2013_v27  ;;  %2077 = vst.msk [vmem:[#allocation2 + $0xb8] sm:$0xff] %vm687_vm0, %v2013_v27  ;;  %2515 = vmatprep.mubr.msk.f32.mxu1 %vm687_vm0, %v2107_v56  ;;  %v284_v21 = vadd.f32 1.0, %v2761_v58 }
 0x2fd   : > { %2300 = vmatmul.mubr.f32.gmra.mrb[4].mxu1 %v2048_v0  ;;  %2762 = vrcp.f32 %v276_v43 }
 0x2fe   : > { %2764 = vrcp.f32 %v284_v21 }
 0x2ff   : > { %v2093_v2 = vld [vmem:[#allocation2 + $0x38] sm:$0xff]  ;;  %2766 = vpow2.f32 %v2463_v9 }
 0x300   : > { %2508 = vmatprep.mubr.msk.f32.mxu0 %vm687_vm0, %v2093_v2  ;;  %2768 = vpow2.f32 %v2471_v36 }
 0x301   : > { %2265 = vmatmul.mubr.f32.gmra.mrb[6].mxu0 %v2041_v39  ;;  %2770 = vpow2.f32 %v2464_v61 }
 0x303   : > { %v2109_v19 = vld [vmem:[#allocation2 + $0xb8] sm:$0xff] }
 0x304   : > { %2516 = vmatprep.mubr.msk.f32.mxu1 %vm687_vm0, %v2109_v19 }
 0x305   : > { %2305 = vmatmul.mubr.f32.gmra.mrb[6].mxu1 %v2049_v8 }
 0x307   : > { %v2763_v20 = vpop.eup %2762 }
 0x308   : > { %v1999_v34 = vpop.permute.xlu0 %1998  ;;  %v324_v6 = vmul.f32 %v2794_v54, %v2763_v20  ;;  %v2765_v35 = vpop.eup %2764 }
 0x309   : > { %v2042_v7 = vsel %vm687_vm0, %v323_v50, %v1999_v34  ;;  %2063 = vst.msk [vmem:[#allocation2 + $0x48] sm:$0xff] %vm687_vm0, %v1999_v34  ;;  %v332_v13 = vmul.f32 %v2795_v12, %v2765_v35  ;;  %v2767_v14 = vpop.eup %2766 }
 0x30a   : > { %v277_v10 = vadd.f32 1.0, %v2767_v14  ;;  %v2769_v40 = vpop.eup %2768 }
 0x30b   : > { %v285_v15 = vadd.f32 1.0, %v2769_v40  ;;  %v2771_v62 = vpop.eup %2770 }
 0x30c   : > { %v2015_v41 = vpop.permute.xlu1 %2014  ;;  %2772 = vrcp.f32 %v277_v10  ;;  %v278_v51 = vadd.f32 1.0, %v2771_v62 }
 0x30d   : > { %v2050_v3 = vsel %vm687_vm0, %v331_v46, %v2015_v41  ;;  %2079 = vst.msk [vmem:[#allocation2 + $0xc8] sm:$0xff] %vm687_vm0, %v2015_v41  ;;  %2774 = vpow2.f32 %v2472_v22 }
 0x30e   : > { %2776 = vrcp.f32 %v285_v15 }
 0x30f   : > { %2778 = vrcp.f32 %v278_v51 }
 0x310   : > { %v2095_v44 = vld [vmem:[#allocation2 + $0x48] sm:$0xff] }
 0x311   : > { %2509 = vmatprep.mubr.msk.f32.mxu0 %vm687_vm0, %v2095_v44 }
 0x312   : > { %2270 = vmatmul.mubr.f32.gmra.mrb[8].mxu0 %v2042_v7 }
 0x314   : > { %v2111_v4 = vld [vmem:[#allocation2 + $0xc8] sm:$0xff] }
 0x315   : > { %2517 = vmatprep.mubr.msk.f32.mxu1 %vm687_vm0, %v2111_v4 }
 0x316   : > { %2310 = vmatmul.mubr.f32.gmra.mrb[8].mxu1 %v2050_v3  ;;  %v2773_v24 = vpop.eup %2772 }
 0x317   : > { %v2775_v48 = vpop.eup %2774  ;;  %v325_v57 = vmul.f32 %v2796_v55, %v2773_v24 }
 0x318   : > { %v2777_v30 = vpop.eup %2776  ;;  %v286_v25 = vadd.f32 1.0, %v2775_v48 }
 0x319   : > { %v333_v16 = vmul.f32 %v2797_v33, %v2777_v30  ;;  %v2779_v31 = vpop.eup %2778 }
 0x31a   : > { %2780 = vrcp.f32 %v286_v25  ;;  %v326_v37 = vmul.f32 %v2798_v29, %v2779_v31 }
 0x323   : > { %v2001_v63 = vpop.permute.xlu0 %2000 }
 0x324   : > { %v2043_v47 = vsel %vm687_vm0, %v324_v6, %v2001_v63  ;;  %2065 = vst.msk [vmem:[#allocation2 + $0x58] sm:$0xff] %vm687_vm0, %v2001_v63  ;;  %v2781_v52 = vpop.eup %2780 }
 0x325   : > { %v334_v27 = vmul.f32 %v2799_v28, %v2781_v52 }
 0x327   : > { %v2017_v26 = vpop.permute.xlu1 %2016 }
 0x328   : > { %v2051_v53 = vsel %vm687_vm0, %v332_v13, %v2017_v26  ;;  %2081 = vst.msk [vmem:[#allocation2 + $0xd8] sm:$0xff] %vm687_vm0, %v2017_v26 }
 0x32b   : > { %v2097_v5 = vld [vmem:[#allocation2 + $0x58] sm:$0xff] }
 0x32c   : > { %2510 = vmatprep.mubr.msk.f32.mxu0 %vm687_vm0, %v2097_v5 }
 0x32d   : > { %2275 = vmatmul.mubr.f32.gmra.mrb[10].mxu0 %v2043_v47 }
 0x32f   : > { %v2113_v23 = vld [vmem:[#allocation2 + $0xd8] sm:$0xff] }
 0x330   : > { %2518 = vmatprep.mubr.msk.f32.mxu1 %vm687_vm0, %v2113_v23 }
 0x331   : > { %2315 = vmatmul.mubr.f32.gmra.mrb[10].mxu1 %v2051_v53 }
 0x33f   : > { %v2003_v32 = vpop.permute.xlu0 %2002 }
 0x340   : > { %v2044_v59 = vsel %vm687_vm0, %v325_v57, %v2003_v32  ;;  %2067 = vst.msk [vmem:[#allocation2 + $0x68] sm:$0xff] %vm687_vm0, %v2003_v32 }
 0x343   : > { %v2019_v18 = vpop.permute.xlu1 %2018 }
 0x344   : > { %v2052_v0 = vsel %vm687_vm0, %v333_v16, %v2019_v18  ;;  %2083 = vst.msk [vmem:[#allocation2 + $0xe8] sm:$0xff] %vm687_vm0, %v2019_v18 }
 0x347   : > { %v2099_v11 = vld [vmem:[#allocation2 + $0x68] sm:$0xff] }
 0x348   : > { %2511 = vmatprep.mubr.msk.f32.mxu0 %vm687_vm0, %v2099_v11 }
 0x349   : > { %2280 = vmatmul.mubr.f32.gmra.mrb[12].mxu0 %v2044_v59 }
 0x34b   : > { %v2115_v38 = vld [vmem:[#allocation2 + $0xe8] sm:$0xff] }
 0x34c   : > { %2519 = vmatprep.mubr.msk.f32.mxu1 %vm687_vm0, %v2115_v38 }
 0x34d   : > { %2320 = vmatmul.mubr.f32.gmra.mrb[12].mxu1 %v2052_v0 }
 0x34f   : > { %v2005_v39 = vpop.permute.xlu0 %2004 }
 0x350   : > { %v2045_v17 = vsel %vm687_vm0, %v326_v37, %v2005_v39  ;;  %2069 = vst.msk [vmem:[#allocation2 + $0x78] sm:$0xff] %vm687_vm0, %v2005_v39 }
 0x353   : > { %v2021_v56 = vpop.permute.xlu1 %2020 }
 0x354   : > { %v2053_v8 = vsel %vm687_vm0, %v334_v27, %v2021_v56  ;;  %2085 = vst.msk [vmem:[#allocation2 + $0xf8] sm:$0xff] %vm687_vm0, %v2021_v56 }
 0x357   : > { %v2101_v54 = vld [vmem:[#allocation2 + $0x78] sm:$0xff] }
 0x358   : > { %2512 = vmatprep.mubr.msk.f32.mxu0 %vm687_vm0, %v2101_v54 }
 0x359   : > { %2285 = vmatmul.mubr.f32.gmra.mrb[14].mxu0 %v2045_v17 }
 0x35b   : > { %v2117_v1 = vld [vmem:[#allocation2 + $0xf8] sm:$0xff] }
 0x35c   : > { %2520 = vmatprep.mubr.msk.f32.mxu1 %vm687_vm0, %v2117_v1 }
 0x35d   : > { %2325 = vmatmul.mubr.f32.gmra.mrb[14].mxu1 %v2053_v8 }
 0x3bc   : > { %v2251_v2 = vpop.f32.mrb[0].mxu0 }
 0x3bd   : > { %2330 = vst [vmem:[%s4964_s28] sm:$0xff] %v2251_v2  ;;  %v2253_v42 = vpop.f32.mrb[1].mxu0 }
 0x3c0   : > { %v2291_v12 = vpop.f32.mrb[0].mxu1 }
 0x3c1   : > { %2338 = vst [vmem:[%s4964_s28 + $0x40] sm:$0xff] %v2291_v12  ;;  %v2293_v49 = vpop.f32.mrb[1].mxu1 }
 0x3c4   : > { %v2256_v19 = vpop.f32.mrb[2].mxu0 }
 0x3c5   : > { %2331 = vst [vmem:[%s4964_s28 + $0x8] sm:$0xff] %v2256_v19  ;;  %v2258_v50 = vpop.f32.mrb[3].mxu0 }
 0x3c8   : > { %v2296_v45 = vpop.f32.mrb[2].mxu1 }
 0x3c9   : > { %2339 = vst [vmem:[%s4964_s28 + $0x48] sm:$0xff] %v2296_v45  ;;  %v2298_v34 = vpop.f32.mrb[3].mxu1 }
 0x3cc   : > { %v2261_v7 = vpop.f32.mrb[4].mxu0 }
 0x3cd   : > { %2332 = vst [vmem:[%s4964_s28 + $0x10] sm:$0xff] %v2261_v7  ;;  %v2263_v46 = vpop.f32.mrb[5].mxu0 }
 0x3d0   : > { %v2301_v41 = vpop.f32.mrb[4].mxu1 }
 0x3d1   : > { %2340 = vst [vmem:[%s4964_s28 + $0x50] sm:$0xff] %v2301_v41  ;;  %v2303_v60 = vpop.f32.mrb[5].mxu1 }
 0x3d4   : > { %v2266_v3 = vpop.f32.mrb[6].mxu0 }
 0x3d5   : > { %2333 = vst [vmem:[%s4964_s28 + $0x18] sm:$0xff] %v2266_v3  ;;  %v2268_v44 = vpop.f32.mrb[7].mxu0 }
 0x3d8   : > { %v2306_v43 = vpop.f32.mrb[6].mxu1 }
 0x3d9   : > { %2341 = vst [vmem:[%s4964_s28 + $0x58] sm:$0xff] %v2306_v43  ;;  %v2308_v58 = vpop.f32.mrb[7].mxu1 }
 0x3e5   : > { %v2271_v4 = vpop.f32.mrb[8].mxu0 }
 0x3e6   : > { %2334 = vst [vmem:[%s4964_s28 + $0x20] sm:$0xff] %v2271_v4  ;;  %v2273_v21 = vpop.f32.mrb[9].mxu0 }
 0x3e9   : > { %v2311_v55 = vpop.f32.mrb[8].mxu1 }
 0x3ea   : > { %2342 = vst [vmem:[%s4964_s28 + $0x60] sm:$0xff] %v2311_v55  ;;  %v2313_v9 = vpop.f32.mrb[9].mxu1 }
 0x400   : > { %v2276_v20 = vpop.f32.mrb[10].mxu0 }
 0x401   : > { %2335 = vst [vmem:[%s4964_s28 + $0x28] sm:$0xff] %v2276_v20  ;;  %v2278_v33 = vpop.f32.mrb[11].mxu0 }
 0x404   : > { %v2316_v36 = vpop.f32.mrb[10].mxu1 }
 0x405   : > { %2343 = vst [vmem:[%s4964_s28 + $0x68] sm:$0xff] %v2316_v36  ;;  %v2318_v6 = vpop.f32.mrb[11].mxu1 }
 0x41c   : > { %v2281_v35 = vpop.f32.mrb[12].mxu0 }
 0x41d   : > { %2336 = vst [vmem:[%s4964_s28 + $0x30] sm:$0xff] %v2281_v35  ;;  %v2283_v63 = vpop.f32.mrb[13].mxu0 }
 0x420   : > { %v2321_v47 = vpop.f32.mrb[12].mxu1 }
 0x421   : > { %2344 = vst [vmem:[%s4964_s28 + $0x70] sm:$0xff] %v2321_v47  ;;  %v2323_v13 = vpop.f32.mrb[13].mxu1 }
 0x42c   : > { %v2286_v26 = vpop.f32.mrb[14].mxu0 }
 0x42d   : > { %2337 = vst [vmem:[%s4964_s28 + $0x38] sm:$0xff] %v2286_v26  ;;  %v2288_v14 = vpop.f32.mrb[15].mxu0 }
 0x430   : > { %v2326_v53 = vpop.f32.mrb[14].mxu1 }
 0x431   : > { %2345 = vst [vmem:[%s4964_s28 + $0x78] sm:$0xff] %v2326_v53  ;;  %v2328_v29 = vpop.f32.mrb[15].mxu1 }
 0x432   : > { %2813 = shalt.err (!%p2810_p5)
}
 0x433   : > { %s2814_s11 = scalar_lea.hbm %s4986_s4, 2048  ;;  %s2818_s21 = scalar_lea.hbm %s5042_s3, 4096 }
 0x434   : > { %p2815_p6 = scmp.ne.s32.totalorder %s4986_s4, %s2814_s11  ;;  %p2819_p10 = scmp.lt.u32.totalorder %s4986_s4, %s5042_s3 }
 0x435   : > { %p2820_p11 = scmp.lt.u32.totalorder %s2818_s21, %s2814_s11  ;;  %p2822_p13 = scmp.lt.u32.totalorder %s2814_s11, %s4986_s4 }
 0x436   : > { %p2816_p7 = pnand %p2815_p6, %p2952_p4 }
 0x437   : > { %p2821_p12 = por %p2820_p11, %p2819_p10 }
 0x438   : > { %p2817_p9 = pneg %p2816_p7 }
 0x439   : > { %p2823_p0 = por %p2822_p13, %p2821_p12 }
 0x43b   : > { %p2824_p1 = pnand %p2823_p0, %p2817_p9 }
 0x43d   : > { %2827 = shalt.err (!%p2824_p1)
}
 0x43e   : > { %s2890_s9 = smov 128   ;;  %s2891_s28 = smov 8  }
 0x43f   : > { %2572 = dma.vmem_to_hbm [thread:$0]  (%p2952_p4), %s4988_s27, 2048, %s4986_s4, %s4993_s5, %s2890_s9, %s2890_s9, %s2891_s28  }
 0x440 PF: > { %p2578_p2 = scmp.ge.s32.totalorder %s2878_s17, 2  ;;  %s2376_s26 = sand.u32 1, %s2858_s12  }
 0x441   : > { %s2377_s29 = scalar_lea.sflag [#allocation4], %s2376_s26 }
 0x442   : > { %p2575_p3 = pnand %p2578_p2, %p2959_p8 }
 0x444   : > { %2853 = dma.done.wait (!%p2575_p3), %s2377_s29, 2048  }
 0x445   : > { %2855 = vsyncadd (!%p2575_p3), %s2377_s29, 4294965248  ;;  %s16_s17 = sadd.s32 1, %s2878_s17   ;;  %s5371_s12 = smov %s2862_s13 }
 0x446   : > { %p13_p5 = scmp.ge.s32.totalorder %s16_s17, 4   ;;  %s5372_s13 = smov %s2866_s14 }
 0x447   : > { %s5373_s14 = smov %s2965_s25  ;;  %s5374_s15 = smov %s2874_s16 }
 0x448   : > { %s5375_s16 = smov %s5377_s20  ;;  %15 = sbr.rel (!%p13_p5) target bundleno = 4 (0x4), region = 74 }
 0x44f   :  { %2382 = vsyncpa [#allocation4], 1 }
 0x450   :  { %2384 = vsyncpa [#allocation4 + $0x1], 1 }

</bundles_post_ra>
